<compile_context>
chip_gen: v6e
topology: v6e:2x2x1
jax: 0.10.0
libtpu: 0.0.40
codegen_flags: <defaults>
</compile_context>

<pallas_src>
import jax
import jax.numpy as jnp
import numpy as np
from jax.experimental import pallas as pl
from jax.experimental.pallas import tpu as pltpu

C = 64          # Conv1d out_channels (fixed by the module)
L = 64          # sequence length == input_dim (required for the module to be shape-consistent)
CP = C // 2     # channel pairs packed along lanes
LP = 2 * L      # packed lane width (128)


def make_spatial_attention_kernel(sub):
    """Kernel over one (bt, 128) batch tile, processed in sub-chunks of `sub` samples."""

    def kernel(x_ref, conv_ref, wbig_ref, bfc_ref, o_ref):
        # x_ref:    (bt, 128)      input row duplicated into both lane halves: [x | x]
        # conv_ref: (4, 32, 128)   packed conv taps w0, w1, w2 and bias per channel pair
        # wbig_ref: (128, 256)     [block_diag(fc_w.T, fc_w.T) | attn logit cols 128,129 | 0]
        # bfc_ref:  (1, 128)       [fc_bias | fc_bias]
        # o_ref:    (bt, 32, 128)  packed output block
        bt = x_ref.shape[0]
        trips = bt // sub

        # Loop-invariant loads / masks (hoisted: JAX does not CSE broadcast_in_dim).
        w0 = conv_ref[0]                                   # (CP, LP)
        w1 = conv_ref[1]
        w2 = conv_ref[2]
        cb = conv_ref[3]
        wbig = wbig_ref[...]                               # (LP, 2*LP)
        bfc3 = bfc_ref[...].reshape(1, 1, LP)              # (1, 1, LP)
        half = jax.lax.broadcasted_iota(jnp.int32, (1, 1, LP), 2) < L
        lane = jax.lax.broadcasted_iota(jnp.int32, (sub, LP), 1)
        lm = jnp.bitwise_and(lane, L - 1)                  # position within each 64-wide half
        zeros = jnp.zeros((sub, LP), jnp.float32)

        def body(i, carry):
            r0 = pl.multiple_of(i * sub, sub)
            x = x_ref[pl.ds(r0, sub), :]                   # (sub, LP)

            # Conv1d padding=1: zero-padded left/right neighbours per lane half.
            # (roll shift must be non-negative: LP-1 == roll by -1.)
            x_left = jnp.where(lm == 0, zeros, pltpu.roll(x, shift=1, axis=1))
            x_right = jnp.where(lm == L - 1, zeros, pltpu.roll(x, shift=LP - 1, axis=1))

            # h[b, c, l] = w[c,0]*x[l-1] + w[c,1]*x[l] + w[c,2]*x[l+1] + bconv[c] (packed)
            h3 = (w0[None, :, :] * x_left[:, None, :]
                  + w1[None, :, :] * x[:, None, :]
                  + w2[None, :, :] * x_right[:, None, :]
                  + cb[None, :, :])                        # (sub, CP, LP)

            hs = h3.reshape(sub * CP, LP)                  # free sublane merge
            # One MXU matmul does the fc for both packed channels AND the attention logits
            # (columns 128/129 of wbig); free extra columns on the 256-wide v6e/v7x MXU.
            res = jnp.dot(hs, wbig, preferred_element_type=jnp.float32)   # (sub*CP, 2*LP)
            g3 = res[:, :LP].reshape(sub, CP, LP)
            lg = res[:, LP:LP + 2].reshape(sub, CP, 2)
            le = lg[:, :, 0:1]                             # logits of even channels
            lo = lg[:, :, 1:2]                             # logits of odd channels

            # softmax over all 64 channels of each sample (battn dropped: softmax-invariant)
            m = jnp.max(jnp.maximum(le, lo), axis=1, keepdims=True)       # (sub, 1, 1)
            ee = jnp.exp(le - m)
            eo = jnp.exp(lo - m)
            s = jnp.sum(ee + eo, axis=1, keepdims=True)                   # (sub, 1, 1)
            inv = pl.reciprocal(s, approx=True)
            inv = inv * (2.0 - s * inv)                    # one Newton step -> ~f32 accuracy
            attn = jnp.where(half, ee * inv, eo * inv)     # (sub, CP, LP)

            # Fused epilogue: attn * h + (h @ fc_w.T + fc_b)
            o_ref[pl.ds(r0, sub), :, :] = attn * h3 + g3 + bfc3
            return carry

        jax.lax.fori_loop(0, trips, body, 0, unroll=(trips <= 4))

    return kernel


def spatial_attention_cnn(x, params, *, block_b=256, sub_b=8):
    """x: (B, input_dim) f32 -> (B, 64, input_dim) f32, matching PyTorch's (N, C, L)."""
    wconv, bconv, wattn, battn, wfc, bfc = params
    del battn  # softmax over channels is invariant to the scalar attention bias
    B, dim = x.shape
    assert dim == L, "PyTorch module requires input_dim == 64 to be shape-consistent"

    # Batch tile: multiple of sub_b, at most block_b; pad batch up to a multiple of it.
    bt = min(block_b, ((B + sub_b - 1) // sub_b) * sub_b)
    bt = max(sub_b, (bt // sub_b) * sub_b)
    Bp = ((B + bt - 1) // bt) * bt
    if Bp != B:
        x = jnp.pad(x, ((0, Bp - B), (0, 0)))

    # ---- wrapper-side layout packing (tiny, free XLA ops) -------------------------------
    x_pk = jnp.concatenate([x, x], axis=1)                          # (Bp, 128)  [x | x]

    # conv taps + bias: channel 2k in lanes 0:64, channel 2k+1 in lanes 64:128
    taps = jnp.concatenate([wconv, bconv[:, None]], axis=1)         # (64, 4): w0 w1 w2 b
    conv_pk = jnp.repeat(taps.T.reshape(4, CP, 2), L, axis=2)       # (4, 32, 128)

    # (128, 256) weight: block-diag fc weight in cols 0:128, attention-logit cols 128/129.
    wfct = wfc.T.astype(jnp.float32)                                # (64, 64): [l, j]
    wa = wattn.reshape(L).astype(jnp.float32)
    wbig = jnp.zeros((LP, 2 * LP), jnp.float32)
    wbig = wbig.at[:L, :L].set(wfct)
    wbig = wbig.at[L:, L:LP].set(wfct)
    wbig = wbig.at[:L, LP].set(wa)
    wbig = wbig.at[L:, LP + 1].set(wa)
    bfc_pk = jnp.concatenate([bfc, bfc]).reshape(1, LP)             # (1, 128)

    # VMEM budget for this tile (double-buffered x/out blocks + weights + in-loop scratch).
    out_blk = bt * CP * LP * 4
    x_blk = bt * LP * 4
    wt_bytes = (4 * CP * LP + LP * 2 * LP + LP) * 4
    vmem_limit = int(min(110 * 2 ** 20,
                         max(24 * 2 ** 20,
                             2 * (out_blk + x_blk + wt_bytes) + 8 * 2 ** 20)))

    out_pk = pl.pallas_call(
        make_spatial_attention_kernel(sub_b),
        out_shape=jax.ShapeDtypeStruct((Bp, CP, LP), jnp.float32),
        grid_spec=pltpu.PrefetchScalarGridSpec(
            num_scalar_prefetch=0,
            grid=(Bp // bt,),
            in_specs=[
                pl.BlockSpec((bt, LP), lambda b: (b, 0)),           # packed x (per batch block)
                pl.BlockSpec((4, CP, LP), lambda b: (0, 0, 0)),     # packed conv taps + bias
                pl.BlockSpec((LP, 2 * LP), lambda b: (0, 0)),       # fc + attn-logit weight
                pl.BlockSpec((1, LP), lambda b: (0, 0)),            # packed fc bias
            ],
            out_specs=pl.BlockSpec((bt, CP, LP), lambda b: (b, 0, 0)),
        ),
        compiler_params=pltpu.CompilerParams(
            dimension_semantics=("parallel",),
            vmem_limit_bytes=vmem_limit,
        ),
    )(x_pk, conv_pk, wbig, bfc_pk)

    # (Bp, 32, 128) row-major is bit-identical to (Bp, 64, 64) row-major: free reshape.
    return out_pk.reshape(Bp, C, L)[:B]


def ref_forward(x, params):
    """Pure-JAX reference mirroring the PyTorch forward exactly."""
    wconv, bconv, wattn, battn, wfc, bfc = params
    B, Ld = x.shape
    xpad = jnp.pad(x, ((0, 0), (1, 1)))
    windows = jnp.stack([xpad[:, 0:Ld], xpad[:, 1:Ld + 1], xpad[:, 2:Ld + 2]], axis=1)  # (B,3,L)
    h = jnp.einsum('ck,bkl->bcl', wconv, windows) + bconv[None, :, None]                # (B,C,L)
    logits = jnp.einsum('bcl,l->bc', h, wattn[0]) + battn[0]                            # (B,C)
    attn = jax.nn.softmax(logits, axis=1)[:, :, None]                                   # (B,C,1)
    f = jnp.einsum('bcl,jl->bcj', h, wfc) + bfc[None, None, :]                          # (B,C,L)
    return attn * h + f


if __name__ == "__main__":
    input_dim = 64   # forced by the module (Linear(64, .) applied over the length dim)

    key = jax.random.PRNGKey(0)
    ks = jax.random.split(key, 7)
    # Deterministic synthetic parameters (PyTorch-default-style uniform fan-in scaling).
    wconv = jax.random.uniform(ks[0], (C, 3), jnp.float32, -0.5, 0.5)        # Conv1d (64,1,3) squeezed
    bconv = jax.random.uniform(ks[1], (C,), jnp.float32, -0.5, 0.5)
    wattn = jax.random.uniform(ks[2], (1, 64), jnp.float32, -0.125, 0.125)   # Linear(64,1)
    battn = jax.random.uniform(ks[3], (1,), jnp.float32, -0.125, 0.125)
    wfc = jax.random.uniform(ks[4], (input_dim, 64), jnp.float32, -0.125, 0.125)  # Linear(64,input_dim)
    bfc = jax.random.uniform(ks[5], (input_dim,), jnp.float32, -0.125, 0.125)
    params = (wconv, bconv, wattn, battn, wfc, bfc)

    # Case 1: multi-step grid + rolled inner loop (batch tile 64 -> 3 grid steps, 8 sub-chunks).
    x1 = jax.random.normal(ks[6], (192, input_dim), jnp.float32)
    out1 = jax.block_until_ready(spatial_attention_cnn(x1, params, block_b=64))
    ref1 = ref_forward(x1, params)
    assert out1.shape == (192, C, input_dim)
    np.testing.assert_allclose(np.asarray(out1), np.asarray(ref1), rtol=5e-3, atol=5e-3)

    # Case 2: default (large) tile path with batch padding + unrolled short inner loop.
    x2 = x1[:10]
    out2 = jax.block_until_ready(spatial_attention_cnn(x2, params))
    ref2 = ref_forward(x2, params)
    assert out2.shape == (10, C, input_dim)
    np.testing.assert_allclose(np.asarray(out2), np.asarray(ref2), rtol=5e-3, atol=5e-3)

    print("KERNEL_OK")
</pallas_src>

<mosaic_0001>
module attributes {stable_mosaic.version = 11 : i64} {
  func.func @kernel(%arg0: i32, %arg1: memref<64x128xf32, #tpu.memory_space<vmem>>, %arg2: memref<4x32x128xf32, #tpu.memory_space<vmem>>, %arg3: memref<128x256xf32, #tpu.memory_space<vmem>>, %arg4: memref<1x128xf32, #tpu.memory_space<vmem>>, %arg5: memref<64x32x128xf32, #tpu.memory_space<vmem>>) attributes {dimension_semantics = [#tpu.dimension_semantics<parallel>], iteration_bounds = array<i64: 3>, scalar_prefetch = 0 : i64, scratch_operands = 0 : i64, tpu.core_type = #tpu.core_type<tc>, window_params = [{transform_indices = @transform_0, window_bounds = array<i64: 64, 128>}, {pipeline_mode = #tpu.pipeline_mode<synchronous>, transform_indices = @transform_1, window_bounds = array<i64: 4, 32, 128>}, {pipeline_mode = #tpu.pipeline_mode<synchronous>, transform_indices = @transform_2, window_bounds = array<i64: 128, 256>}, {pipeline_mode = #tpu.pipeline_mode<synchronous>, transform_indices = @transform_3, window_bounds = array<i64: 1, 128>}, {transform_indices = @transform_4, window_bounds = array<i64: 64, 32, 128>}]} {
    %c0 = arith.constant 0 : index
    %c0_0 = arith.constant 0 : index
    %c0_1 = arith.constant 0 : index
    %0 = vector.load %arg2[%c0, %c0_0, %c0_1] : memref<4x32x128xf32, #tpu.memory_space<vmem>>, vector<1x32x128xf32>
    %1 = vector.shape_cast %0 : vector<1x32x128xf32> to vector<32x128xf32>
    %c1 = arith.constant 1 : index
    %c0_2 = arith.constant 0 : index
    %c0_3 = arith.constant 0 : index
    %2 = vector.load %arg2[%c1, %c0_2, %c0_3] : memref<4x32x128xf32, #tpu.memory_space<vmem>>, vector<1x32x128xf32>
    %3 = vector.shape_cast %2 : vector<1x32x128xf32> to vector<32x128xf32>
    %c2 = arith.constant 2 : index
    %c0_4 = arith.constant 0 : index
    %c0_5 = arith.constant 0 : index
    %4 = vector.load %arg2[%c2, %c0_4, %c0_5] : memref<4x32x128xf32, #tpu.memory_space<vmem>>, vector<1x32x128xf32>
    %5 = vector.shape_cast %4 : vector<1x32x128xf32> to vector<32x128xf32>
    %c3 = arith.constant 3 : index
    %c0_6 = arith.constant 0 : index
    %c0_7 = arith.constant 0 : index
    %6 = vector.load %arg2[%c3, %c0_6, %c0_7] : memref<4x32x128xf32, #tpu.memory_space<vmem>>, vector<1x32x128xf32>
    %7 = vector.shape_cast %6 : vector<1x32x128xf32> to vector<32x128xf32>
    %c0_8 = arith.constant 0 : index
    %c0_9 = arith.constant 0 : index
    %8 = vector.load %arg3[%c0_8, %c0_9] : memref<128x256xf32, #tpu.memory_space<vmem>>, vector<128x256xf32>
    %c0_10 = arith.constant 0 : index
    %c0_11 = arith.constant 0 : index
    %9 = vector.load %arg4[%c0_10, %c0_11] : memref<1x128xf32, #tpu.memory_space<vmem>>, vector<1x128xf32>
    %10 = vector.shape_cast %9 : vector<1x128xf32> to vector<1x1x128xf32>
    %11 = tpu.iota {dimensions = array<i32: 2>} : vector<1x1x128xi32>
    %c64_i32 = arith.constant 64 : i32
    %12 = vector.broadcast %c64_i32 : i32 to vector<1x1x128xi32>
    %13 = arith.cmpi slt, %11, %12 : vector<1x1x128xi32>
    %14 = tpu.iota {dimensions = array<i32: 1>} : vector<8x128xi32>
    %c63_i32 = arith.constant 63 : i32
    %15 = vector.broadcast %c63_i32 : i32 to vector<8x128xi32>
    %16 = arith.andi %14, %15 : vector<8x128xi32>
    %cst = arith.constant 0.000000e+00 : f32
    %17 = vector.broadcast %cst : f32 to vector<8x128xf32>
    %c0_i32 = arith.constant 0 : i32
    %c8_i32 = arith.constant 8 : i32
    %18 = arith.addi %c0_i32, %c8_i32 : i32
    %c1_i32 = arith.constant 1 : i32
    scf.for %arg6 = %c0_i32 to %18 step %c1_i32  : i32 {
      %c8_i32_13 = arith.constant 8 : i32
      %19 = arith.muli %arg6, %c8_i32_13 : i32
      %20 = tpu.assume_multiple %19, 8 : i32
      %21 = arith.index_cast %20 : i32 to index
      %c0_14 = arith.constant 0 : index
      %22 = vector.load %arg1[%21, %c0_14] : memref<64x128xf32, #tpu.memory_space<vmem>>, vector<8x128xf32>
      %c0_i32_15 = arith.constant 0 : i32
      %23 = vector.broadcast %c0_i32_15 : i32 to vector<8x128xi32>
      %24 = arith.cmpi eq, %16, %23 : vector<8x128xi32>
      %c1_i32_16 = arith.constant 1 : i32
      %25 = tpu.dynamic_rotate %22 by %c1_i32_16 dim 1 : vector<8x128xf32>, i32 -> vector<8x128xf32>
      %26 = arith.select %24, %17, %25 : vector<8x128xi1>, vector<8x128xf32>
      %c63_i32_17 = arith.constant 63 : i32
      %27 = vector.broadcast %c63_i32_17 : i32 to vector<8x128xi32>
      %28 = arith.cmpi eq, %16, %27 : vector<8x128xi32>
      %c127_i32 = arith.constant 127 : i32
      %29 = tpu.dynamic_rotate %22 by %c127_i32 dim 1 : vector<8x128xf32>, i32 -> vector<8x128xf32>
      %30 = arith.select %28, %17, %29 : vector<8x128xi1>, vector<8x128xf32>
      %31 = vector.shape_cast %1 : vector<32x128xf32> to vector<1x32x128xf32>
      %32 = vector.shape_cast %26 : vector<8x128xf32> to vector<8x1x128xf32>
      %33 = vector.broadcast %31 : vector<1x32x128xf32> to vector<8x32x128xf32>
      %34 = vector.broadcast %32 : vector<8x1x128xf32> to vector<8x32x128xf32>
      %35 = arith.mulf %33, %34 : vector<8x32x128xf32>
      %36 = vector.shape_cast %3 : vector<32x128xf32> to vector<1x32x128xf32>
      %37 = vector.shape_cast %22 : vector<8x128xf32> to vector<8x1x128xf32>
      %38 = vector.broadcast %36 : vector<1x32x128xf32> to vector<8x32x128xf32>
      %39 = vector.broadcast %37 : vector<8x1x128xf32> to vector<8x32x128xf32>
      %40 = arith.mulf %38, %39 : vector<8x32x128xf32>
      %41 = arith.addf %35, %40 : vector<8x32x128xf32>
      %42 = vector.shape_cast %5 : vector<32x128xf32> to vector<1x32x128xf32>
      %43 = vector.shape_cast %30 : vector<8x128xf32> to vector<8x1x128xf32>
      %44 = vector.broadcast %42 : vector<1x32x128xf32> to vector<8x32x128xf32>
      %45 = vector.broadcast %43 : vector<8x1x128xf32> to vector<8x32x128xf32>
      %46 = arith.mulf %44, %45 : vector<8x32x128xf32>
      %47 = arith.addf %41, %46 : vector<8x32x128xf32>
      %48 = vector.shape_cast %7 : vector<32x128xf32> to vector<1x32x128xf32>
      %49 = vector.broadcast %48 : vector<1x32x128xf32> to vector<8x32x128xf32>
      %50 = arith.addf %47, %49 : vector<8x32x128xf32>
      %51 = vector.shape_cast %50 : vector<8x32x128xf32> to vector<256x128xf32>
      %cst_18 = arith.constant dense<0.000000e+00> : vector<256x256xf32>
      %52 = tpu.matmul %51, %8, %cst_18 {dimension_numbers = #tpu.dot_dimension_numbers<[1], [0], [0], [1], [0, 0, 1, 1], [], []>} : vector<256x128xf32>, vector<128x256xf32>, vector<256x256xf32> -> vector<256x256xf32>
      %53 = vector.extract_strided_slice %52 {offsets = [0, 0], sizes = [256, 128], strides = [1, 1]} : vector<256x256xf32> to vector<256x128xf32>
      %54 = vector.shape_cast %53 : vector<256x128xf32> to vector<8x32x128xf32>
      %55 = vector.extract_strided_slice %52 {offsets = [0, 128], sizes = [256, 2], strides = [1, 1]} : vector<256x256xf32> to vector<256x2xf32>
      %56 = vector.shape_cast %55 : vector<256x2xf32> to vector<8x32x2xf32>
      %57 = vector.extract_strided_slice %56 {offsets = [0, 0, 0], sizes = [8, 32, 1], strides = [1, 1, 1]} : vector<8x32x2xf32> to vector<8x32x1xf32>
      %58 = vector.extract_strided_slice %56 {offsets = [0, 0, 1], sizes = [8, 32, 1], strides = [1, 1, 1]} : vector<8x32x2xf32> to vector<8x32x1xf32>
      %59 = arith.maximumf %57, %58 : vector<8x32x1xf32>
      %cst_19 = arith.constant dense<0xFF800000> : vector<8x1xf32>
      %60 = vector.multi_reduction <maximumf>, %59, %cst_19 [1] : vector<8x32x1xf32> to vector<8x1xf32>
      %61 = vector.shape_cast %60 : vector<8x1xf32> to vector<8x1x1xf32>
      %62 = vector.broadcast %61 : vector<8x1x1xf32> to vector<8x32x1xf32>
      %63 = arith.subf %57, %62 : vector<8x32x1xf32>
      %64 = math.exp %63 : vector<8x32x1xf32>
      %65 = vector.broadcast %61 : vector<8x1x1xf32> to vector<8x32x1xf32>
      %66 = arith.subf %58, %65 : vector<8x32x1xf32>
      %67 = math.exp %66 : vector<8x32x1xf32>
      %68 = arith.addf %64, %67 : vector<8x32x1xf32>
      %cst_20 = arith.constant dense<0.000000e+00> : vector<8x1xf32>
      %69 = vector.multi_reduction <add>, %68, %cst_20 [1] : vector<8x32x1xf32> to vector<8x1xf32>
      %70 = vector.shape_cast %69 : vector<8x1xf32> to vector<8x1x1xf32>
      %71 = tpu.reciprocal %70 {approx = true} : vector<8x1x1xf32> -> vector<8x1x1xf32>
      %72 = arith.mulf %70, %71 : vector<8x1x1xf32>
      %cst_21 = arith.constant 2.000000e+00 : f32
      %73 = vector.broadcast %cst_21 : f32 to vector<8x1x1xf32>
      %74 = arith.subf %73, %72 : vector<8x1x1xf32>
      %75 = arith.mulf %71, %74 : vector<8x1x1xf32>
      %76 = vector.broadcast %75 : vector<8x1x1xf32> to vector<8x32x1xf32>
      %77 = arith.mulf %64, %76 : vector<8x32x1xf32>
      %78 = vector.broadcast %75 : vector<8x1x1xf32> to vector<8x32x1xf32>
      %79 = arith.mulf %67, %78 : vector<8x32x1xf32>
      %80 = vector.shape_cast %13 : vector<1x1x128xi1> to vector<1x1x128xi1>
      %81 = vector.broadcast %80 : vector<1x1x128xi1> to vector<8x32x128xi1>
      %82 = vector.shape_cast %77 : vector<8x32x1xf32> to vector<8x32x1xf32>
      %83 = vector.broadcast %82 : vector<8x32x1xf32> to vector<8x32x128xf32>
      %84 = vector.shape_cast %79 : vector<8x32x1xf32> to vector<8x32x1xf32>
      %85 = vector.broadcast %84 : vector<8x32x1xf32> to vector<8x32x128xf32>
      %86 = arith.select %81, %83, %85 : vector<8x32x128xi1>, vector<8x32x128xf32>
      %87 = arith.mulf %86, %50 : vector<8x32x128xf32>
      %88 = arith.addf %87, %54 : vector<8x32x128xf32>
      %89 = vector.broadcast %10 : vector<1x1x128xf32> to vector<8x32x128xf32>
      %90 = arith.addf %88, %89 : vector<8x32x128xf32>
      %91 = arith.index_cast %20 : i32 to index
      %c0_22 = arith.constant 0 : index
      %c0_23 = arith.constant 0 : index
      %92 = vector.load %arg5[%91, %c0_22, %c0_23] : memref<64x32x128xf32, #tpu.memory_space<vmem>>, vector<8x32x128xf32>
      tpu.vector_store %arg5[%91, %c0_22, %c0_23], %90 {strides = array<i32>} : memref<64x32x128xf32, #tpu.memory_space<vmem>>, vector<8x32x128xf32>,
    }
    %c8_i32_12 = arith.constant 8 : i32
    return
  }
  func.func @transform_0(%arg0: i32) -> (i32, i32) {
    %c0_i32 = arith.constant 0 : i32
    %c0_i32_0 = arith.constant 0 : i32
    return %arg0, %c0_i32 : i32, i32
  }
  func.func @transform_1(%arg0: i32) -> (i32, i32, i32) {
    %c0_i32 = arith.constant 0 : i32
    %c0_i32_0 = arith.constant 0 : i32
    %c0_i32_1 = arith.constant 0 : i32
    %c0_i32_2 = arith.constant 0 : i32
    return %c0_i32, %c0_i32_0, %c0_i32_1 : i32, i32, i32
  }
  func.func @transform_2(%arg0: i32) -> (i32, i32) {
    %c0_i32 = arith.constant 0 : i32
    %c0_i32_0 = arith.constant 0 : i32
    %c0_i32_1 = arith.constant 0 : i32
    return %c0_i32, %c0_i32_0 : i32, i32
  }
  func.func @transform_3(%arg0: i32) -> (i32, i32) {
    %c0_i32 = arith.constant 0 : i32
    %c0_i32_0 = arith.constant 0 : i32
    %c0_i32_1 = arith.constant 0 : i32
    return %c0_i32, %c0_i32_0 : i32, i32
  }
  func.func @transform_4(%arg0: i32) -> (i32, i32, i32) {
    %c0_i32 = arith.constant 0 : i32
    %c0_i32_0 = arith.constant 0 : i32
    %c0_i32_1 = arith.constant 0 : i32
    return %arg0, %c0_i32, %c0_i32_0 : i32, i32, i32
  }
}

</mosaic_0001>

<bundles_post_ra>
// kernel: tpu_custom_call.1
= control target key start
LH: loop header
LB: loop body
LE: loop exit
PB: predicated region body
PF: predicated region fallthrough
CT: control target
= control target key end

     0   :  { %9 = vsyncpa [#allocation3], 0  ;;  %s4973_s0 = inlined_call_operand.hbm [shape: f32[192,128], index: 0, kind: input, shape index: {}]   ;;  %s4974_s1 = inlined_call_operand.hbm [shape: f32[4,32,128], index: 1, kind: input, shape index: {}]   ;;  %s4975_s2 = inlined_call_operand.hbm [shape: f32[128,256], index: 2, kind: input, shape index: {}]   ;;  %s4976_s3 = inlined_call_operand.hbm [shape: f32[1,128], index: 3, kind: input, shape index: {}]   ;;  %s4977_s4 = inlined_call_operand.hbm [shape: f32[192,32,128], index: 4, kind: output, shape index: {}]  }
   0x1   :  { %11 = vsyncpa [#allocation3 + $0x1], 0 }
   0x2   :  { %12 = vsyncpa [#allocation6], 0 }
   0x3   :  { %13 = vsyncpa [#allocation9], 0 }
   0x4   :  { %14 = vsyncpa [#allocation4], 0 }
   0x5   :  { %16 = vsyncpa [#allocation4 + $0x1], 0  ;;  %s3085_s15 = smov 0   ;;  %s3087_s16 = smov 0  }
   0x6   :  { %s3089_s17 = smov 0   ;;  %s3091_s18 = smov 0  }
   0x7 LB: > { %s3106_s19 = sadd.s32 4294967295, %s3037_s18   ;;  %s2549_s20 = sadd.s32 4294967294, %s3037_s18   ;;  %s3037_s18 = sphi %s3091_s18, %s5373_s18   ;;  %s3033_s17 = sphi %s3089_s17, %s5372_s17   ;;  %s3029_s16 = sphi %s3087_s16, %s5371_s16   ;;  %s3025_s15 = sphi %s3085_s15, %s5370_s15  }
   0x8   : > { %p42_p0 = scmp.ne.s32.totalorder %s3029_s16, %s3025_s15  ;;  %p4978_p1 = scmp.eq.s32.totalorder %s3106_s19, 0 }
   0x9   : > { %p129_p2 = scmp.eq.s32.totalorder %s3106_s19, 2  ;;  %p135_p3 = scmp.eq.s32.totalorder %s2549_s20, 2 }
   0xa   : > { %p3115_p4 = por %p4978_p1, %p42_p0  ;;  %p2550_p5 = scmp.ge.s32.totalorder %s3037_s18, 1 }
   0xb   : > { %p3120_p6 = por %p135_p3, %p42_p0  ;;  %p142_p7 = scmp.lt.s32.totalorder %s3037_s18, 4 }
   0xc   : > { %s5087_s21 = scalar_select %p3115_p4, 1, 0 }
   0xd   : > { %s5088_s22 = scalar_select %p3120_p6, 1, 0 }
   0xe   : > { %p3125_p8 = pnand %p2550_p5, %p142_p7  ;;  %s3043_s24 = smov [#allocation5]  }
   0xf   : > { %s154_s25 = sshll.u32 %s3043_s24, 4  ;;  %s3044_s27 = smov [#allocation7]   ;;  %s155_s25 = int_to_ptr.vmem [resolvable:$true] %s154_s25 }
  0x10   : > { %s5089_s23 = scalar_select %p3125_p8, 1, 0 }
  0x11   : > { %p2625_p9 = pneg %p3125_p8  ;;  %s167_s28 = sshll.u32 %s3044_s27, 4  ;;  %s168_s28 = int_to_ptr.vmem [resolvable:$true] %s167_s28 }
  0x12   : > { %s2866_s29 = scalar_lea.vmem %s155_s25, 2048  ;;  %p2874_p3 = scmp.lt.s32.totalorder %s155_s25, %s155_s25 }
  0x13   : > { %p3133_p10 = pnand %p2625_p9, %p4978_p1  ;;  %p2867_p12 = scmp.ne.s32.totalorder %s155_s25, %s2866_s29 }
  0x14   : > { %p2875_p5 = scmp.lt.s32.totalorder %s2866_s29, %s2866_s29 }
  0x15   : > { %p2857_p11 = pneg %p3133_p10 }
  0x16   : > { %p2876_p7 = por %p2875_p5, %p2874_p3 }
  0x17   : > { %p2869_p13 = pnand %p2867_p12, %p2857_p11 }
  0x19   : > { %p2870_p0 = pneg %p2869_p13 }
  0x1b   : > { %p2877_p9 = pnand %p2876_p7, %p2870_p0 }
  0x1d   : > { %2880 = shalt.err (!%p2877_p9)
}
  0x1e   : > { %s3045_s30 = smov 128   ;;  %s3046_s5 = smov 8  }
  0x1f   : > { %2628 = dma.hbm_to_vmem [thread:$0]  (!%p3133_p10), %s4974_s1, 2048, %s155_s25, [#allocation6], %s3045_s30, %s3045_s30, %s3046_s5  }
  0x20   : > { %s2892_s8 = scalar_lea.vmem %s168_s28, 4096  ;;  %p2900_p0 = scmp.lt.s32.totalorder %s168_s28, %s168_s28 }
  0x21   : > { %p2893_p12 = scmp.ne.s32.totalorder %s168_s28, %s2892_s8  ;;  %p2901_p5 = scmp.lt.s32.totalorder %s2892_s8, %s2892_s8 }
  0x23   : > { %p2895_p13 = pnand %p2893_p12, %p2857_p11  ;;  %p2902_p7 = por %p2901_p5, %p2900_p0 }
  0x25   : > { %p2896_p3 = pneg %p2895_p13 }
  0x27   : > { %p2903_p9 = pnand %p2902_p7, %p2896_p3 }
  0x29   : > { %2906 = shalt.err (!%p2903_p9)
}
  0x2a   : > { %s3047_s9 = smov 256   ;;  %s3048_s10 = smov 16  }
  0x2b   : > { %2631 = dma.hbm_to_vmem [thread:$0]  (!%p3133_p10), %s4975_s2, 4096, %s168_s28, [#allocation6], %s3047_s9, %s3047_s9, %s3048_s10  }
  0x2c   : > { %s3049_s13 = smov [#allocation8]   ;;  %s3159_s20 = sadd.s32 1, %s3037_s18  }
  0x2d   : > { %s181_s14 = sshll.u32 %s3049_s13, 4  ;;  %s182_s14 = int_to_ptr.vmem [resolvable:$true] %s181_s14 }
  0x2e   : > { %s2918_s24 = scalar_lea.vmem %s182_s14, 16  ;;  %s2925_s25 = scalar_lea.vmem %s182_s14, 32 }
  0x2f   : > { %p2919_p12 = scmp.ne.s32.totalorder %s182_s14, %s2918_s24  ;;  %p2926_p0 = scmp.lt.s32.totalorder %s182_s14, %s182_s14 }
  0x30   : > { %p2927_p5 = scmp.lt.s32.totalorder %s2925_s25, %s2918_s24 }
  0x31   : > { %p2921_p13 = pnand %p2919_p12, %p2857_p11 }
  0x32   : > { %p2928_p7 = por %p2927_p5, %p2926_p0 }
  0x33   : > { %p2922_p3 = pneg %p2921_p13 }
  0x35   : > { %p2929_p9 = pnand %p2928_p7, %p2922_p3 }
  0x37   : > { %2932 = shalt.err (!%p2929_p9)
}
  0x38   : > { %2634 = dma.hbm_to_vmem [thread:$0]  (!%p3133_p10), %s4976_s3, 16, %s182_s14, [#allocation9]  }
  0x39   : > { %s26_s29 = ssub.s32 %s3037_s18, %s3159_s20  ;;  %s29_s6 = sadd.s32 1, %s3033_s17 }
  0x3a   : > { %p27_p11 = scmp.eq.s32.totalorder %s26_s29, 0  ;;  %p36_p12 = scmp.ne.s32.totalorder %s3033_s17, %s3029_s16 }
  0x3b   : > { %p37_p13 = scmp.eq.s32.totalorder %s3037_s18, 0  ;;  %p2646_p3 = scmp.lt.s32.totalorder %s3037_s18, 3 }
  0x3c   : > { %s3177_s26 = scalar_select %p27_p11, %s3033_s17, %s29_s6  }
  0x3d   : > { %p38_p0 = por %p37_p13, %p36_p12  ;;  %p3181_p5 = por %p129_p2, %p36_p12 }
  0x3e   : > { %s192_s8 = sand.u32 1, %s3033_s17   ;;  %s2573_s9 = sshll.u32 %s3037_s18, 10 }
  0x3f   : > { %s5091_s7 = scalar_select %p3181_p5, 1, 0 }
  0x40   : > { %s2555_s10 = sshll.u32 %s192_s8, 6  ;;  %s3190_s13 = scalar_lea.hbm %s4973_s0, %s2573_s9 }
  0x41   : > { %s196_s14 = scalar_lea.vmem [#allocation2], %s2555_s10  ;;  %p3192_p10 = pnand %p2646_p3, %p38_p0 }
  0x42   : > { %s203_s24 = sshll.u32 %s196_s14, 4  ;;  %s3198_s27 = scalar_lea.sflag [#allocation3], %s192_s8  ;;  %s3196_s24 = int_to_ptr.vmem [resolvable:$true] %s203_s24 }
  0x43   : > { %s2933_s28 = scalar_lea.hbm %s3190_s13, 1024  ;;  %p2935_p7 = pneg %p3192_p10 }
  0x44   : > { %p2934_p2 = scmp.ne.s32.totalorder %s3190_s13, %s2933_s28  ;;  %s2938_s9 = scalar_lea.hbm %s4973_s0, 3072 }
  0x45   : > { %p2939_p12 = scmp.lt.s32.totalorder %s3190_s13, %s4973_s0  ;;  %p2940_p13 = scmp.lt.s32.totalorder %s2938_s9, %s2933_s28 }
  0x46   : > { %p2936_p9 = pnand %p2935_p7, %p2934_p2 }
  0x47   : > { %p2941_p3 = por %p2940_p13, %p2939_p12 }
  0x48   : > { %p2937_p11 = pneg %p2936_p9 }
  0x4a   : > { %p2942_p0 = pnand %p2941_p3, %p2937_p11 }
  0x4c   : > { %2945 = shalt.err (!%p2942_p0)
}
  0x4d   : > { %s2946_s8 = scalar_lea.vmem %s3196_s24, 1024  ;;  %s3050_s12 = smov [#allocation2]  }
  0x4e   : > { %p2947_p1 = scmp.ne.s32.totalorder %s3196_s24, %s2946_s8  ;;  %s2951_s14 = sshll.u32 %s3050_s12, 4  ;;  %s2952_s14 = int_to_ptr.vmem [resolvable:$false] %s2951_s14 }
  0x4f   : > { %s2953_s29 = scalar_lea.vmem %s2952_s14, 2048  ;;  %p2954_p9 = scmp.lt.s32.totalorder %s3196_s24, %s2952_s14 }
  0x50   : > { %p2949_p6 = pnand %p2947_p1, %p2935_p7  ;;  %p2955_p5 = scmp.lt.s32.totalorder %s2953_s29, %s2946_s8 }
  0x52   : > { %p2950_p2 = pneg %p2949_p6  ;;  %p2956_p4 = por %p2955_p5, %p2954_p9 }
  0x54   : > { %p2957_p8 = pnand %p2956_p4, %p2950_p2 }
  0x56   : > { %2960 = shalt.err (!%p2957_p8)
}
  0x57   : > { %2638 = dma.hbm_to_vmem [thread:$0]  (!%p3192_p10), %s3190_s13, 1024, %s3196_s24, %s3198_s27, %s3045_s30, %s3045_s30, %s3046_s5  }
  0x58   : > { %p5093_p1 = scmp.ne.s32.totalorder %s5089_s23, 0 }
  0x5a   : > { %215 = sbr.rel (%p5093_p1) target bundleno = 1258 (0x4ea), region = 36 }
  0x5f   : > { %s3225_s28 = sand.u32 1, %s3029_s16   ;;  %p5094_p4 = scmp.ne.s32.totalorder %s5087_s21, 0 }
  0x60   : > { %s2559_s6 = sshll.u32 %s3225_s28, 6  ;;  %s218_s9 = scalar_lea.sflag [#allocation3], %s3225_s28 }
  0x61   : > { %s3229_s10 = scalar_lea.vmem [#allocation2], %s2559_s6 }
  0x62   : > { %3008 = dma.done.wait (%p5094_p4), %s218_s9, 1024  }
  0x63   : > { %3010 = vsyncadd (%p5094_p4), %s218_s9, 4294966272  ;;  %p5095_p6 = scmp.eq.s32.totalorder %s3106_s19, 0 }
  0x65   : > { %3012 = dma.done.wait (%p5095_p6), [#allocation6], 6144   ;;  %p5096_p8 = pmov %p5095_p6 }
  0x66   : > { %p5097_p5 = pmov %p5095_p6 }
  0x67   : > { %3014 = vsyncadd (%p5096_p8), [#allocation6], 4294961152 }
  0x68   : > { %3016 = dma.done.wait (%p5097_p5), [#allocation9], 16   ;;  %p5098_p10 = pmov %p5097_p5 }
  0x69   : > { %s2563_s23 = sshll.u32 %s3225_s28, 11  ;;  %v4982_v0 = vlaneseq  ;;  %v3249_v3 = vld [vmem:[#allocation5] sm:$0xff]  ;;  %v3251_v4 = vld [vmem:[#allocation5 + $0x8] sm:$0xff]  ;;  %v3253_v5 = vld [vmem:[#allocation5 + $0x10] sm:$0xff]  ;;  %s3351_s30 = smov 0  }
  0x6a   : > { %3018 = vsyncadd (%p5098_p10), [#allocation9], 4294967280  ;;  %5100 = vst [vmem:[#allocation16_spill] sm:$0xff] %v3249_v3  ;;  %v3255_v6 = vld [vmem:[#allocation5 + $0x18] sm:$0xff]  ;;  %v3257_v7 = vld [vmem:[#allocation5 + $0x20] sm:$0xff]  ;;  %s3349_s21 = scalar_lea.vmem [#allocation10], %s2563_s23 }
  0x6b   : > { %v3245_v1 = vand.u32 127, %v4982_v0  ;;  %5101 = vst [vmem:[#allocation17_spill] sm:$0xff] %v3251_v4  ;;  %5102 = vst [vmem:[#allocation18_spill] sm:$0xff] %v3253_v5  ;;  %v3259_v8 = vld [vmem:[#allocation5 + $0x28] sm:$0xff]  ;;  %v3261_v9 = vld [vmem:[#allocation5 + $0x30] sm:$0xff] }
  0x6c   : > { %5103 = vst [vmem:[#allocation19_spill] sm:$0xff] %v3255_v6  ;;  %5104 = vst [vmem:[#allocation20_spill] sm:$0xff] %v3257_v7  ;;  %v3263_v10 = vld [vmem:[#allocation5 + $0x38] sm:$0xff]  ;;  %v3265_v11 = vld [vmem:[#allocation5 + $0x40] sm:$0xff] }
  0x6d   : > { %5099 = vst [vmem:[#allocation15_spill] sm:$0xff] %v3245_v1  ;;  %vm314_vm0 = vcmp.lt.s32.totalorder %v3245_v1, 64  ;;  %5105 = vst [vmem:[#allocation21_spill] sm:$0xff] %v3259_v8  ;;  %v3267_v12 = vld [vmem:[#allocation5 + $0x48] sm:$0xff]  ;;  %v3269_v13 = vld [vmem:[#allocation5 + $0x50] sm:$0xff] }
  0x6e   : > { %5106 = vst [vmem:[#allocation22_spill] sm:$0xff] %v3261_v9  ;;  %5107 = vst [vmem:[#allocation23_spill] sm:$0xff] %v3263_v10  ;;  %v3271_v14 = vld [vmem:[#allocation5 + $0x58] sm:$0xff]  ;;  %v3273_v15 = vld [vmem:[#allocation5 + $0x60] sm:$0xff] }
  0x6f   : > { %5108 = vst [vmem:[#allocation24_spill] sm:$0xff] %v3265_v11  ;;  %5109 = vst [vmem:[#allocation25_spill] sm:$0xff] %v3267_v12  ;;  %v3275_v16 = vld [vmem:[#allocation5 + $0x68] sm:$0xff]  ;;  %v3277_v17 = vld [vmem:[#allocation5 + $0x70] sm:$0xff] }
  0x70   : > { %5110 = vst [vmem:[#allocation26_spill] sm:$0xff] %v3269_v13  ;;  %5111 = vst [vmem:[#allocation27_spill] sm:$0xff] %v3271_v14  ;;  %v3279_v18 = vld [vmem:[#allocation5 + $0x78] sm:$0xff]  ;;  %v3281_v19 = vld [vmem:[#allocation7] sm:$0xff] }
  0x71   : > { %5112 = vst [vmem:[#allocation28_spill] sm:$0xff] %v3273_v15  ;;  %5113 = vst [vmem:[#allocation29_spill] sm:$0xff] %v3275_v16  ;;  %v3283_v20 = vld [vmem:[#allocation7 + $0x8] sm:$0xff]  ;;  %v3285_v21 = vld [vmem:[#allocation7 + $0x10] sm:$0xff] }
  0x72   : > { %5114 = vst [vmem:[#allocation30_spill] sm:$0xff] %v3277_v17  ;;  %5115 = vst [vmem:[#allocation31_spill] sm:$0xff] %v3279_v18  ;;  %v3287_v22 = vld [vmem:[#allocation7 + $0x18] sm:$0xff]  ;;  %v3289_v23 = vld [vmem:[#allocation7 + $0x20] sm:$0xff] }
  0x73   : > { %5116 = vst [vmem:[#allocation32_spill] sm:$0xff] %v3281_v19  ;;  %5117 = vst [vmem:[#allocation33_spill] sm:$0xff] %v3283_v20  ;;  %v3291_v24 = vld [vmem:[#allocation7 + $0x28] sm:$0xff]  ;;  %v3293_v25 = vld [vmem:[#allocation7 + $0x30] sm:$0xff] }
  0x74   : > { %5118 = vst [vmem:[#allocation34_spill] sm:$0xff] %v3285_v21  ;;  %5119 = vst [vmem:[#allocation35_spill] sm:$0xff] %v3287_v22  ;;  %v3295_v26 = vld [vmem:[#allocation7 + $0x38] sm:$0xff]  ;;  %v3297_v27 = vld [vmem:[#allocation7 + $0x40] sm:$0xff] }
  0x75   : > { %5120 = vst [vmem:[#allocation36_spill] sm:$0xff] %v3289_v23  ;;  %5121 = vst [vmem:[#allocation37_spill] sm:$0xff] %v3291_v24  ;;  %v3299_v28 = vld [vmem:[#allocation7 + $0x48] sm:$0xff]  ;;  %v3301_v29 = vld [vmem:[#allocation7 + $0x50] sm:$0xff] }
  0x76   : > { %5122 = vst [vmem:[#allocation38_spill] sm:$0xff] %v3293_v25  ;;  %5123 = vst [vmem:[#allocation39_spill] sm:$0xff] %v3295_v26  ;;  %v3303_v30 = vld [vmem:[#allocation7 + $0x58] sm:$0xff]  ;;  %v3305_v31 = vld [vmem:[#allocation7 + $0x60] sm:$0xff] }
  0x77   : > { %5124 = vst [vmem:[#allocation40_spill] sm:$0xff] %v3297_v27  ;;  %5125 = vst [vmem:[#allocation41_spill] sm:$0xff] %v3299_v28  ;;  %v3307_v32 = vld [vmem:[#allocation7 + $0x68] sm:$0xff]  ;;  %v3309_v33 = vld [vmem:[#allocation7 + $0x70] sm:$0xff] }
  0x78   : > { %5126 = vst [vmem:[#allocation42_spill] sm:$0xff] %v3301_v29  ;;  %5127 = vst [vmem:[#allocation43_spill] sm:$0xff] %v3303_v30  ;;  %v3311_v34 = vld [vmem:[#allocation7 + $0x78] sm:$0xff]  ;;  %v3313_v35 = vld [vmem:[#allocation7 + $0x80] sm:$0xff] }
  0x79   : > { %5128 = vst [vmem:[#allocation44_spill] sm:$0xff] %v3305_v31  ;;  %5129 = vst [vmem:[#allocation45_spill] sm:$0xff] %v3307_v32  ;;  %v3315_v36 = vld [vmem:[#allocation7 + $0x88] sm:$0xff]  ;;  %v3317_v37 = vld [vmem:[#allocation7 + $0x90] sm:$0xff] }
  0x7a   : > { %5130 = vst [vmem:[#allocation46_spill] sm:$0xff] %v3309_v33  ;;  %5131 = vst [vmem:[#allocation47_spill] sm:$0xff] %v3311_v34  ;;  %v3319_v38 = vld [vmem:[#allocation7 + $0x98] sm:$0xff]  ;;  %v3321_v39 = vld [vmem:[#allocation7 + $0xa0] sm:$0xff] }
  0x7b   : > { %5132 = vst [vmem:[#allocation48_spill] sm:$0xff] %v3313_v35  ;;  %5133 = vst [vmem:[#allocation49_spill] sm:$0xff] %v3315_v36  ;;  %v3323_v40 = vld [vmem:[#allocation7 + $0xa8] sm:$0xff]  ;;  %v3325_v41 = vld [vmem:[#allocation7 + $0xb0] sm:$0xff] }
  0x7c   : > { %5134 = vst [vmem:[#allocation50_spill] sm:$0xff] %v3317_v37  ;;  %5135 = vst [vmem:[#allocation51_spill] sm:$0xff] %v3319_v38  ;;  %v3327_v42 = vld [vmem:[#allocation7 + $0xb8] sm:$0xff]  ;;  %v3329_v43 = vld [vmem:[#allocation7 + $0xc0] sm:$0xff] }
  0x7d   : > { %5136 = vst [vmem:[#allocation52_spill] sm:$0xff] %v3321_v39  ;;  %5137 = vst [vmem:[#allocation53_spill] sm:$0xff] %v3323_v40  ;;  %v3331_v44 = vld [vmem:[#allocation7 + $0xc8] sm:$0xff]  ;;  %v3333_v45 = vld [vmem:[#allocation7 + $0xd0] sm:$0xff] }
  0x7e   : > { %5138 = vst [vmem:[#allocation54_spill] sm:$0xff] %v3325_v41  ;;  %5139 = vst [vmem:[#allocation55_spill] sm:$0xff] %v3327_v42  ;;  %v3335_v46 = vld [vmem:[#allocation7 + $0xd8] sm:$0xff]  ;;  %v3337_v47 = vld [vmem:[#allocation7 + $0xe0] sm:$0xff] }
  0x7f   : > { %5140 = vst [vmem:[#allocation56_spill] sm:$0xff] %v3329_v43  ;;  %5141 = vst [vmem:[#allocation57_spill] sm:$0xff] %v3331_v44  ;;  %v3339_v48 = vld [vmem:[#allocation7 + $0xe8] sm:$0xff]  ;;  %v3341_v49 = vld [vmem:[#allocation7 + $0xf0] sm:$0xff] }
  0x80   : > { %5142 = vst [vmem:[#allocation58_spill] sm:$0xff] %v3333_v45  ;;  %5143 = vst [vmem:[#allocation59_spill] sm:$0xff] %v3335_v46  ;;  %v3343_v50 = vld [vmem:[#allocation7 + $0xf8] sm:$0xff]  ;;  %v3345_v51 = vld [vmem:[#allocation8] ss:$0 sm:$0xff] }
  0x81   : > { %5144 = vst [vmem:[#allocation60_spill] sm:$0xff] %v3337_v47  ;;  %5145 = vst [vmem:[#allocation61_spill] sm:$0xff] %v3339_v48 }
  0x82   : > { %5146 = vst [vmem:[#allocation62_spill] sm:$0xff] %v3341_v49  ;;  %5147 = vst [vmem:[#allocation63_spill] sm:$0xff] %v3343_v50 }
  0x83   : > { %5148 = vst [vmem:[#allocation64_spill] sm:$0xff] %v3345_v51 }
  0x84 LB: >> { %v5149_v1 = vld [vmem:[#allocation15_spill] sm:$0xff]  ;;  %v5151_v17 = vld [vmem:[#allocation30_spill] sm:$0xff]  ;;  %v5152_v16 = vld [vmem:[#allocation29_spill] sm:$0xff]  ;;  %s2564_s5 = sshll.u32 %s3041_s30, 3  ;;  %s3051_s24 = smov 1   ;;  %v4983_v53 = vmov 0.0   ;;  %v5198_v0 = vlaneseq  ;;  %s3041_s30 = sphi %s3351_s30, %s321_s30  }
  0x85   : >> { %v5150_v18 = vld [vmem:[#allocation31_spill] sm:$0xff]  ;;  %v5153_v15 = vld [vmem:[#allocation28_spill] sm:$0xff]  ;;  %v5155_v13 = vld [vmem:[#allocation26_spill] sm:$0xff]  ;;  %s323_s13 = scalar_lea.vmem %s3229_s10, %s2564_s5 [#allocation2]  ;;  %s3052_s25 = smov 127   ;;  %859 = vmatprep.mubr.f32.mxu0 %v4983_v53  ;;  %955 = vmatprep.mubr.f32.mxu1 %v4983_v53  ;;  %v3054_v54 = vmov 1966171168  }
  0x86   : >> { %v5154_v14 = vld [vmem:[#allocation27_spill] sm:$0xff]  ;;  %v5156_v12 = vld [vmem:[#allocation25_spill] sm:$0xff]  ;;  %v5157_v11 = vld [vmem:[#allocation24_spill] sm:$0xff]  ;;  %v336_v55 = vunpack.c.l.s4 %v3054_v54  ;;  %v339_v57 = vshrl.u32 %v5198_v0, 7  ;;  %v5199_v2 = vand.u32 63, %v5149_v1  ;;  %vm1212_vm3 = vcmask 7168  }
  0x87   : >> { %v5158_v10 = vld [vmem:[#allocation23_spill] sm:$0xff]  ;;  %v5159_v9 = vld [vmem:[#allocation22_spill] sm:$0xff]  ;;  %v5160_v8 = vld [vmem:[#allocation21_spill] sm:$0xff]  ;;  %s2574_s27 = sshll.u32 %s3041_s30, 8  ;;  %s321_s30 = sadd.s32 1, %s3041_s30  }
  0x88   : >> { %v5161_v7 = vld [vmem:[#allocation20_spill] sm:$0xff]  ;;  %v5162_v6 = vld [vmem:[#allocation19_spill] sm:$0xff]  ;;  %v5163_v5 = vld [vmem:[#allocation18_spill] sm:$0xff]  ;;  %v337_v56 = vunpack.c.0.s8 %v336_v55  ;;  %vm325_vm1 = vcmp.eq.s32.totalorder %v5199_v2, 0  ;;  %vm329_vm2 = vcmp.eq.s32.totalorder %v5199_v2, 63  ;;  %v3444_v53 = vsub.s32 0, %v339_v57  ;;  %s4705_s11 = scalar_lea.vmem %s3349_s21, %s2574_s27 [#allocation10] }
  0x89   : >> { %v5164_v4 = vld [vmem:[#allocation17_spill] sm:$0xff]  ;;  %v5165_v3 = vld [vmem:[#allocation16_spill] sm:$0xff]  ;;  %v5166_v50 = vld [vmem:[#allocation63_spill] sm:$0xff]  ;;  %p318_p7 = scmp.ge.s32.totalorder %s321_s30, 8  }
  0x8a   : >> { %v5167_v49 = vld [vmem:[#allocation62_spill] sm:$0xff]  ;;  %v5168_v48 = vld [vmem:[#allocation61_spill] sm:$0xff]  ;;  %v5169_v47 = vld [vmem:[#allocation60_spill] sm:$0xff]  ;;  %795 = vmatprep.subr.mxu0 %v5166_v50  ;;  %2577 = vmatprep.subr.mxu1 %v5166_v50  ;;  %v3431_v58 = vsub.s32 %v337_v56, %v339_v57  ;;  %s2576_s8 = sshll.u32 (%p318_p7), %s3106_s19, 15  ;;  %s2438_s6 = sshll.u32 (%p318_p7), %s3349_s21, 4  ;;  %s4931_s6 = int_to_ptr.vmem [resolvable:$true] %s2438_s6 }
  0x8b   : >> { %v5170_v46 = vld [vmem:[#allocation59_spill] sm:$0xff]  ;;  %v5171_v45 = vld [vmem:[#allocation58_spill] sm:$0xff]  ;;  %v5172_v44 = vld [vmem:[#allocation57_spill] sm:$0xff]  ;;  %796 = vmatpush1.msra.mxu0 %v5167_v49  ;;  %2593 = vmatpush1.msra.mxu1 %v5167_v49  ;;  %s4928_s29 = scalar_lea.hbm (%p318_p7), %s4977_s4, %s2576_s8  ;;  %s2424_s9 = scalar_lea.sflag (%p318_p7), [#allocation4], %s3225_s28 }
  0x8c   : >> { %v5173_v43 = vld [vmem:[#allocation56_spill] sm:$0xff]  ;;  %v5174_v42 = vld [vmem:[#allocation55_spill] sm:$0xff]  ;;  %v5175_v41 = vld [vmem:[#allocation54_spill] sm:$0xff]  ;;  %797 = vmatprep.subr.mxu0 %v5168_v48  ;;  %2578 = vmatprep.subr.mxu1 %v5168_v48  ;;  %s2961_s23 = scalar_lea.vmem (%p318_p7), %s4931_s6, 32768  ;;  %p5368_p12 = scmp.ne.s32.totalorder (%p318_p7), %s5091_s7, 0 }
  0x8d   : >> { %v5176_v40 = vld [vmem:[#allocation53_spill] sm:$0xff]  ;;  %v5177_v39 = vld [vmem:[#allocation52_spill] sm:$0xff]  ;;  %v5178_v38 = vld [vmem:[#allocation51_spill] sm:$0xff]  ;;  %798 = vmatpush1.msra.mxu0 %v5169_v47  ;;  %2594 = vmatpush1.msra.mxu1 %v5169_v47  ;;  %p2962_p11 = scmp.ne.s32.totalorder (%p318_p7), %s4931_s6, %s2961_s23  ;;  %s3057_s10 = smov (%p318_p7), [#allocation10]  }
  0x8e   : >> { %v5179_v37 = vld [vmem:[#allocation50_spill] sm:$0xff]  ;;  %v5180_v36 = vld [vmem:[#allocation49_spill] sm:$0xff]  ;;  %v5181_v35 = vld [vmem:[#allocation48_spill] sm:$0xff]  ;;  %799 = vmatprep.subr.mxu0 %v5170_v46  ;;  %2579 = vmatprep.subr.mxu1 %v5170_v46  ;;  %s2965_s30 = sshll.u32 (%p318_p7), %s3057_s10, 4  ;;  %s2966_s30 = int_to_ptr.vmem [resolvable:$false] %s2965_s30 }
  0x8f   : >> { %v5182_v34 = vld [vmem:[#allocation47_spill] sm:$0xff]  ;;  %v5183_v33 = vld [vmem:[#allocation46_spill] sm:$0xff]  ;;  %v5184_v32 = vld [vmem:[#allocation45_spill] sm:$0xff]  ;;  %800 = vmatpush1.msra.mxu0 %v5171_v45  ;;  %2595 = vmatpush1.msra.mxu1 %v5171_v45  ;;  %p2963_p13 = pnand (%p318_p7), %p2962_p11, %p5368_p12  ;;  %s2967_s19 = scalar_lea.vmem (%p318_p7), %s2966_s30, 65536 }
  0x90   : >> { %v5185_v31 = vld [vmem:[#allocation44_spill] sm:$0xff]  ;;  %v5186_v30 = vld [vmem:[#allocation43_spill] sm:$0xff]  ;;  %v5187_v29 = vld [vmem:[#allocation42_spill] sm:$0xff]  ;;  %801 = vmatprep.subr.mxu0 %v5172_v44  ;;  %2580 = vmatprep.subr.mxu1 %v5172_v44  ;;  %p2968_p0 = scmp.lt.s32.totalorder (%p318_p7), %s4931_s6, %s2966_s30  ;;  %p2969_p2 = scmp.lt.s32.totalorder (%p318_p7), %s2967_s19, %s2961_s23 }
  0x91   : >> { %v5188_v28 = vld [vmem:[#allocation41_spill] sm:$0xff]  ;;  %v5189_v27 = vld [vmem:[#allocation40_spill] sm:$0xff]  ;;  %v5190_v26 = vld [vmem:[#allocation39_spill] sm:$0xff]  ;;  %802 = vmatpush1.msra.mxu0 %v5173_v43  ;;  %2596 = vmatpush1.msra.mxu1 %v5173_v43  ;;  %p2964_p3 = pneg (%p318_p7), %p2963_p13 }
  0x92   : >> { %v5191_v25 = vld [vmem:[#allocation38_spill] sm:$0xff]  ;;  %v5192_v24 = vld [vmem:[#allocation37_spill] sm:$0xff]  ;;  %v5193_v23 = vld [vmem:[#allocation36_spill] sm:$0xff]  ;;  %803 = vmatprep.subr.mxu0 %v5174_v42  ;;  %2581 = vmatprep.subr.mxu1 %v5174_v42  ;;  %p2970_p9 = por (%p318_p7), %p2969_p2, %p2968_p0 }
  0x93   : >> { %v5194_v22 = vld [vmem:[#allocation35_spill] sm:$0xff]  ;;  %v5195_v21 = vld [vmem:[#allocation34_spill] sm:$0xff]  ;;  %v5196_v20 = vld [vmem:[#allocation33_spill] sm:$0xff]  ;;  %804 = vmatpush1.msra.mxu0 %v5175_v41  ;;  %2597 = vmatpush1.msra.mxu1 %v5175_v41 }
  0x94   : >> { %v5197_v19 = vld [vmem:[#allocation32_spill] sm:$0xff]  ;;  %v3366_v52 = vld [vmem:[%s323_s13] sm:$0xff]  ;;  %805 = vmatprep.subr.mxu0 %v5176_v40  ;;  %2582 = vmatprep.subr.mxu1 %v5176_v40  ;;  %p2971_p1 = pnand (%p318_p7), %p2970_p9, %p2964_p3 }
  0x95   : >> { %326 = vrot.lane.b32.xlu0 %v3366_v52, %s3051_s24  ;;  %806 = vmatpush1.msra.mxu0 %v5177_v39  ;;  %v456_v59 = vcombine.high %v3366_v52, %v3366_v52  ;;  %v463_v60 = vrot.slane %v3366_v52, %v3431_v58 }
  0x96   : >> { %807 = vmatprep.subr.mxu0 %v5178_v38  ;;  %2598 = vmatpush1.msra.mxu1 %v5177_v39 }
  0x97   : >> { %808 = vmatpush1.msra.mxu0 %v5179_v37  ;;  %2583 = vmatprep.subr.mxu1 %v5178_v38  ;;  %v470_v61 = vrot.slane %v456_v59, %v3431_v58  ;;  %v471_v62 = vcombine.high %v463_v60, %v463_v60  ;;  %v479_v54 = vrot.slane %v463_v60, %v3431_v58 }
  0x98   : >> { %809 = vmatprep.subr.mxu0 %v5180_v36  ;;  %2599 = vmatpush1.msra.mxu1 %v5179_v37 }
  0x99   : >> { %330 = vrot.lane.b32.xlu0 %v3366_v52, %s3052_s25  ;;  %810 = vmatpush1.msra.mxu0 %v5181_v35  ;;  %v472_v63 = vcombine.high %v470_v61, %v470_v61  ;;  %v486_v0 = vrot.slane %v470_v61, %v3431_v58  ;;  %v493_v52 = vrot.slane %v471_v62, %v3431_v58 }
  0x9a   : >> { %2584 = vmatprep.subr.mxu1 %v5180_v36  ;;  %811 = vmatprep.subr.mxu0 %v5182_v34  ;;  %v508_v57 = vrot.slane %v479_v54, %v3444_v53 }
  0x9b   : >> { %2600 = vmatpush1.msra.mxu1 %v5181_v35  ;;  %812 = vmatpush1.msra.mxu0 %v5183_v33  ;;  %v503_v2 = vcombine.high %v493_v52, %v493_v52  ;;  %v524_v62 = vrot.slane %v486_v0, %v3444_v53 }
  0x9c   : >> { %2585 = vmatprep.subr.mxu1 %v5182_v34  ;;  %813 = vmatprep.subr.mxu0 %v5184_v32  ;;  %v548_v37 = vmul.f32 %v508_v57, %v5158_v10 }
  0x9d   : >> { %2601 = vmatpush1.msra.mxu1 %v5183_v33  ;;  %814 = vmatpush1.msra.mxu0 %v5185_v31  ;;  %v563_v35 = vmul.f32 %v524_v62, %v5159_v9  ;;  %v564_v38 = vmul.f32 %v524_v62, %v5158_v10 }
  0x9e   : >> { %2586 = vmatprep.subr.mxu1 %v5184_v32  ;;  %815 = vmatprep.subr.mxu0 %v5186_v30 }
  0x9f   : >> { %2602 = vmatpush1.msra.mxu1 %v5185_v31  ;;  %816 = vmatpush1.msra.mxu0 %v5187_v29 }
  0xa0   : >> { %2587 = vmatprep.subr.mxu1 %v5186_v30  ;;  %817 = vmatprep.subr.mxu0 %v5188_v28 }
  0xa1   : >> { %2603 = vmatpush1.msra.mxu1 %v5187_v29  ;;  %818 = vmatpush1.msra.mxu0 %v5189_v27 }
  0xa2   : >> { %2588 = vmatprep.subr.mxu1 %v5188_v28  ;;  %819 = vmatprep.subr.mxu0 %v5190_v26  ;;  %v561_v28 = vmul.f32 %v524_v62, %v5161_v7 }
  0xa3   : >> { %2604 = vmatpush1.msra.mxu1 %v5189_v27  ;;  %820 = vmatpush1.msra.mxu0 %v5191_v25  ;;  %v545_v27 = vmul.f32 %v508_v57, %v5161_v7 }
  0xa4   : >> { %2589 = vmatprep.subr.mxu1 %v5190_v26  ;;  %821 = vmatprep.subr.mxu0 %v5192_v24 }
  0xa5   : >> { %2605 = vmatpush1.msra.mxu1 %v5191_v25  ;;  %822 = vmatpush1.msra.mxu0 %v5193_v23  ;;  %v3464_v25 = vrot.slane %v493_v52, %v3444_v53  ;;  %v3482_v52 = vrot.slane %v503_v2, %v3444_v53  ;;  %v546_v2 = vmul.f32 %v508_v57, %v5160_v8 }
  0xa6   : >> { %2590 = vmatprep.subr.mxu1 %v5192_v24  ;;  %823 = vmatprep.subr.mxu0 %v5194_v22 }
  0xa7   : >> { %2606 = vmatpush1.msra.mxu1 %v5193_v23  ;;  %824 = vmatpush1.msra.mxu0 %v5195_v21  ;;  %v549_v41 = vmul.f32 %v3464_v25, %v5161_v7  ;;  %v552_v50 = vmul.f32 %v3464_v25, %v5158_v10 }
  0xa8   : >> { %2591 = vmatprep.subr.mxu1 %v5194_v22  ;;  %825 = vmatprep.subr.mxu0 %v5196_v20 }
  0xa9   : >> { %2607 = vmatpush1.msra.mxu1 %v5195_v21  ;;  %826 = vmatpush1.msra.mxu0 %v5197_v19  ;;  %v501_v21 = vcombine.high %v479_v54, %v479_v54 }
  0xaa   : >> { %2592 = vmatprep.subr.mxu1 %v5196_v20  ;;  %v3449_v20 = vrot.slane %v472_v63, %v3431_v58 }
  0xab   : >> { %2608 = vmatpush1.msra.mxu1 %v5197_v19  ;;  %v3467_v26 = vrot.slane %v501_v21, %v3444_v53 }
 0x107   : >> { %v327_v55 = vpop.permute.xlu0 %326 }
 0x108   : >> { %v328_v56 = vsel %vm325_vm1, 0.0, %v327_v55  ;;  %v502_v55 = vcombine.high %v486_v0, %v486_v0  ;;  %v3473_v0 = vrot.slane %v3449_v20, %v3444_v53 }
 0x109   : >> { %v334_v19 = vcombine.high %v328_v56, %v328_v56  ;;  %v341_v59 = vrot.slane %v328_v56, %v3431_v58 }
 0x10a   : >> { %v567_v49 = vmul.f32 %v3473_v0, %v5159_v9 }
 0x10b   : >> { %v348_v60 = vrot.slane %v334_v19, %v3431_v58  ;;  %v3453_v22 = vrot.slane %v341_v59, %v3431_v58  ;;  %v331_v61 = vpop.permute.xlu0 %330  ;;  %v349_v21 = vcombine.high %v341_v59, %v341_v59  ;;  %v562_v59 = vmul.f32 %v524_v62, %v5160_v8 }
 0x10c   : >> { %v332_v23 = vsel %vm329_vm2, 0.0, %v331_v61  ;;  %v3476_v61 = vrot.slane %v502_v55, %v3444_v53 }
 0x10d   : >> { %v3458_v24 = vrot.slane %v348_v60, %v3431_v58  ;;  %v610_v56 = vcombine.high %v332_v23, %v332_v23  ;;  %v617_v63 = vrot.slane %v332_v23, %v3431_v58  ;;  %v386_v54 = vrot.slane %v3453_v22, %v3444_v53 }
 0x10e   : >> { %v350_v29 = vcombine.high %v348_v60, %v348_v60  ;;  %v547_v60 = vmul.f32 %v508_v57, %v5159_v9  ;;  %v3506_v39 = vrot.slane %v349_v21, %v3431_v58 }
 0x10f   : >> { %v402_v23 = vrot.slane %v3458_v24, %v3444_v53  ;;  %v624_v19 = vrot.slane %v610_v56, %v3431_v58  ;;  %v625_v30 = vcombine.high %v617_v63, %v617_v63  ;;  %v3487_v31 = vrot.slane %v617_v63, %v3431_v58 }
 0x110   : >> { %v423_v32 = vmul.f32 %v386_v54, %v5165_v3  ;;  %v424_v34 = vmul.f32 %v386_v54, %v5164_v4  ;;  %v425_v48 = vmul.f32 %v386_v54, %v5163_v5 }
 0x111   : >> { %v3490_v55 = vrot.slane %v624_v19, %v3431_v58  ;;  %v439_v56 = vmul.f32 %v402_v23, %v5165_v3  ;;  %v626_v33 = vcombine.high %v624_v19, %v624_v19  ;;  %v662_v63 = vrot.slane %v3487_v31, %v3444_v53 }
 0x112   : >> { %v3509_v19 = vrot.slane %v350_v29, %v3431_v58  ;;  %v3512_v40 = vrot.slane %v625_v30, %v3431_v58  ;;  %v577_v42 = vadd.f32 %v545_v27, %v423_v32  ;;  %v578_v21 = vadd.f32 %v546_v2, %v424_v34 }
 0x113   : >> { %v678_v36 = vrot.slane %v3490_v55, %v3444_v53  ;;  %v699_v43 = vmul.f32 %v662_v63, %v5157_v11  ;;  %v593_v44 = vadd.f32 %v561_v28, %v439_v56  ;;  %v3519_v62 = vrot.slane %v626_v33, %v3431_v58 }
 0x114   : >> { %v700_v45 = vmul.f32 %v662_v63, %v5156_v12  ;;  %v440_v29 = vmul.f32 %v402_v23, %v5164_v4  ;;  %v701_v28 = vmul.f32 %v662_v63, %v5155_v13  ;;  %v441_v56 = vmul.f32 %v402_v23, %v5163_v5 }
 0x115   : >> { %v715_v57 = vmul.f32 %v678_v36, %v5157_v11  ;;  %v731_v46 = vadd.f32 %v699_v43, %v577_v42  ;;  %v716_v47 = vmul.f32 %v678_v36, %v5156_v12  ;;  %v3529_v33 = vrot.slane %v3506_v39, %v3444_v53 }
 0x116   : >> { %v732_v27 = vadd.f32 %v700_v45, %v578_v21  ;;  %v594_v32 = vadd.f32 %v562_v59, %v440_v29  ;;  %v717_v43 = vmul.f32 %v678_v36, %v5155_v13  ;;  %v3544_v45 = vrot.slane %v3512_v40, %v3444_v53 }
 0x117   : >> { %v747_v30 = vadd.f32 %v715_v57, %v593_v44  ;;  %v3532_v34 = vadd.f32 %v731_v46, %v5153_v15  ;;  %v3540_v44 = vrot.slane %v3509_v19, %v3444_v53  ;;  %v579_v2 = vadd.f32 %v547_v60, %v425_v48 }
 0x118   : >> { %v748_v58 = vadd.f32 %v716_v47, %v594_v32  ;;  %v595_v46 = vadd.f32 %v563_v35, %v441_v56  ;;  %v426_v59 = vmul.f32 %v386_v54, %v5162_v6  ;;  %v442_v57 = vmul.f32 %v402_v23, %v5162_v6 }
 0x119   : >> { %5200 = vst [vmem:[#allocation65_spill] sm:$0xff] %v3532_v34  ;;  %v3535_v42 = vadd.f32 %v747_v30, %v5153_v15  ;;  %860 = vmatmul.mubr.f32.vlgmr.msra.gmra.mxu0 %v3532_v34  ;;  %v3552_v21 = vrot.slane %v3519_v62, %v3444_v53  ;;  %v5202_v29 = vmov 0.0   ;;  %v3556_v30 = vadd.f32 %v732_v27, %v5152_v16 }
 0x11a   : >> { %865 = vmatprep.mubr.f32.mxu0 %v5202_v29  ;;  %v733_v47 = vadd.f32 %v701_v28, %v579_v2  ;;  %v3560_v48 = vadd.f32 %v748_v58, %v5152_v16  ;;  %v749_v35 = vadd.f32 %v717_v43, %v595_v46  ;;  %v702_v54 = vmul.f32 %v662_v63, %v5154_v14 }
 0x11b   : >> { %5201 = vst [vmem:[#allocation66_spill] sm:$0xff] %v3535_v42  ;;  %956 = vmatmul.mubr.f32.vlgmr.msra.gmra.mxu1 %v3535_v42  ;;  %5203 = vst [vmem:[#allocation67_spill] sm:$0xff] %v3556_v30  ;;  %v718_v23 = vmul.f32 %v678_v36, %v5154_v14  ;;  %v427_v60 = vmul.f32 %v3529_v33, %v5165_v3  ;;  %v565_v32 = vmul.f32 %v3473_v0, %v5161_v7 }
 0x11c   : >> { %961 = vmatprep.mubr.f32.mxu1 %v5202_v29  ;;  %5204 = vst [vmem:[#allocation68_spill] sm:$0xff] %v3560_v48  ;;  %v550_v27 = vmul.f32 %v3464_v25, %v5160_v8  ;;  %v566_v28 = vmul.f32 %v3473_v0, %v5160_v8  ;;  %v580_v56 = vadd.f32 %v548_v37, %v426_v59 }
 0x11d   : >> { %866 = vmatmul.mubr.f32.gmra.mxu0 %v3556_v30  ;;  %v596_v63 = vadd.f32 %v564_v38, %v442_v57  ;;  %v443_v36 = vmul.f32 %v3540_v44, %v5165_v3  ;;  %v3578_v43 = vadd.f32 %v733_v47, %v5151_v17  ;;  %v703_v58 = vmul.f32 %v3544_v45, %v5157_v11 }
 0x11e   : >> { %871 = vmatprep.mubr.f32.mxu0 %v5202_v29  ;;  %v551_v2 = vmul.f32 %v3464_v25, %v5159_v9  ;;  %v3586_v46 = vadd.f32 %v749_v35, %v5151_v17  ;;  %v734_v37 = vadd.f32 %v702_v54, %v580_v56  ;;  %v719_v59 = vmul.f32 %v3552_v21, %v5157_v11 }
 0x11f   : >> { %962 = vmatmul.mubr.f32.gmra.mxu1 %v3560_v48  ;;  %5205 = vst [vmem:[#allocation69_spill] sm:$0xff] %v3578_v43  ;;  %v750_v38 = vadd.f32 %v718_v23, %v596_v63  ;;  %v581_v57 = vadd.f32 %v549_v41, %v427_v60  ;;  %v428_v47 = vmul.f32 %v3529_v33, %v5164_v4 }
 0x120   : >> { %967 = vmatprep.mubr.f32.mxu1 %v5202_v29  ;;  %5206 = vst [vmem:[#allocation70_spill] sm:$0xff] %v3586_v46  ;;  %v597_v35 = vadd.f32 %v565_v32, %v443_v36  ;;  %v444_v54 = vmul.f32 %v3540_v44, %v5164_v4  ;;  %v568_v41 = vmul.f32 %v3473_v0, %v5158_v10 }
 0x121   : >> { %872 = vmatmul.mubr.f32.gmra.mxu0 %v3578_v43  ;;  %v735_v23 = vadd.f32 %v703_v58, %v581_v57  ;;  %v704_v60 = vmul.f32 %v3544_v45, %v5156_v12  ;;  %v553_v25 = vmul.f32 %v3467_v26, %v5161_v7  ;;  %v3609_v56 = vadd.f32 %v734_v37, %v5150_v18 }
 0x122   : >> { %877 = vmatprep.mubr.f32.mxu0 %v5202_v29  ;;  %v3612_v32 = vadd.f32 %v750_v38, %v5150_v18  ;;  %v751_v63 = vadd.f32 %v719_v59, %v597_v35  ;;  %v720_v0 = vmul.f32 %v3552_v21, %v5156_v12  ;;  %v379_v36 = vcombine.high %v3453_v22, %v3453_v22 }
 0x123   : >> { %968 = vmatmul.mubr.f32.gmra.mxu1 %v3586_v46  ;;  %5207 = vst [vmem:[#allocation71_spill] sm:$0xff] %v3609_v56  ;;  %v380_v58 = vcombine.high %v3458_v24, %v3458_v24  ;;  %v655_v57 = vcombine.high %v3487_v31, %v3487_v31  ;;  %v582_v48 = vadd.f32 %v550_v27, %v428_v47 }
 0x124   : >> { %973 = vmatprep.mubr.f32.mxu1 %v5202_v29  ;;  %5208 = vst [vmem:[#allocation72_spill] sm:$0xff] %v3612_v32  ;;  %v598_v37 = vadd.f32 %v566_v28, %v444_v54  ;;  %v429_v38 = vmul.f32 %v3529_v33, %v5163_v5  ;;  %v445_v59 = vmul.f32 %v3540_v44, %v5163_v5 }
 0x125   : >> { %878 = vmatmul.mubr.f32.gmra.mxu0 %v3609_v56  ;;  %v656_v22 = vcombine.high %v3490_v55, %v3490_v55  ;;  %v3632_v24 = vadd.f32 %v735_v23, %v5153_v15  ;;  %v736_v31 = vadd.f32 %v704_v60, %v582_v48  ;;  %v3636_v27 = vadd.f32 %v751_v63, %v5153_v15 }
 0x126   : >> { %883 = vmatprep.mubr.f32.mxu0 %v5202_v29  ;;  %v752_v28 = vadd.f32 %v720_v0, %v598_v37  ;;  %v705_v47 = vmul.f32 %v3544_v45, %v5155_v13  ;;  %v721_v35 = vmul.f32 %v3552_v21, %v5155_v13  ;;  %v3643_v55 = vrot.slane %v379_v36, %v3444_v53 }
 0x127   : >> { %974 = vmatmul.mubr.f32.gmra.mxu1 %v3612_v32  ;;  %5209 = vst [vmem:[#allocation73_spill] sm:$0xff] %v3632_v24  ;;  %5210 = vst [vmem:[#allocation74_spill] sm:$0xff] %v3636_v27  ;;  %v3646_v54 = vrot.slane %v380_v58, %v3444_v53  ;;  %v3649_v23 = vrot.slane %v655_v57, %v3444_v53  ;;  %v430_v48 = vmul.f32 %v3529_v33, %v5162_v6 }
 0x128   : >> { %979 = vmatprep.mubr.f32.mxu1 %v5202_v29  ;;  %v583_v60 = vadd.f32 %v551_v2, %v429_v38  ;;  %v599_v63 = vadd.f32 %v567_v49, %v445_v59  ;;  %v446_v0 = vmul.f32 %v3540_v44, %v5162_v6  ;;  %v3658_v36 = vrot.slane %v656_v22, %v3444_v53 }
 0x129   : >> { %884 = vmatmul.mubr.f32.gmra.mxu0 %v3632_v24  ;;  %v3662_v58 = vadd.f32 %v736_v31, %v5152_v16  ;;  %v706_v33 = vmul.f32 %v3544_v45, %v5154_v14  ;;  %v3668_v57 = vadd.f32 %v752_v28, %v5152_v16  ;;  %v722_v44 = vmul.f32 %v3552_v21, %v5154_v14 }
 0x12a   : >> { %889 = vmatprep.mubr.f32.mxu0 %v5202_v29  ;;  %v737_v49 = vadd.f32 %v705_v47, %v583_v60  ;;  %v753_v2 = vadd.f32 %v721_v35, %v599_v63  ;;  %v584_v37 = vadd.f32 %v552_v50, %v430_v48  ;;  %v431_v38 = vmul.f32 %v3643_v55, %v5165_v3 }
 0x12b   : >> { %980 = vmatmul.mubr.f32.gmra.mxu1 %v3636_v27  ;;  %5211 = vst [vmem:[#allocation75_spill] sm:$0xff] %v3662_v58  ;;  %5212 = vst [vmem:[#allocation76_spill] sm:$0xff] %v3668_v57  ;;  %v569_v59 = vmul.f32 %v3476_v61, %v5161_v7  ;;  %v554_v22 = vmul.f32 %v3467_v26, %v5160_v8  ;;  %v600_v45 = vadd.f32 %v568_v41, %v446_v0 }
 0x12c   : >> { %985 = vmatprep.mubr.f32.mxu1 %v5202_v29  ;;  %v447_v31 = vmul.f32 %v3646_v54, %v5165_v3  ;;  %v570_v50 = vmul.f32 %v3476_v61, %v5160_v8  ;;  %v738_v21 = vadd.f32 %v706_v33, %v584_v37  ;;  %v707_v28 = vmul.f32 %v3649_v23, %v5157_v11 }
 0x12d   : >> { %890 = vmatmul.mubr.f32.gmra.mxu0 %v3662_v58  ;;  %v555_v47 = vmul.f32 %v3467_v26, %v5159_v9  ;;  %v3691_v35 = vadd.f32 %v737_v49, %v5151_v17  ;;  %v3694_v41 = vadd.f32 %v753_v2, %v5151_v17  ;;  %v754_v48 = vadd.f32 %v722_v44, %v600_v45 }
 0x12e   : >> { %895 = vmatprep.mubr.f32.mxu0 %v5202_v29  ;;  %v723_v60 = vmul.f32 %v3658_v36, %v5157_v11  ;;  %v585_v63 = vadd.f32 %v553_v25, %v431_v38  ;;  %v571_v0 = vmul.f32 %v3476_v61, %v5159_v9  ;;  %v556_v33 = vmul.f32 %v3467_v26, %v5158_v10 }
 0x12f   : >> { %986 = vmatmul.mubr.f32.gmra.mxu1 %v3668_v57  ;;  %5213 = vst [vmem:[#allocation77_spill] sm:$0xff] %v3691_v35  ;;  %5214 = vst [vmem:[#allocation78_spill] sm:$0xff] %v3694_v41  ;;  %v572_v37 = vmul.f32 %v3476_v61, %v5158_v10  ;;  %v601_v49 = vadd.f32 %v569_v59, %v447_v31  ;;  %v432_v2 = vmul.f32 %v3643_v55, %v5164_v4 }
 0x130   : >> { %991 = vmatprep.mubr.f32.mxu1 %v5202_v29  ;;  %v448_v25 = vmul.f32 %v3646_v54, %v5164_v4  ;;  %v3712_v44 = vadd.f32 %v738_v21, %v5150_v18  ;;  %v739_v26 = vadd.f32 %v707_v28, %v585_v63  ;;  %v5216_v61 = vcombine.high %v3449_v20, %v3449_v20 }
 0x131   : >> { %896 = vmatmul.mubr.f32.gmra.mxu0 %v3691_v35  ;;  %v3722_v59 = vadd.f32 %v754_v48, %v5150_v18  ;;  %v755_v45 = vadd.f32 %v723_v60, %v601_v49  ;;  %v708_v31 = vmul.f32 %v3649_v23, %v5156_v12  ;;  %v724_v21 = vmul.f32 %v3658_v36, %v5156_v12 }
 0x132   : >> { %901 = vmatprep.mubr.f32.mxu0 %v5202_v29  ;;  %5215 = vst [vmem:[#allocation79_spill] sm:$0xff] %v3712_v44  ;;  %v3719_v38 = vrot.slane %v5216_v61, %v3444_v53  ;;  %v382_v28 = vcombine.high %v3509_v19, %v3509_v19  ;;  %v657_v20 = vcombine.high %v3512_v40, %v3512_v40 }
 0x133   : >> { %992 = vmatmul.mubr.f32.gmra.mxu1 %v3694_v41  ;;  %5217 = vst [vmem:[#allocation80_spill] sm:$0xff] %v3722_v59  ;;  %v381_v41 = vcombine.high %v3506_v39, %v3506_v39  ;;  %v433_v48 = vmul.f32 %v3643_v55, %v5163_v5  ;;  %v586_v60 = vadd.f32 %v554_v22, %v432_v2 }
 0x134   : >> { %997 = vmatprep.mubr.f32.mxu1 %v5202_v29  ;;  %v602_v63 = vadd.f32 %v570_v50, %v448_v25  ;;  %v449_v49 = vmul.f32 %v3646_v54, %v5163_v5  ;;  %v658_v39 = vcombine.high %v3519_v62, %v3519_v62  ;;  %v3744_v19 = vadd.f32 %v739_v26, %v5153_v15 }
 0x135   : >> { %902 = vmatmul.mubr.f32.gmra.mxu0 %v3712_v44  ;;  %v709_v40 = vmul.f32 %v3649_v23, %v5155_v13  ;;  %v3750_v61 = vadd.f32 %v755_v45, %v5153_v15  ;;  %v740_v22 = vadd.f32 %v708_v31, %v586_v60  ;;  %v725_v2 = vmul.f32 %v3658_v36, %v5155_v13 }
 0x136   : >> { %907 = vmatprep.mubr.f32.mxu0 %v5202_v29  ;;  %5218 = vst [vmem:[#allocation81_spill] sm:$0xff] %v3744_v19  ;;  %v756_v50 = vadd.f32 %v724_v21, %v602_v63  ;;  %v3755_v62 = vrot.slane %v381_v41, %v3444_v53  ;;  %v3758_v25 = vrot.slane %v382_v28, %v3444_v53 }
 0x137   : >> { %998 = vmatmul.mubr.f32.gmra.mxu1 %v3722_v59  ;;  %5219 = vst [vmem:[#allocation82_spill] sm:$0xff] %v3750_v61  ;;  %v587_v26 = vadd.f32 %v555_v47, %v433_v48  ;;  %v434_v59 = vmul.f32 %v3643_v55, %v5162_v6  ;;  %v3763_v57 = vrot.slane %v657_v20, %v3444_v53 }
 0x138   : >> { %1003 = vmatprep.mubr.f32.mxu1 %v5202_v29  ;;  %v603_v45 = vadd.f32 %v571_v0, %v449_v49  ;;  %v450_v31 = vmul.f32 %v3646_v54, %v5162_v6  ;;  %v3770_v41 = vrot.slane %v658_v39, %v3444_v53  ;;  %v710_v55 = vmul.f32 %v3649_v23, %v5154_v14 }
 0x139   : >> { %908 = vmatmul.mubr.f32.gmra.mxu0 %v3744_v19  ;;  %v741_v47 = vadd.f32 %v709_v40, %v587_v26  ;;  %v3777_v21 = vadd.f32 %v740_v22, %v5152_v16  ;;  %v3780_v28 = vadd.f32 %v756_v50, %v5152_v16  ;;  %v726_v54 = vmul.f32 %v3658_v36, %v5154_v14 }
 0x13a   : >> { %913 = vmatprep.mubr.f32.mxu0 %v5202_v29  ;;  %v757_v0 = vadd.f32 %v725_v2, %v603_v45  ;;  %v588_v53 = vadd.f32 %v556_v33, %v434_v59  ;;  %v557_v20 = vmul.f32 %v3482_v52, %v5161_v7  ;;  %v573_v48 = vmul.f32 %v3719_v38, %v5161_v7 }
 0x13b   : >> { %1004 = vmatmul.mubr.f32.gmra.mxu1 %v3750_v61  ;;  %5220 = vst [vmem:[#allocation83_spill] sm:$0xff] %v3777_v21  ;;  %5221 = vst [vmem:[#allocation84_spill] sm:$0xff] %v3780_v28  ;;  %v604_v23 = vadd.f32 %v572_v37, %v450_v31  ;;  %v435_v60 = vmul.f32 %v3755_v62, %v5165_v3  ;;  %v451_v63 = vmul.f32 %v3758_v25, %v5165_v3 }
 0x13c   : >> { %1009 = vmatprep.mubr.f32.mxu1 %v5202_v29  ;;  %v3796_v36 = vadd.f32 %v741_v47, %v5151_v17  ;;  %v742_v33 = vadd.f32 %v710_v55, %v588_v53  ;;  %v3800_v59 = vadd.f32 %v757_v0, %v5151_v17  ;;  %v711_v37 = vmul.f32 %v3763_v57, %v5157_v11 }
 0x13d   : >> { %914 = vmatmul.mubr.f32.gmra.mxu0 %v3777_v21  ;;  %v758_v49 = vadd.f32 %v726_v54, %v604_v23  ;;  %v727_v39 = vmul.f32 %v3770_v41, %v5157_v11  ;;  %v436_v40 = vmul.f32 %v3755_v62, %v5164_v4  ;;  %v558_v22 = vmul.f32 %v3482_v52, %v5160_v8 }
 0x13e   : >> { %919 = vmatprep.mubr.f32.mxu0 %v5202_v29  ;;  %5222 = vst [vmem:[#allocation85_spill] sm:$0xff] %v3796_v36  ;;  %5223 = vst [vmem:[#allocation86_spill] sm:$0xff] %v3800_v59  ;;  %v574_v50 = vmul.f32 %v3719_v38, %v5160_v8  ;;  %v589_v2 = vadd.f32 %v557_v20, %v435_v60  ;;  %v605_v26 = vadd.f32 %v573_v48, %v451_v63 }
 0x13f   : >> { %1010 = vmatmul.mubr.f32.gmra.mxu1 %v3780_v28  ;;  %v452_v45 = vmul.f32 %v3758_v25, %v5164_v4  ;;  %v3818_v31 = vadd.f32 %v742_v33, %v5150_v18  ;;  %v712_v47 = vmul.f32 %v3763_v57, %v5156_v12  ;;  %v3824_v55 = vadd.f32 %v758_v49, %v5150_v18 }
 0x140   : >> { %1015 = vmatprep.mubr.f32.mxu1 %v5202_v29  ;;  %v743_v0 = vadd.f32 %v711_v37, %v589_v2  ;;  %v759_v54 = vadd.f32 %v727_v39, %v605_v26  ;;  %v728_v53 = vmul.f32 %v3770_v41, %v5156_v12  ;;  %v590_v20 = vadd.f32 %v558_v22, %v436_v40 }
 0x141   : >> { %920 = vmatmul.mubr.f32.gmra.mxu0 %v3796_v36  ;;  %5224 = vst [vmem:[#allocation87_spill] sm:$0xff] %v3818_v31  ;;  %5225 = vst [vmem:[#allocation88_spill] sm:$0xff] %v3824_v55  ;;  %v437_v48 = vmul.f32 %v3755_v62, %v5163_v5  ;;  %v559_v23 = vmul.f32 %v3482_v52, %v5159_v9  ;;  %v606_v60 = vadd.f32 %v574_v50, %v452_v45 }
 0x142   : >> { %925 = vmatprep.mubr.f32.mxu0 %v5202_v29  ;;  %v453_v63 = vmul.f32 %v3758_v25, %v5163_v5  ;;  %v575_v33 = vmul.f32 %v3719_v38, %v5159_v9  ;;  %v744_v49 = vadd.f32 %v712_v47, %v590_v20  ;;  %v713_v37 = vmul.f32 %v3763_v57, %v5155_v13 }
 0x143   : >> { %1016 = vmatmul.mubr.f32.gmra.mxu1 %v3800_v59  ;;  %v3843_v39 = vadd.f32 %v743_v0, %v5153_v15  ;;  %v3846_v40 = vadd.f32 %v759_v54, %v5153_v15  ;;  %v760_v22 = vadd.f32 %v728_v53, %v606_v60  ;;  %v729_v50 = vmul.f32 %v3770_v41, %v5155_v13 }
 0x144   : >> { %1021 = vmatprep.mubr.f32.mxu1 %v5202_v29  ;;  %v591_v2 = vadd.f32 %v559_v23, %v437_v48  ;;  %v560_v26 = vmul.f32 %v3482_v52, %v5158_v10  ;;  %v576_v45 = vmul.f32 %v3719_v38, %v5158_v10  ;;  %v607_v47 = vadd.f32 %v575_v33, %v453_v63 }
 0x145   : >> { %926 = vmatmul.mubr.f32.gmra.mxu0 %v3818_v31  ;;  %5226 = vst [vmem:[#allocation89_spill] sm:$0xff] %v3843_v39  ;;  %5227 = vst [vmem:[#allocation90_spill] sm:$0xff] %v3846_v40  ;;  %v438_v0 = vmul.f32 %v3755_v62, %v5162_v6  ;;  %v454_v54 = vmul.f32 %v3758_v25, %v5162_v6  ;;  %v3862_v53 = vadd.f32 %v744_v49, %v5152_v16 }
 0x146   : >> { %931 = vmatprep.mubr.f32.mxu0 %v5202_v29  ;;  %v745_v52 = vadd.f32 %v713_v37, %v591_v2  ;;  %v3866_v38 = vadd.f32 %v760_v22, %v5152_v16  ;;  %v761_v20 = vadd.f32 %v729_v50, %v607_v47  ;;  %v714_v48 = vmul.f32 %v3763_v57, %v5154_v14 }
 0x147   : >> { %1022 = vmatmul.mubr.f32.gmra.mxu1 %v3824_v55  ;;  %5228 = vst [vmem:[#allocation91_spill] sm:$0xff] %v3862_v53  ;;  %v730_v62 = vmul.f32 %v3770_v41, %v5154_v14  ;;  %v592_v25 = vadd.f32 %v560_v26, %v438_v0  ;;  %v608_v23 = vadd.f32 %v576_v45, %v454_v54 }
 0x148   : >> { %1027 = vmatprep.mubr.f32.mxu1 %v5202_v29  ;;  %5229 = vst [vmem:[#allocation92_spill] sm:$0xff] %v3866_v38  ;;  %v3877_v60 = vadd.f32 %v745_v52, %v5151_v17  ;;  %v3880_v63 = vadd.f32 %v761_v20, %v5151_v17 }
 0x149   : >> { %932 = vmatmul.mubr.f32.gmra.mxu0 %v3843_v39  ;;  %v746_v57 = vadd.f32 %v714_v48, %v592_v25  ;;  %v762_v33 = vadd.f32 %v730_v62, %v608_v23 }
 0x14a   : >> { %937 = vmatprep.mubr.f32.mxu0 %v5202_v29  ;;  %5230 = vst [vmem:[#allocation93_spill] sm:$0xff] %v3877_v60  ;;  %5231 = vst [vmem:[#allocation94_spill] sm:$0xff] %v3880_v63 }
 0x14b   : >> { %1028 = vmatmul.mubr.f32.gmra.mxu1 %v3846_v40  ;;  %v3887_v41 = vadd.f32 %v746_v57, %v5150_v18  ;;  %v3890_v49 = vadd.f32 %v762_v33, %v5150_v18 }
 0x14c   : >> { %1033 = vmatprep.mubr.f32.mxu1 %v5202_v29 }
 0x14d   : >> { %938 = vmatmul.mubr.f32.gmra.mxu0 %v3862_v53  ;;  %5232 = vst [vmem:[#allocation95_spill] sm:$0xff] %v3887_v41  ;;  %5233 = vst [vmem:[#allocation96_spill] sm:$0xff] %v3890_v49 }
 0x14e   : >> { %943 = vmatprep.mubr.f32.mxu0 %v5202_v29 }
 0x14f   : >> { %1034 = vmatmul.mubr.f32.gmra.mxu1 %v3866_v38 }
 0x150   : >> { %1039 = vmatprep.mubr.f32.mxu1 %v5202_v29 }
 0x151   : >> { %944 = vmatmul.mubr.f32.gmra.mxu0 %v3877_v60 }
 0x152   : >> { %949 = vmatprep.mubr.f32.mxu0 %v5202_v29 }
 0x153   : >> { %1040 = vmatmul.mubr.f32.gmra.mxu1 %v3880_v63 }
 0x154   : >> { %1045 = vmatprep.mubr.f32.mxu1 %v5202_v29 }
 0x155   : >> { %950 = vmatmul.mubr.f32.gmra.mxu0 %v3887_v41 }
 0x157   : >> { %1046 = vmatmul.mubr.f32.gmra.mxu1 %v3890_v49 }
 0x1d9   : >> { %v3894_v37 = vpop.f32.mrf.mxu0 }
 0x1da   : >> { %5234 = vst [vmem:[#allocation97_spill] sm:$0xff] %v3894_v37 }
 0x1db   : >> { %v3896_v22 = vpop.f32.mrf.mxu1  ;;  %v3898_v50 = vpop.f32.mrf.mxu0 }
 0x1dc   : >> { %5235 = vst [vmem:[#allocation98_spill] sm:$0xff] %v3896_v22  ;;  %1084 = vrot.lane.b32.xlu1 %v3898_v50, %s3052_s25 }
 0x1dd   : >> { %v3900_v2 = vpop.f32.mrf.mxu1  ;;  %v3906_v29 = vpop.f32.mrf.mxu0 }
 0x1de   : >> { %1116 = vrot.lane.b32.xlu0 %v3900_v2, %s3052_s25  ;;  %5236 = vst [vmem:[#allocation99_spill] sm:$0xff] %v3906_v29 }
 0x1df   : >> { %v3908_v26 = vpop.f32.mrf.mxu1  ;;  %v3910_v45 = vpop.f32.mrf.mxu0 }
 0x1e0   : >> { %5237 = vst [vmem:[#allocation100_spill] sm:$0xff] %v3908_v26  ;;  %1086 = vrot.lane.b32.xlu1 %v3910_v45, %s3052_s25 }
 0x1e1   : >> { %v3912_v47 = vpop.f32.mrf.mxu1  ;;  %v3916_v0 = vpop.f32.mrf.mxu0 }
 0x1e2   : >> { %5238 = vst [vmem:[#allocation101_spill] sm:$0xff] %v3916_v0 }
 0x1e3   : >> { %v3918_v54 = vpop.f32.mrf.mxu1  ;;  %v3920_v52 = vpop.f32.mrf.mxu0 }
 0x1e4   : >> { %5239 = vst [vmem:[#allocation102_spill] sm:$0xff] %v3918_v54  ;;  %1088 = vrot.lane.b32.xlu0 %v3920_v52, %s3052_s25  ;;  %1118 = vrot.lane.b32.xlu1 %v3912_v47, %s3052_s25 }
 0x1e5   : >> { %v3922_v20 = vpop.f32.mrf.mxu1  ;;  %v3928_v48 = vpop.f32.mrf.mxu0 }
 0x1e6   : >> { %5240 = vst [vmem:[#allocation103_spill] sm:$0xff] %v3928_v48 }
 0x1e7   : >> { %v3930_v62 = vpop.f32.mrf.mxu1  ;;  %v3932_v25 = vpop.f32.mrf.mxu0 }
 0x1e8   : >> { %5241 = vst [vmem:[#allocation104_spill] sm:$0xff] %v3930_v62  ;;  %1090 = vrot.lane.b32.xlu1 %v3932_v25, %s3052_s25  ;;  %1120 = vrot.lane.b32.xlu0 %v3922_v20, %s3052_s25 }
 0x1e9   : >> { %v3934_v23 = vpop.f32.mrf.mxu1  ;;  %v3940_v57 = vpop.f32.mrf.mxu0 }
 0x1ea   : >> { %5242 = vst [vmem:[#allocation105_spill] sm:$0xff] %v3940_v57 }
 0x1eb   : >> { %v3942_v33 = vpop.f32.mrf.mxu1  ;;  %v3944_v3 = vpop.f32.mrf.mxu0 }
 0x1ec   : >> { %5243 = vst [vmem:[#allocation106_spill] sm:$0xff] %v3942_v33  ;;  %1122 = vrot.lane.b32.xlu0 %v3934_v23, %s3052_s25 }
 0x1ed   : >> { %v3946_v4 = vpop.f32.mrf.mxu1  ;;  %v3950_v5 = vpop.f32.mrf.mxu0 }
 0x1ee   : >> { %5244 = vst [vmem:[#allocation107_spill] sm:$0xff] %v3950_v5 }
 0x1ef   : >> { %v3952_v6 = vpop.f32.mrf.mxu1  ;;  %v3954_v7 = vpop.f32.mrf.mxu0 }
 0x1f0   : >> { %5245 = vst [vmem:[#allocation108_spill] sm:$0xff] %v3952_v6  ;;  %1094 = vrot.lane.b32.xlu1 %v3954_v7, %s3052_s25  ;;  %1092 = vrot.lane.b32.xlu0 %v3944_v3, %s3052_s25 }
 0x1f1   : >> { %v3956_v8 = vpop.f32.mrf.mxu1  ;;  %v3962_v9 = vpop.f32.mrf.mxu0 }
 0x1f2   : >> { %5246 = vst [vmem:[#allocation109_spill] sm:$0xff] %v3962_v9 }
 0x1f3   : >> { %v3964_v10 = vpop.f32.mrf.mxu1  ;;  %v3966_v11 = vpop.f32.mrf.mxu0 }
 0x1f4   : >> { %5247 = vst [vmem:[#allocation110_spill] sm:$0xff] %v3964_v10  ;;  %1124 = vrot.lane.b32.xlu0 %v3946_v4, %s3052_s25  ;;  %1126 = vrot.lane.b32.xlu1 %v3956_v8, %s3052_s25 }
 0x1f5   : >> { %v3968_v12 = vpop.f32.mrf.mxu1  ;;  %v3974_v13 = vpop.f32.mrf.mxu0 }
 0x1f6   : >> { %5248 = vst [vmem:[#allocation111_spill] sm:$0xff] %v3974_v13 }
 0x1f7   : >> { %v3976_v14 = vpop.f32.mrf.mxu1  ;;  %v3978_v15 = vpop.f32.mrf.mxu0 }
 0x1f8   : >> { %5249 = vst [vmem:[#allocation112_spill] sm:$0xff] %v3976_v14  ;;  %1096 = vrot.lane.b32.xlu0 %v3966_v11, %s3052_s25  ;;  %1128 = vrot.lane.b32.xlu1 %v3968_v12, %s3052_s25 }
 0x1f9   : >> { %v3980_v16 = vpop.f32.mrf.mxu1  ;;  %v3986_v17 = vpop.f32.mrf.mxu0 }
 0x1fa   : >> { %5250 = vst [vmem:[#allocation113_spill] sm:$0xff] %v3986_v17 }
 0x1fb   : >> { %v3988_v18 = vpop.f32.mrf.mxu1  ;;  %v3990_v49 = vpop.f32.mrf.mxu0 }
 0x1fc   : >> { %5251 = vst [vmem:[#allocation114_spill] sm:$0xff] %v3988_v18  ;;  %1100 = vrot.lane.b32.xlu0 %v3990_v49, %s3052_s25  ;;  %1098 = vrot.lane.b32.xlu1 %v3978_v15, %s3052_s25 }
 0x1fd   : >> { %v3992_v63 = vpop.f32.mrf.mxu1  ;;  %v3998_v38 = vpop.f32.mrf.mxu0 }
 0x1fe   : >> { %5252 = vst [vmem:[#allocation115_spill] sm:$0xff] %v3998_v38 }
 0x1ff   : >> { %v4000_v40 = vpop.f32.mrf.mxu1  ;;  %v4002_v41 = vpop.f32.mrf.mxu0 }
 0x200   : >> { %5253 = vst [vmem:[#allocation116_spill] sm:$0xff] %v4000_v40  ;;  %1130 = vrot.lane.b32.xlu1 %v3980_v16, %s3052_s25  ;;  %1132 = vrot.lane.b32.xlu0 %v3992_v63, %s3052_s25 }
 0x201   : >> { %v4004_v60 = vpop.f32.mrf.mxu1  ;;  %v4010_v53 = vpop.f32.mrf.mxu0 }
 0x202   : >> { %5254 = vst [vmem:[#allocation117_spill] sm:$0xff] %v4010_v53 }
 0x203   : >> { %v4012_v39 = vpop.f32.mrf.mxu1  ;;  %v4014_v55 = vpop.f32.mrf.mxu0 }
 0x204   : >> { %5255 = vst [vmem:[#allocation118_spill] sm:$0xff] %v4012_v39  ;;  %1102 = vrot.lane.b32.xlu1 %v4002_v41, %s3052_s25  ;;  %1104 = vrot.lane.b32.xlu0 %v4014_v55, %s3052_s25 }
 0x205   : >> { %v4016_v59 = vpop.f32.mrf.mxu1  ;;  %v4022_v40 = vpop.f32.mrf.mxu0 }
 0x206   : >> { %5256 = vst [vmem:[#allocation119_spill] sm:$0xff] %v4022_v40 }
 0x207   : >> { %v4024_v18 = vpop.f32.mrf.mxu1  ;;  %v4026_v28 = vpop.f32.mrf.mxu0 }
 0x208   : >> { %5257 = vst [vmem:[#allocation120_spill] sm:$0xff] %v4024_v18  ;;  %1134 = vrot.lane.b32.xlu1 %v4004_v60, %s3052_s25  ;;  %1136 = vrot.lane.b32.xlu0 %v4016_v59, %s3052_s25 }
 0x209   : >> { %v4028_v61 = vpop.f32.mrf.mxu1  ;;  %v4034_v39 = vpop.f32.mrf.mxu0 }
 0x20a   : >> { %5258 = vst [vmem:[#allocation121_spill] sm:$0xff] %v4034_v39 }
 0x20b   : >> { %v4036_v53 = vpop.f32.mrf.mxu1  ;;  %v4038_v31 = vpop.f32.mrf.mxu0 }
 0x20c   : >> { %5259 = vst [vmem:[#allocation122_spill] sm:$0xff] %v4036_v53  ;;  %1106 = vrot.lane.b32.xlu1 %v4026_v28, %s3052_s25  ;;  %1108 = vrot.lane.b32.xlu0 %v4038_v31, %s3052_s25 }
 0x20d   : >> { %v4040_v36 = vpop.f32.mrf.mxu1  ;;  %v4046_v18 = vpop.f32.mrf.mxu0 }
 0x20e   : >> { %5260 = vst [vmem:[#allocation123_spill] sm:$0xff] %v4046_v18 }
 0x20f   : >> { %v4048_v40 = vpop.f32.mrf.mxu1  ;;  %v4050_v38 = vpop.f32.mrf.mxu0 }
 0x210   : >> { %5261 = vst [vmem:[#allocation124_spill] sm:$0xff] %v4048_v40  ;;  %1110 = vrot.lane.b32.xlu1 %v4050_v38, %s3052_s25  ;;  %1140 = vrot.lane.b32.xlu0 %v4040_v36, %s3052_s25 }
 0x211   : >> { %v4052_v17 = vpop.f32.mrf.mxu1  ;;  %v4058_v53 = vpop.f32.mrf.mxu0 }
 0x212   : >> { %5262 = vst [vmem:[#allocation125_spill] sm:$0xff] %v4058_v53 }
 0x213   : >> { %v4060_v39 = vpop.f32.mrf.mxu0  ;;  %v4062_v21 = vpop.f32.mrf.mxu1 }
 0x214   : >> { %5263 = vst [vmem:[#allocation126_spill] sm:$0xff] %v4062_v21  ;;  %1112 = vrot.lane.b32.xlu0 %v4060_v39, %s3052_s25  ;;  %1142 = vrot.lane.b32.xlu1 %v4052_v17, %s3052_s25 }
 0x215   : >> { %v4068_v40 = vpop.f32.mrf.mxu0  ;;  %v4070_v18 = vpop.f32.mrf.mxu1 }
 0x216   : >> { %5264 = vst [vmem:[#allocation127_spill] sm:$0xff] %v4068_v40 }
 0x217   : >> { %v4076_v53 = vpop.f32.mrf.mxu0  ;;  %v4078_v19 = vpop.f32.mrf.mxu1 }
 0x218   : >> { %1138 = vrot.lane.b32.xlu0 %v4028_v61, %s3052_s25  ;;  %1144 = vrot.lane.b32.xlu1 %v4070_v18, %s3052_s25  ;;  %5265 = vst [vmem:[#allocation128_spill] sm:$0xff] %v4078_v19 }
 0x219   : >> { %v4082_v21 = vpop.f32.mrf.mxu1 }
 0x21c   : >> { %1114 = vrot.lane.b32.xlu1 %v4076_v53, %s3052_s25 }
 0x220   : >> { %1146 = vrot.lane.b32.xlu1 %v4082_v21, %s3052_s25 }
 0x24e   : >> { %v1085_v40 = vpop.permute.xlu1 %1084 }
 0x24f   : >> { %v1180_v33 = vmax.f32 %v3898_v50, %v1085_v40 }
 0x250   : >> { %v1117_v14 = vpop.permute.xlu0 %1116 }
 0x251   : >> { %v1213_v35 = vsel %vm1212_vm3, %v1180_v33, -inf  ;;  %v1196_v5 = vmax.f32 %v3900_v2, %v1117_v14 }
 0x252   : >> { %v1087_v10 = vpop.permute.xlu1 %1086 }
 0x253   : >> { %v1181_v6 = vmax.f32 %v3910_v45, %v1087_v10 }
 0x255   : >> { %v1214_v19 = vsel %vm1212_vm3, %v1181_v6, -inf }
 0x256   : >> { %v1089_v27 = vpop.permute.xlu0 %1088  ;;  %v1119_v13 = vpop.permute.xlu1 %1118  ;;  %v1215_v58 = vmax.f32 %v1213_v35, %v1214_v19 }
 0x257   : >> { %v1182_v9 = vmax.f32 %v3920_v52, %v1089_v27  ;;  %v1197_v44 = vmax.f32 %v3912_v47, %v1119_v13  ;;  %v1265_v27 = vsel %vm1212_vm3, %v1196_v5, -inf }
 0x259   : >> { %v1216_v57 = vsel %vm1212_vm3, %v1182_v9, -inf  ;;  %v1266_v40 = vsel %vm1212_vm3, %v1197_v44, -inf }
 0x25a   : >> { %v1091_v24 = vpop.permute.xlu1 %1090  ;;  %v1121_v10 = vpop.permute.xlu0 %1120  ;;  %v1217_v6 = vmax.f32 %v1215_v58, %v1216_v57  ;;  %v1267_v26 = vmax.f32 %v1265_v27, %v1266_v40 }
 0x25b   : >> { %v1183_v62 = vmax.f32 %v3932_v25, %v1091_v24  ;;  %v1198_v32 = vmax.f32 %v3922_v20, %v1121_v10 }
 0x25d   : >> { %v1218_v13 = vsel %vm1212_vm3, %v1183_v62, -inf  ;;  %v1268_v33 = vsel %vm1212_vm3, %v1198_v32, -inf }
 0x25e   : >> { %v1219_v14 = vmax.f32 %v1217_v6, %v1218_v13  ;;  %v1123_v54 = vpop.permute.xlu0 %1122  ;;  %v1269_v19 = vmax.f32 %v1267_v26, %v1268_v33 }
 0x25f   : >> { %v1199_v9 = vmax.f32 %v3934_v23, %v1123_v54 }
 0x260   : >> { %v1220_v35 = vrot.slane %v1219_v14, 4 }
 0x261   : >> { %v1270_v44 = vsel %vm1212_vm3, %v1199_v9, -inf }
 0x262   : >> { %v1221_v46 = vmax.f32 %v1219_v14, %v1220_v35  ;;  %v1271_v24 = vmax.f32 %v1269_v19, %v1270_v44  ;;  %v1095_v48 = vpop.permute.xlu1 %1094  ;;  %v1093_v10 = vpop.permute.xlu0 %1092 }
 0x263   : >> { %v1185_v62 = vmax.f32 %v3954_v7, %v1095_v48  ;;  %v1184_v6 = vmax.f32 %v3944_v3, %v1093_v10 }
 0x264   : >> { %v1222_v58 = vrot.slane %v1221_v46, 2  ;;  %v1272_v57 = vrot.slane %v1271_v24, 4 }
 0x265   : >> { %v1227_v33 = vsel %vm1212_vm3, %v1185_v62, -inf  ;;  %v1226_v35 = vsel %vm1212_vm3, %v1184_v6, -inf }
 0x266   : >> { %v1223_v5 = vmax.f32 %v1221_v46, %v1222_v58  ;;  %v1273_v22 = vmax.f32 %v1271_v24, %v1272_v57  ;;  %v1125_v32 = vpop.permute.xlu0 %1124  ;;  %v1127_v40 = vpop.permute.xlu1 %1126  ;;  %v1228_v58 = vmax.f32 %v1226_v35, %v1227_v33 }
 0x267   : >> { %v1200_v46 = vmax.f32 %v3946_v4, %v1125_v32  ;;  %v1201_v19 = vmax.f32 %v3956_v8, %v1127_v40 }
 0x268   : >> { %v1224_v27 = vrot.slane %v1223_v5, 1  ;;  %v1274_v54 = vrot.slane %v1273_v22, 2 }
 0x269   : >> { %v1278_v62 = vsel %vm1212_vm3, %v1200_v46, -inf  ;;  %v1279_v32 = vsel %vm1212_vm3, %v1201_v19, -inf }
 0x26a   : >> { %v4104_v13 = vmax.f32 %v1223_v5, %v1224_v27  ;;  %v1275_v26 = vmax.f32 %v1273_v22, %v1274_v54  ;;  %v1097_v14 = vpop.permute.xlu0 %1096  ;;  %v1129_v9 = vpop.permute.xlu1 %1128 }
 0x26b   : >> { %v1186_v48 = vmax.f32 %v3966_v11, %v1097_v14  ;;  %v1202_v22 = vmax.f32 %v3968_v12, %v1129_v9  ;;  %v1280_v14 = vmax.f32 %v1278_v62, %v1279_v32 }
 0x26c   : >> { %v1276_v44 = vrot.slane %v1275_v26, 1  ;;  %1421 = vrot.lane.b32.xlu0 %v4104_v13, %s3051_s24 }
 0x26d   : >> { %v1229_v24 = vsel %vm1212_vm3, %v1186_v48, -inf  ;;  %v1281_v27 = vsel %vm1212_vm3, %v1202_v22, -inf }
 0x26e   : >> { %v4115_v10 = vmax.f32 %v1275_v26, %v1276_v44  ;;  %v1101_v57 = vpop.permute.xlu0 %1100  ;;  %v1099_v5 = vpop.permute.xlu1 %1098  ;;  %v1230_v6 = vmax.f32 %v1228_v58, %v1229_v24  ;;  %v1282_v48 = vmax.f32 %v1280_v14, %v1281_v27 }
 0x26f   : >> { %v1187_v40 = vmax.f32 %v3978_v15, %v1099_v5  ;;  %v1188_v56 = vmax.f32 %v3990_v49, %v1101_v57 }
 0x270   : >> { %1429 = vrot.lane.b32.xlu0 %v4115_v10, %s3051_s24 }
 0x271   : >> { %v1231_v54 = vsel %vm1212_vm3, %v1187_v40, -inf  ;;  %v1239_v27 = vsel %vm1212_vm3, %v1188_v56, -inf }
 0x272   : >> { %v1232_v26 = vmax.f32 %v1230_v6, %v1231_v54  ;;  %v1131_v9 = vpop.permute.xlu1 %1130  ;;  %v1133_v33 = vpop.permute.xlu0 %1132 }
 0x273   : >> { %v1203_v35 = vmax.f32 %v3980_v16, %v1131_v9 }
 0x274   : >> { %v1233_v46 = vrot.slane %v1232_v26, 4 }
 0x275   : >> { %v1283_v19 = vsel %vm1212_vm3, %v1203_v35, -inf }
 0x276   : >> { %v1234_v44 = vmax.f32 %v1232_v26, %v1233_v46  ;;  %v1284_v5 = vmax.f32 %v1282_v48, %v1283_v19  ;;  %v1103_v24 = vpop.permute.xlu1 %1102  ;;  %v1105_v58 = vpop.permute.xlu0 %1104 }
 0x277   : >> { %v1189_v22 = vmax.f32 %v4002_v41, %v1103_v24  ;;  %v1190_v14 = vmax.f32 %v4014_v55, %v1105_v58 }
 0x278   : >> { %v1235_v42 = vrot.slane %v1234_v44, 2  ;;  %v1285_v40 = vrot.slane %v1284_v5, 4 }
 0x279   : >> { %v1240_v62 = vsel %vm1212_vm3, %v1189_v22, -inf  ;;  %v1242_v0 = vsel %vm1212_vm3, %v1190_v14, -inf }
 0x27a   : >> { %v1236_v32 = vmax.f32 %v1234_v44, %v1235_v42  ;;  %v1286_v6 = vmax.f32 %v1284_v5, %v1285_v40  ;;  %v1135_v54 = vpop.permute.xlu1 %1134  ;;  %v1137_v9 = vpop.permute.xlu0 %1136  ;;  %v1241_v48 = vmax.f32 %v1239_v27, %v1240_v62 }
 0x27b   : >> { %v1205_v56 = vmax.f32 %v4004_v60, %v1135_v54 }
 0x27c   : >> { %v1237_v26 = vrot.slane %v1236_v32, 1  ;;  %v1287_v35 = vrot.slane %v1286_v6, 2  ;;  %v1243_v44 = vmax.f32 %v1241_v48, %v1242_v0  ;;  %v1206_v48 = vmax.f32 %v4016_v59, %v1137_v9 }
 0x27d   : >> { %v1292_v0 = vsel %vm1212_vm3, %v1205_v56, -inf }
 0x27e   : >> { %v4131_v46 = vmax.f32 %v1236_v32, %v1237_v26  ;;  %v1288_v57 = vmax.f32 %v1286_v6, %v1287_v35  ;;  %v1107_v19 = vpop.permute.xlu1 %1106  ;;  %v1109_v24 = vpop.permute.xlu0 %1108  ;;  %v1204_v6 = vmax.f32 %v3992_v63, %v1133_v33  ;;  %v1294_v56 = vsel %vm1212_vm3, %v1206_v48, -inf }
 0x27f   : >> { %v1191_v22 = vmax.f32 %v4026_v28, %v1107_v19 }
 0x280   : >> { %v1289_v42 = vrot.slane %v1288_v57, 1  ;;  %1423 = vrot.lane.b32.xlu1 %v4131_v46, %s3051_s24  ;;  %v1291_v54 = vsel %vm1212_vm3, %v1204_v6, -inf }
 0x281   : >> { %v1244_v5 = vsel %vm1212_vm3, %v1191_v22, -inf  ;;  %v1293_v19 = vmax.f32 %v1291_v54, %v1292_v0 }
 0x282   : >> { %v4139_v58 = vmax.f32 %v1288_v57, %v1289_v42  ;;  %v1245_v40 = vmax.f32 %v1243_v44, %v1244_v5  ;;  %v1111_v62 = vpop.permute.xlu1 %1110  ;;  %v1141_v32 = vpop.permute.xlu0 %1140  ;;  %v1192_v42 = vmax.f32 %v4038_v31, %v1109_v24 }
 0x283   : >> { %v1193_v57 = vmax.f32 %v4050_v38, %v1111_v62  ;;  %v1295_v9 = vmax.f32 %v1293_v19, %v1294_v56  ;;  %v1208_v0 = vmax.f32 %v4040_v36, %v1141_v32 }
 0x284   : >> { %v1246_v27 = vrot.slane %v1245_v40, 4  ;;  %1431 = vrot.lane.b32.xlu1 %v4139_v58, %s3051_s24  ;;  %v1252_v62 = vsel %vm1212_vm3, %v1192_v42, -inf }
 0x285   : >> { %v1304_v32 = vsel %vm1212_vm3, %v1208_v0, -inf }
 0x286   : >> { %v1247_v14 = vmax.f32 %v1245_v40, %v1246_v27  ;;  %v1113_v26 = vpop.permute.xlu0 %1112  ;;  %v1143_v35 = vpop.permute.xlu1 %1142  ;;  %v1253_v40 = vsel %vm1212_vm3, %v1193_v57, -inf }
 0x287   : >> { %v1194_v33 = vmax.f32 %v4060_v39, %v1113_v26  ;;  %v1209_v27 = vmax.f32 %v4052_v17, %v1143_v35  ;;  %v1254_v48 = vmax.f32 %v1252_v62, %v1253_v40 }
 0x288   : >> { %v1248_v22 = vrot.slane %v1247_v14, 2 }
 0x289   : >> { %v1255_v24 = vsel %vm1212_vm3, %v1194_v33, -inf  ;;  %v1305_v35 = vsel %vm1212_vm3, %v1209_v27, -inf }
 0x28a   : >> { %v1249_v44 = vmax.f32 %v1247_v14, %v1248_v22  ;;  %v1139_v5 = vpop.permute.xlu0 %1138  ;;  %v1145_v43 = vpop.permute.xlu1 %1144 }
 0x28b   : >> { %v1207_v6 = vmax.f32 %v4028_v61, %v1139_v5  ;;  %v1210_v26 = vmax.f32 %v4070_v18, %v1145_v43  ;;  %v1256_v5 = vmax.f32 %v1254_v48, %v1255_v24 }
 0x28c   : >> { %v1250_v51 = vrot.slane %v1249_v44, 1 }
 0x28d   : >> { %v1296_v14 = vsel %vm1212_vm3, %v1207_v6, -inf  ;;  %v1307_v42 = vsel %vm1212_vm3, %v1210_v26, -inf }
 0x28e   : >> { %v4159_v54 = vmax.f32 %v1249_v44, %v1250_v51  ;;  %v1297_v57 = vmax.f32 %v1295_v9, %v1296_v14  ;;  %v1115_v22 = vpop.permute.xlu1 %1114  ;;  %v1306_v51 = vmax.f32 %v1304_v32, %v1305_v35 }
 0x28f   : >> { %v1195_v19 = vmax.f32 %v4076_v53, %v1115_v22 }
 0x290   : >> { %v1298_v56 = vrot.slane %v1297_v57, 4  ;;  %1425 = vrot.lane.b32.xlu0 %v4159_v54, %s3051_s24  ;;  %v1308_v9 = vmax.f32 %v1306_v51, %v1307_v42 }
 0x291   : >> { %v1257_v43 = vsel %vm1212_vm3, %v1195_v19, -inf }
 0x292   : >> { %v1299_v33 = vmax.f32 %v1297_v57, %v1298_v56  ;;  %v1258_v44 = vmax.f32 %v1256_v5, %v1257_v43  ;;  %v1147_v40 = vpop.permute.xlu1 %1146 }
 0x293   : >> { %v1211_v6 = vmax.f32 %v4082_v21, %v1147_v40 }
 0x294   : >> { %v1300_v27 = vrot.slane %v1299_v33, 2  ;;  %v1259_v62 = vrot.slane %v1258_v44, 4 }
 0x295   : >> { %v1309_v24 = vsel %vm1212_vm3, %v1211_v6, -inf }
 0x296   : >> { %v1301_v14 = vmax.f32 %v1299_v33, %v1300_v27  ;;  %v1260_v48 = vmax.f32 %v1258_v44, %v1259_v62  ;;  %v1310_v22 = vmax.f32 %v1308_v9, %v1309_v24 }
 0x298   : >> { %v1302_v37 = vrot.slane %v1301_v14, 1  ;;  %v1261_v0 = vrot.slane %v1260_v48, 2  ;;  %v1311_v29 = vrot.slane %v1310_v22, 4 }
 0x29a   : >> { %v4170_v26 = vmax.f32 %v1301_v14, %v1302_v37  ;;  %v1262_v19 = vmax.f32 %v1260_v48, %v1261_v0  ;;  %v1312_v35 = vmax.f32 %v1310_v22, %v1311_v29 }
 0x29c   : >> { %v1263_v57 = vrot.slane %v1262_v19, 1  ;;  %v1313_v5 = vrot.slane %v1312_v35, 2  ;;  %1433 = vrot.lane.b32.xlu0 %v4170_v26, %s3051_s24 }
 0x29e   : >> { %v4174_v56 = vmax.f32 %v1262_v19, %v1263_v57  ;;  %v1314_v32 = vmax.f32 %v1312_v35, %v1313_v5 }
 0x2a0   : >> { %v1315_v42 = vrot.slane %v1314_v32, 1  ;;  %1427 = vrot.lane.b32.xlu1 %v4174_v56, %s3051_s24 }
 0x2a2   : >> { %v4178_v43 = vmax.f32 %v1314_v32, %v1315_v42 }
 0x2a4   : >> { %1435 = vrot.lane.b32.xlu1 %v4178_v43, %s3051_s24 }
 0x2de   : >> { %v1422_v37 = vpop.permute.xlu0 %1421 }
 0x2df   : >> { %v1445_v29 = vsub.f32 %v3898_v50, %v1422_v37  ;;  %v1446_v51 = vsub.f32 %v3910_v45, %v1422_v37  ;;  %v1447_v33 = vsub.f32 %v3920_v52, %v1422_v37  ;;  %v1448_v44 = vsub.f32 %v3932_v25, %v1422_v37 }
 0x2e1   : >> { %v1477_v40 = vmul.f32 1.442695, %v1445_v29  ;;  %v1479_v6 = vmul.f32 1.442695, %v1446_v51  ;;  %v1481_v9 = vmul.f32 1.442695, %v1447_v33 }
 0x2e2   : >> { %v1430_v27 = vpop.permute.xlu0 %1429  ;;  %v1483_v24 = vmul.f32 1.442695, %v1448_v44 }
 0x2e3   : >> { %2711 = vpow2.f32 %v1477_v40  ;;  %v1461_v62 = vsub.f32 %v3900_v2, %v1430_v27  ;;  %v1462_v14 = vsub.f32 %v3912_v47, %v1430_v27  ;;  %v1463_v48 = vsub.f32 %v3922_v20, %v1430_v27 }
 0x2e4   : >> { %2713 = vpow2.f32 %v1479_v6  ;;  %v1464_v0 = vsub.f32 %v3934_v23, %v1430_v27 }
 0x2e5   : >> { %2715 = vpow2.f32 %v1481_v9  ;;  %v1509_v22 = vmul.f32 1.442695, %v1461_v62  ;;  %v1511_v19 = vmul.f32 1.442695, %v1462_v14  ;;  %v1513_v35 = vmul.f32 1.442695, %v1463_v48 }
 0x2e6   : >> { %2717 = vpow2.f32 %v1483_v24  ;;  %v1515_v57 = vmul.f32 1.442695, %v1464_v0 }
 0x2e7   : >> { %2719 = vpow2.f32 %v1509_v22 }
 0x2e8   : >> { %2721 = vpow2.f32 %v1511_v19 }
 0x2e9   : >> { %2723 = vpow2.f32 %v1513_v35 }
 0x2ea   : >> { %2725 = vpow2.f32 %v1515_v57 }
 0x2f0   : >> { %v4190_v5 = vpop.eup %2711 }
 0x2f1   : >> { %v4192_v32 = vpop.eup %2713  ;;  %1573 = vrot.lane.b32.xlu0 %v4190_v5, %s3052_s25 }
 0x2f2   : >> { %1575 = vrot.lane.b32.xlu1 %v4192_v32, %s3052_s25  ;;  %v1424_v42 = vpop.permute.xlu1 %1423  ;;  %v4201_v33 = vpop.eup %2715 }
 0x2f3   : >> { %v1449_v37 = vsub.f32 %v3944_v3, %v1424_v42  ;;  %v1450_v29 = vsub.f32 %v3954_v7, %v1424_v42  ;;  %v1451_v51 = vsub.f32 %v3966_v11, %v1424_v42  ;;  %v1452_v44 = vsub.f32 %v3978_v15, %v1424_v42  ;;  %v4204_v40 = vpop.eup %2717 }
 0x2f4   : >> { %v4211_v14 = vpop.eup %2719 }
 0x2f5   : >> { %v1485_v6 = vmul.f32 1.442695, %v1449_v37  ;;  %v1487_v27 = vmul.f32 1.442695, %v1450_v29  ;;  %1577 = vrot.lane.b32.xlu0 %v4201_v33, %s3052_s25  ;;  %v1489_v62 = vmul.f32 1.442695, %v1451_v51  ;;  %v4214_v0 = vpop.eup %2721 }
 0x2f6   : >> { %1579 = vrot.lane.b32.xlu1 %v4204_v40, %s3052_s25  ;;  %v1432_v9 = vpop.permute.xlu1 %1431  ;;  %v1491_v48 = vmul.f32 1.442695, %v1452_v44  ;;  %v4221_v57 = vpop.eup %2723 }
 0x2f7   : >> { %2727 = vpow2.f32 %v1485_v6  ;;  %v1465_v24 = vsub.f32 %v3946_v4, %v1432_v9  ;;  %v1466_v22 = vsub.f32 %v3956_v8, %v1432_v9  ;;  %v1467_v19 = vsub.f32 %v3968_v12, %v1432_v9  ;;  %v4224_v29 = vpop.eup %2725 }
 0x2f8   : >> { %2729 = vpow2.f32 %v1487_v27  ;;  %v1468_v42 = vsub.f32 %v3980_v16, %v1432_v9 }
 0x2f9   : >> { %1605 = vrot.lane.b32.xlu0 %v4211_v14, %s3052_s25  ;;  %2731 = vpow2.f32 %v1489_v62  ;;  %v1517_v35 = vmul.f32 1.442695, %v1465_v24  ;;  %v1519_v37 = vmul.f32 1.442695, %v1466_v22  ;;  %v1521_v51 = vmul.f32 1.442695, %v1467_v19 }
 0x2fa   : >> { %1607 = vrot.lane.b32.xlu1 %v4214_v0, %s3052_s25  ;;  %2733 = vpow2.f32 %v1491_v48  ;;  %v1523_v44 = vmul.f32 1.442695, %v1468_v42 }
 0x2fb   : >> { %2735 = vpow2.f32 %v1517_v35 }
 0x2fc   : >> { %2737 = vpow2.f32 %v1519_v37 }
 0x2fd   : >> { %1609 = vrot.lane.b32.xlu0 %v4221_v57, %s3052_s25  ;;  %2739 = vpow2.f32 %v1521_v51 }
 0x2fe   : >> { %1611 = vrot.lane.b32.xlu1 %v4224_v29, %s3052_s25  ;;  %2741 = vpow2.f32 %v1523_v44 }
 0x302   : >> { %v1426_v6 = vpop.permute.xlu0 %1425 }
 0x303   : >> { %v1453_v27 = vsub.f32 %v3990_v49, %v1426_v6  ;;  %v1454_v62 = vsub.f32 %v4002_v41, %v1426_v6  ;;  %v1455_v9 = vsub.f32 %v4014_v55, %v1426_v6  ;;  %v1456_v48 = vsub.f32 %v4026_v28, %v1426_v6 }
 0x304   : >> { %v4233_v24 = vpop.eup %2727 }
 0x305   : >> { %5266 = vst [vmem:[#allocation129_spill] sm:$0xff] %v4233_v24  ;;  %v4236_v22 = vpop.eup %2729  ;;  %v1493_v34 = vmul.f32 1.442695, %v1453_v27  ;;  %v1495_v35 = vmul.f32 1.442695, %v1454_v62  ;;  %1581 = vrot.lane.b32.xlu0 %v4233_v24, %s3052_s25 }
 0x306   : >> { %5267 = vst [vmem:[#allocation130_spill] sm:$0xff] %v4236_v22  ;;  %1583 = vrot.lane.b32.xlu1 %v4236_v22, %s3052_s25  ;;  %v1497_v19 = vmul.f32 1.442695, %v1455_v9  ;;  %v4242_v42 = vpop.eup %2731  ;;  %v1499_v37 = vmul.f32 1.442695, %v1456_v48 }
 0x307   : >> { %2743 = vpow2.f32 %v1493_v34  ;;  %5268 = vst [vmem:[#allocation131_spill] sm:$0xff] %v4242_v42  ;;  %v4244_v51 = vpop.eup %2733 }
 0x308   : >> { %2745 = vpow2.f32 %v1495_v35  ;;  %5269 = vst [vmem:[#allocation132_spill] sm:$0xff] %v4244_v51  ;;  %v4250_v44 = vpop.eup %2735 }
 0x309   : >> { %1585 = vrot.lane.b32.xlu0 %v4242_v42, %s3052_s25  ;;  %2747 = vpow2.f32 %v1497_v19  ;;  %5270 = vst [vmem:[#allocation133_spill] sm:$0xff] %v4250_v44  ;;  %v4252_v6 = vpop.eup %2737 }
 0x30a   : >> { %1587 = vrot.lane.b32.xlu1 %v4244_v51, %s3052_s25  ;;  %2749 = vpow2.f32 %v1499_v37  ;;  %5271 = vst [vmem:[#allocation134_spill] sm:$0xff] %v4252_v6  ;;  %v4261_v48 = vpop.eup %2739 }
 0x30b   : >> { %5272 = vst [vmem:[#allocation135_spill] sm:$0xff] %v4261_v48  ;;  %v4264_v19 = vpop.eup %2741 }
 0x30c   : >> { %5273 = vst [vmem:[#allocation136_spill] sm:$0xff] %v4264_v19 }
 0x30d   : >> { %1613 = vrot.lane.b32.xlu0 %v4250_v44, %s3052_s25 }
 0x30e   : >> { %1615 = vrot.lane.b32.xlu1 %v4252_v6, %s3052_s25  ;;  %v1434_v34 = vpop.permute.xlu0 %1433 }
 0x30f   : >> { %v1469_v27 = vsub.f32 %v3992_v63, %v1434_v34  ;;  %v1470_v62 = vsub.f32 %v4004_v60, %v1434_v34  ;;  %v1471_v9 = vsub.f32 %v4016_v59, %v1434_v34  ;;  %v1472_v35 = vsub.f32 %v4028_v61, %v1434_v34 }
 0x311   : >> { %v1525_v37 = vmul.f32 1.442695, %v1469_v27  ;;  %v1527_v30 = vmul.f32 1.442695, %v1470_v62  ;;  %1617 = vrot.lane.b32.xlu0 %v4261_v48, %s3052_s25  ;;  %v1529_v6 = vmul.f32 1.442695, %v1471_v9 }
 0x312   : >> { %1619 = vrot.lane.b32.xlu1 %v4264_v19, %s3052_s25  ;;  %v1428_v1 = vpop.permute.xlu1 %1427  ;;  %v1531_v42 = vmul.f32 1.442695, %v1472_v35 }
 0x313   : >> { %2751 = vpow2.f32 %v1525_v37  ;;  %v1457_v44 = vsub.f32 %v4038_v31, %v1428_v1  ;;  %v1458_v34 = vsub.f32 %v4050_v38, %v1428_v1  ;;  %v1459_v27 = vsub.f32 %v4060_v39, %v1428_v1 }
 0x314   : >> { %v4271_v51 = vpop.eup %2743  ;;  %2753 = vpow2.f32 %v1527_v30  ;;  %v1460_v30 = vsub.f32 %v4076_v53, %v1428_v1 }
 0x315   : >> { %5274 = vst [vmem:[#allocation137_spill] sm:$0xff] %v4271_v51  ;;  %v4274_v22 = vpop.eup %2745  ;;  %1589 = vrot.lane.b32.xlu0 %v4271_v51, %s3052_s25  ;;  %2755 = vpow2.f32 %v1529_v6  ;;  %v1501_v62 = vmul.f32 1.442695, %v1457_v44  ;;  %v1503_v35 = vmul.f32 1.442695, %v1458_v34 }
 0x316   : >> { %5275 = vst [vmem:[#allocation138_spill] sm:$0xff] %v4274_v22  ;;  %1591 = vrot.lane.b32.xlu1 %v4274_v22, %s3052_s25  ;;  %v4281_v9 = vpop.eup %2747  ;;  %2757 = vpow2.f32 %v1531_v42  ;;  %v1436_v37 = vpop.permute.xlu1 %1435  ;;  %v1505_v6 = vmul.f32 1.442695, %v1459_v27  ;;  %v1507_v44 = vmul.f32 1.442695, %v1460_v30 }
 0x317   : >> { %5276 = vst [vmem:[#allocation139_spill] sm:$0xff] %v4281_v9  ;;  %v4284_v19 = vpop.eup %2749  ;;  %2759 = vpow2.f32 %v1501_v62  ;;  %v1473_v22 = vsub.f32 %v4040_v36, %v1436_v37  ;;  %v1474_v42 = vsub.f32 %v4052_v17, %v1436_v37  ;;  %v1475_v1 = vsub.f32 %v4070_v18, %v1436_v37 }
 0x318   : >> { %2761 = vpow2.f32 %v1503_v35 }
 0x319   : >> { %1593 = vrot.lane.b32.xlu0 %v4281_v9, %s3052_s25  ;;  %2763 = vpow2.f32 %v1505_v6  ;;  %v1533_v34 = vmul.f32 1.442695, %v1473_v22  ;;  %v1476_v9 = vsub.f32 %v4082_v21, %v1436_v37  ;;  %v1535_v48 = vmul.f32 1.442695, %v1474_v42 }
 0x31a   : >> { %1595 = vrot.lane.b32.xlu1 %v4284_v19, %s3052_s25  ;;  %2765 = vpow2.f32 %v1507_v44  ;;  %v1537_v27 = vmul.f32 1.442695, %v1475_v1  ;;  %v3055_v44 = vmov 0  }
 0x31b   : >> { %2767 = vpow2.f32 %v1533_v34  ;;  %v1539_v22 = vmul.f32 1.442695, %v1476_v9  ;;  %2707 = vset.pattern.permute.xlu1 %v3055_v44  ;;  %2706 = vset.pattern.permute.xlu0 %v3055_v44 }
 0x31c   : >> { %2769 = vpow2.f32 %v1535_v48 }
 0x31d   : >> { %2771 = vpow2.f32 %v1537_v27  ;;  %v1317_v27 = vsub.f32 %v3898_v50, %v4104_v13  ;;  %v1334_v50 = vsub.f32 %v3912_v47, %v4115_v10 }
 0x31e   : >> { %2773 = vpow2.f32 %v1539_v22  ;;  %v1318_v22 = vsub.f32 %v3910_v45, %v4104_v13 }
 0x31f   : >> { %v1349_v44 = vmul.f32 1.442695, %v1317_v27  ;;  %v1335_v27 = vsub.f32 %v3922_v20, %v4115_v10  ;;  %v1322_v20 = vsub.f32 %v3954_v7, %v4131_v46 }
 0x320   : >> { %v4293_v51 = vpop.eup %2751 }
 0x321   : >> { %v4296_v24 = vpop.eup %2753  ;;  %1621 = vrot.lane.b32.xlu0 %v4293_v51, %s3052_s25  ;;  %2775 = vpow2.f32 %v1349_v44 }
 0x322   : >> { %1623 = vrot.lane.b32.xlu1 %v4296_v24, %s3052_s25  ;;  %v4302_v62 = vpop.eup %2755 }
 0x323   : >> { %v4304_v30 = vpop.eup %2757 }
 0x324   : >> { %v4310_v35 = vpop.eup %2759 }
 0x325   : >> { %1625 = vrot.lane.b32.xlu0 %v4302_v62, %s3052_s25  ;;  %v4312_v37 = vpop.eup %2761 }
 0x326   : >> { %1627 = vrot.lane.b32.xlu1 %v4304_v30, %s3052_s25  ;;  %5277 = vst [vmem:[#allocation140_spill] sm:$0xff] %v4312_v37  ;;  %v4318_v48 = vpop.eup %2763 }
 0x327   : >> { %5278 = vst [vmem:[#allocation141_spill] sm:$0xff] %v4318_v48  ;;  %v4320_v9 = vpop.eup %2765 }
 0x328   : >> { %5279 = vst [vmem:[#allocation142_spill] sm:$0xff] %v4320_v9  ;;  %v4326_v6 = vpop.eup %2767 }
 0x329   : >> { %1597 = vrot.lane.b32.xlu0 %v4310_v35, %s3052_s25  ;;  %5280 = vst [vmem:[#allocation143_spill] sm:$0xff] %v4326_v6  ;;  %v4328_v42 = vpop.eup %2769 }
 0x32a   : >> { %1599 = vrot.lane.b32.xlu1 %v4312_v37, %s3052_s25  ;;  %5281 = vst [vmem:[#allocation144_spill] sm:$0xff] %v4328_v42  ;;  %v4334_v1 = vpop.eup %2771 }
 0x32b   : >> { %5282 = vst [vmem:[#allocation145_spill] sm:$0xff] %v4334_v1  ;;  %v4336_v34 = vpop.eup %2773 }
 0x32c   : >> { %5283 = vst [vmem:[#allocation146_spill] sm:$0xff] %v4336_v34 }
 0x32d   : >> { %1601 = vrot.lane.b32.xlu0 %v4318_v48, %s3052_s25 }
 0x32e   : >> { %1603 = vrot.lane.b32.xlu1 %v4320_v9, %s3052_s25  ;;  %v1320_v9 = vsub.f32 %v3932_v25, %v4104_v13  ;;  %v1336_v25 = vsub.f32 %v3934_v23, %v4115_v10 }
 0x331   : >> { %1629 = vrot.lane.b32.xlu0 %v4326_v6, %s3052_s25  ;;  %v1351_v6 = vmul.f32 1.442695, %v1318_v22  ;;  %v1324_v22 = vsub.f32 %v3978_v15, %v4131_v46  ;;  %v1337_v15 = vsub.f32 %v3946_v4, %v4139_v58 }
 0x332   : >> { %1631 = vrot.lane.b32.xlu1 %v4328_v42, %s3052_s25  ;;  %v1319_v42 = vsub.f32 %v3920_v52, %v4104_v13  ;;  %v1383_v52 = vmul.f32 1.442695, %v1334_v50  ;;  %v1385_v13 = vmul.f32 1.442695, %v1335_v27 }
 0x333   : >> { %2777 = vpow2.f32 %v1351_v6 }
 0x334   : >> { %v1353_v48 = vmul.f32 1.442695, %v1319_v42  ;;  %v1387_v42 = vmul.f32 1.442695, %v1336_v25 }
 0x335   : >> { %1633 = vrot.lane.b32.xlu0 %v4334_v1, %s3052_s25  ;;  %v1333_v1 = vsub.f32 %v3900_v2, %v4115_v10  ;;  %v1321_v2 = vsub.f32 %v3944_v3, %v4131_v46 }
 0x336   : >> { %1635 = vrot.lane.b32.xlu1 %v4336_v34, %s3052_s25  ;;  %v1355_v34 = vmul.f32 1.442695, %v1320_v9  ;;  %2779 = vpow2.f32 %v1353_v48  ;;  %v4360_v9 = vpop.eup %2775 }
 0x337   : >> { %v1381_v45 = vmul.f32 1.442695, %v1333_v1  ;;  %v1323_v1 = vsub.f32 %v3966_v11, %v4131_v46  ;;  %v1357_v3 = vmul.f32 1.442695, %v1321_v2 }
 0x338   : >> { %2781 = vpow2.f32 %v1355_v34 }
 0x339   : >> { %2783 = vpow2.f32 %v1381_v45  ;;  %v1359_v45 = vmul.f32 1.442695, %v1322_v20 }
 0x33a   : >> { %2785 = vpow2.f32 %v1383_v52 }
 0x33b   : >> { %2787 = vpow2.f32 %v1385_v13 }
 0x33c   : >> { %2789 = vpow2.f32 %v1387_v42  ;;  %v1361_v42 = vmul.f32 1.442695, %v1323_v1 }
 0x33d   : >> { %2791 = vpow2.f32 %v1357_v3 }
 0x33e   : >> { %2793 = vpow2.f32 %v1359_v45  ;;  %v1339_v45 = vsub.f32 %v3968_v12, %v4139_v58  ;;  %v1325_v12 = vsub.f32 %v3990_v49, %v4159_v54  ;;  %v1327_v49 = vsub.f32 %v4014_v55, %v4159_v54 }
 0x33f   : >> { %2795 = vpow2.f32 %v1361_v42 }
 0x340   : >> { %v4364_v48 = vpop.eup %2777 }
 0x343   : >> { %v4373_v44 = vpop.eup %2779 }
 0x345   : >> { %v4376_v27 = vpop.eup %2781 }
 0x346   : >> { %v4383_v46 = vpop.eup %2783 }
 0x363   : >> { %v1574_v47 = vpop.permute.xlu0 %1573 }
 0x364   : >> { %v1669_v6 = vadd.f32 %v4360_v9, %v1574_v47  ;;  %v1576_v23 = vpop.permute.xlu1 %1575  ;;  %v1363_v47 = vmul.f32 1.442695, %v1324_v22 }
 0x365   : >> { %v1670_v10 = vadd.f32 %v4364_v48, %v1576_v23  ;;  %v1338_v23 = vsub.f32 %v3956_v8, %v4139_v58 }
 0x366   : >> { %v1701_v34 = vsel %vm1212_vm3, %v1669_v6, 0.0  ;;  %2797 = vpow2.f32 %v1363_v47 }
 0x367   : >> { %v1702_v7 = vsel %vm1212_vm3, %v1670_v10, 0.0  ;;  %v1578_v50 = vpop.permute.xlu0 %1577  ;;  %v4387_v10 = vpop.eup %2785 }
 0x368   : >> { %v1671_v52 = vadd.f32 %v4373_v44, %v1578_v50  ;;  %v1580_v25 = vpop.permute.xlu1 %1579  ;;  %v1703_v13 = vadd.f32 %v1702_v7, %v1701_v34  ;;  %v1389_v50 = vmul.f32 1.442695, %v1337_v15 }
 0x369   : >> { %v1672_v11 = vadd.f32 %v4376_v27, %v1580_v25 }
 0x36a   : >> { %v1704_v2 = vsel %vm1212_vm3, %v1671_v52, 0.0  ;;  %v4395_v52 = vpop.eup %2787  ;;  %2799 = vpow2.f32 %v1389_v50 }
 0x36b   : >> { %v1705_v6 = vadd.f32 %v1704_v2, %v1703_v13  ;;  %v1606_v20 = vpop.permute.xlu0 %1605  ;;  %v1706_v34 = vsel %vm1212_vm3, %v1672_v11, 0.0  ;;  %v1391_v11 = vmul.f32 1.442695, %v1338_v23  ;;  %v1340_v2 = vsub.f32 %v3980_v16, %v4139_v58 }
 0x36c   : >> { %v1685_v1 = vadd.f32 %v4383_v46, %v1606_v20  ;;  %v1608_v7 = vpop.permute.xlu1 %1607  ;;  %v1326_v23 = vsub.f32 %v4002_v41, %v4159_v54  ;;  %v1328_v41 = vsub.f32 %v4026_v28, %v4159_v54 }
 0x36d   : >> { %v1707_v3 = vadd.f32 %v1706_v34, %v1705_v6  ;;  %v1686_v22 = vadd.f32 %v4387_v10, %v1608_v7  ;;  %v4400_v6 = vpop.eup %2789  ;;  %v1393_v7 = vmul.f32 1.442695, %v1339_v45  ;;  %2801 = vpow2.f32 %v1391_v11 }
 0x36e   : >> { %v1753_v4 = vsel %vm1212_vm3, %v1685_v1, 0.0 }
 0x36f   : >> { %v1708_v8 = vrot.slane %v1707_v3, 4  ;;  %v1754_v25 = vsel %vm1212_vm3, %v1686_v22, 0.0  ;;  %v1610_v13 = vpop.permute.xlu0 %1609  ;;  %v1395_v22 = vmul.f32 1.442695, %v1340_v2  ;;  %2803 = vpow2.f32 %v1393_v7 }
 0x370   : >> { %v1687_v42 = vadd.f32 %v4395_v52, %v1610_v13  ;;  %v1612_v20 = vpop.permute.xlu1 %1611  ;;  %v1755_v15 = vadd.f32 %v1754_v25, %v1753_v4  ;;  %v1367_v25 = vmul.f32 1.442695, %v1326_v23  ;;  %v1369_v7 = vmul.f32 1.442695, %v1327_v49 }
 0x371   : >> { %v1709_v47 = vadd.f32 %v1708_v8, %v1707_v3  ;;  %v1688_v34 = vadd.f32 %v4400_v6, %v1612_v20  ;;  %v1365_v8 = vmul.f32 1.442695, %v1325_v12  ;;  %2805 = vpow2.f32 %v1395_v22 }
 0x372   : >> { %v1756_v1 = vsel %vm1212_vm3, %v1687_v42, 0.0  ;;  %v4412_v42 = vpop.eup %2791 }
 0x373   : >> { %v1710_v16 = vrot.slane %v1709_v47, 2  ;;  %v1757_v58 = vadd.f32 %v1756_v1, %v1755_v15  ;;  %v1758_v13 = vsel %vm1212_vm3, %v1688_v34, 0.0  ;;  %v4416_v11 = vpop.eup %2793  ;;  %2807 = vpow2.f32 %v1365_v8 }
 0x374   : >> { %v4422_v55 = vpop.eup %2795  ;;  %2809 = vpow2.f32 %v1367_v25  ;;  %v1341_v25 = vsub.f32 %v3992_v63, %v4170_v26  ;;  %v1343_v63 = vsub.f32 %v4016_v59, %v4170_v26 }
 0x375   : >> { %v1711_v3 = vadd.f32 %v1710_v16, %v1709_v47  ;;  %v1759_v4 = vadd.f32 %v1758_v13, %v1757_v58  ;;  %v4425_v23 = vpop.eup %2797  ;;  %v1371_v58 = vmul.f32 1.442695, %v1328_v41 }
 0x377   : >> { %v1712_v50 = vrot.slane %v1711_v3, 1  ;;  %v1760_v45 = vrot.slane %v1759_v4, 4  ;;  %v1582_v20 = vpop.permute.xlu0 %1581 }
 0x378   : >> { %v1673_v2 = vadd.f32 %v4412_v42, %v1582_v20  ;;  %v1584_v47 = vpop.permute.xlu1 %1583 }
 0x379   : >> { %v4419_v15 = vadd.f32 %v1712_v50, %v1711_v3  ;;  %v1761_v34 = vadd.f32 %v1760_v45, %v1759_v4  ;;  %v1674_v12 = vadd.f32 %v4416_v11, %v1584_v47  ;;  %v1342_v50 = vsub.f32 %v4004_v60, %v4170_v26  ;;  %v4436_v45 = vpop.eup %2799 }
 0x37a   : >> { %v1714_v1 = vsel %vm1212_vm3, %v1673_v2, 0.0  ;;  %v4438_v47 = vpop.eup %2801 }
 0x37b   : >> { %2811 = vrcp.f32 %v4419_v15  ;;  %v1762_v28 = vrot.slane %v1761_v34, 2  ;;  %v1715_v54 = vsel %vm1212_vm3, %v1674_v12, 0.0  ;;  %v1586_v16 = vpop.permute.xlu0 %1585 }
 0x37c   : >> { %v1675_v22 = vadd.f32 %v4422_v55, %v1586_v16  ;;  %v1588_v13 = vpop.permute.xlu1 %1587  ;;  %v1716_v4 = vadd.f32 %v1715_v54, %v1714_v1  ;;  %2813 = vpow2.f32 %v1369_v7  ;;  %v1397_v54 = vmul.f32 1.442695, %v1341_v25 }
 0x37d   : >> { %v1763_v3 = vadd.f32 %v1762_v28, %v1761_v34  ;;  %v1676_v8 = vadd.f32 %v4425_v23, %v1588_v13  ;;  %2815 = vpow2.f32 %v1371_v58  ;;  %v1344_v58 = vsub.f32 %v4028_v61, %v4170_v26  ;;  %v4450_v13 = vpop.eup %2803 }
 0x37e   : >> { %v1717_v49 = vsel %vm1212_vm3, %v1675_v22, 0.0  ;;  %v1399_v22 = vmul.f32 1.442695, %v1342_v50  ;;  %v1401_v25 = vmul.f32 1.442695, %v1343_v63  ;;  %v1329_v50 = vsub.f32 %v4038_v31, %v4174_v56 }
 0x37f   : >> { %v1764_v20 = vrot.slane %v1763_v3, 1  ;;  %v1718_v41 = vadd.f32 %v1717_v49, %v1716_v4  ;;  %v1614_v2 = vpop.permute.xlu0 %1613  ;;  %v1719_v34 = vsel %vm1212_vm3, %v1676_v8, 0.0  ;;  %v1331_v31 = vsub.f32 %v4060_v39, %v4174_v56 }
 0x380   : >> { %v1689_v12 = vadd.f32 %v4436_v45, %v1614_v2  ;;  %v1616_v1 = vpop.permute.xlu1 %1615 }
 0x381   : >> { %v4444_v7 = vadd.f32 %v1764_v20, %v1763_v3  ;;  %v1720_v28 = vadd.f32 %v1719_v34, %v1718_v41  ;;  %v1690_v60 = vadd.f32 %v4438_v47, %v1616_v1  ;;  %v4454_v3 = vpop.eup %2805  ;;  %v1330_v1 = vsub.f32 %v4050_v38, %v4174_v56 }
 0x382   : >> { %v1766_v16 = vsel %vm1212_vm3, %v1689_v12, 0.0  ;;  %v4460_v26 = vpop.eup %2807  ;;  %v1403_v12 = vmul.f32 1.442695, %v1344_v58 }
 0x383   : >> { %2817 = vrcp.f32 %v4444_v7  ;;  %v1721_v4 = vrot.slane %v1720_v28, 4  ;;  %v1767_v8 = vsel %vm1212_vm3, %v1690_v60, 0.0  ;;  %v1618_v59 = vpop.permute.xlu0 %1617  ;;  %v4465_v60 = vpop.eup %2809  ;;  %v1375_v39 = vmul.f32 1.442695, %v1330_v1 }
 0x384   : >> { %v1691_v49 = vadd.f32 %v4450_v13, %v1618_v59  ;;  %v1620_v20 = vpop.permute.xlu1 %1619  ;;  %v1768_v2 = vadd.f32 %v1767_v8, %v1766_v16  ;;  %2819 = vpow2.f32 %v1397_v54 }
 0x385   : >> { %v1722_v41 = vadd.f32 %v1721_v4, %v1720_v28  ;;  %v1692_v61 = vadd.f32 %v4454_v3, %v1620_v20  ;;  %2821 = vpow2.f32 %v1399_v22  ;;  %v1332_v28 = vsub.f32 %v4076_v53, %v4174_v56 }
 0x386   : >> { %v1769_v34 = vsel %vm1212_vm3, %v1691_v49, 0.0  ;;  %2823 = vpow2.f32 %v1401_v25  ;;  %v1373_v4 = vmul.f32 1.442695, %v1329_v50  ;;  %v1345_v53 = vsub.f32 %v4040_v36, %v4178_v43 }
 0x387   : >> { %v1723_v63 = vrot.slane %v1722_v41, 2  ;;  %v1770_v59 = vadd.f32 %v1769_v34, %v1768_v2  ;;  %v1590_v37 = vpop.permute.xlu0 %1589  ;;  %v1771_v16 = vsel %vm1212_vm3, %v1692_v61, 0.0  ;;  %2825 = vpow2.f32 %v1403_v12 }
 0x388   : >> { %v2812_v54 = vpop.eup %2811  ;;  %v1677_v22 = vadd.f32 %v4460_v26, %v1590_v37  ;;  %v1592_v58 = vpop.permute.xlu1 %1591  ;;  %2827 = vpow2.f32 %v1373_v4  ;;  %v1377_v12 = vmul.f32 1.442695, %v1331_v31  ;;  %v1405_v31 = vmul.f32 1.442695, %v1345_v53 }
 0x389   : >> { %v1813_v38 = vmul.f32 %v2812_v54, %v4419_v15  ;;  %v1724_v8 = vadd.f32 %v1723_v63, %v1722_v41  ;;  %v1772_v49 = vadd.f32 %v1771_v16, %v1770_v59  ;;  %v1678_v20 = vadd.f32 %v4465_v60, %v1592_v58  ;;  %v4478_v56 = vpop.eup %2813 }
 0x38a   : >> { %v1727_v2 = vsel %vm1212_vm3, %v1677_v22, 0.0  ;;  %v4481_v15 = vpop.eup %2815  ;;  %2829 = vpow2.f32 %v1375_v39  ;;  %v1347_v53 = vsub.f32 %v4070_v18, %v4178_v43 }
 0x38b   : >> { %v1821_v61 = vsub.f32 2.0, %v1813_v38  ;;  %v1725_v37 = vrot.slane %v1724_v8, 1  ;;  %v1773_v34 = vrot.slane %v1772_v49, 4  ;;  %v1728_v25 = vsel %vm1212_vm3, %v1678_v20, 0.0  ;;  %v1594_v50 = vpop.permute.xlu0 %1593 }
 0x38c   : >> { %v1729_v41 = vadd.f32 %v1728_v25, %v1727_v2  ;;  %v1679_v63 = vadd.f32 %v4478_v56, %v1594_v50  ;;  %v1596_v59 = vpop.permute.xlu1 %1595  ;;  %v1379_v38 = vmul.f32 1.442695, %v1332_v28  ;;  %v1346_v20 = vsub.f32 %v4052_v17, %v4178_v43 }
 0x38d   : >> { %v4484_v1 = vadd.f32 %v1725_v37, %v1724_v8  ;;  %v1774_v16 = vadd.f32 %v1773_v34, %v1772_v49  ;;  %v1680_v36 = vadd.f32 %v4481_v15, %v1596_v59  ;;  %v1829_v22 = vmul.f32 %v2812_v54, %v1821_v61 }
 0x38e   : >> { %v1730_v58 = vsel %vm1212_vm3, %v1679_v63, 0.0  ;;  %v1407_v34 = vmul.f32 1.442695, %v1346_v20  ;;  %v1409_v20 = vmul.f32 1.442695, %v1347_v53 }
 0x38f   : >> { %2831 = vrcp.f32 %v4484_v1  ;;  %v1775_v2 = vrot.slane %v1774_v16, 2  ;;  %v1731_v25 = vadd.f32 %v1730_v58, %v1729_v41  ;;  %1877 = vrot.lane.b32.xlu0 %v1829_v22, %s3051_s24  ;;  %v1732_v8 = vsel %vm1212_vm3, %v1680_v36, 0.0 }
 0x390   : >> { %v2818_v4 = vpop.eup %2817  ;;  %v1838_v49 = vmul.f32 %v4364_v48, %v1829_v22  ;;  %v1837_v54 = vmul.f32 %v4360_v9, %v1829_v22  ;;  %v4496_v39 = vmul.f32 %v4376_v27, %v1829_v22  ;;  %2833 = vpow2.f32 %v1377_v12 }
 0x391   : >> { %v1817_v28 = vmul.f32 %v2818_v4, %v4444_v7  ;;  %v1776_v17 = vadd.f32 %v1775_v2, %v1774_v16  ;;  %v1733_v61 = vadd.f32 %v1732_v8, %v1731_v25  ;;  %v4499_v37 = vpop.eup %2819  ;;  %v1348_v48 = vsub.f32 %v4082_v21, %v4178_v43 }
 0x392   : >> { %1942 = vperm.xlu1 %2707, %v1838_v49   ;;  %v4505_v50 = vpop.eup %2821  ;;  %2835 = vpow2.f32 %v1379_v38  ;;  %v1839_v16 = vmul.f32 %v4373_v44, %v1829_v22 }
 0x393   : >> { %v1825_v9 = vsub.f32 2.0, %v1817_v28  ;;  %v1777_v27 = vrot.slane %v1776_v17, 1  ;;  %v1734_v41 = vrot.slane %v1733_v61, 4  ;;  %v1622_v63 = vpop.permute.xlu0 %1621  ;;  %2837 = vpow2.f32 %v1405_v31  ;;  %v4509_v12 = vpop.eup %2823 }
 0x394   : >> { %v1693_v7 = vadd.f32 %v4499_v37, %v1622_v63  ;;  %v1624_v59 = vpop.permute.xlu1 %1623  ;;  %2839 = vpow2.f32 %v1407_v34  ;;  %v1411_v38 = vmul.f32 1.442695, %v1348_v48  ;;  %v4515_v2 = vpop.eup %2825 }
 0x395   : >> { %v4511_v36 = vadd.f32 %v1777_v27, %v1776_v17  ;;  %v1735_v18 = vadd.f32 %v1734_v41, %v1733_v61  ;;  %v1694_v21 = vadd.f32 %v4505_v50, %v1624_v59  ;;  %v1833_v43 = vmul.f32 %v2818_v4, %v1825_v9  ;;  %v4523_v28 = vpop.eup %2827 }
 0x396   : >> { %v1779_v58 = vsel %vm1212_vm3, %v1693_v7, 0.0  ;;  %1947 = vperm.xlu1 %2707, %v1839_v16  }
 0x397   : >> { %2841 = vrcp.f32 %v4511_v36  ;;  %v1736_v44 = vrot.slane %v1735_v18, 2  ;;  %v1780_v22 = vsel %vm1212_vm3, %v1694_v21, 0.0  ;;  %v1626_v25 = vpop.permute.xlu0 %1625  ;;  %1885 = vrot.lane.b32.xlu0 %v1833_v43, %s3051_s24  ;;  %v1853_v31 = vmul.f32 %v4383_v46, %v1833_v43  ;;  %v4528_v9 = vpop.eup %2829 }
 0x398   : >> { %v1695_v4 = vadd.f32 %v4509_v12, %v1626_v25  ;;  %v1628_v8 = vpop.permute.xlu1 %1627  ;;  %v1854_v49 = vmul.f32 %v4387_v10, %v1833_v43  ;;  %v1781_v61 = vadd.f32 %v1780_v22, %v1779_v58  ;;  %v1856_v53 = vmul.f32 %v4400_v6, %v1833_v43 }
 0x399   : >> { %v1737_v17 = vadd.f32 %v1736_v44, %v1735_v18  ;;  %v1696_v34 = vadd.f32 %v4515_v2, %v1628_v8  ;;  %2843 = vpow2.f32 %v1409_v20  ;;  %v1855_v16 = vmul.f32 %v4395_v52, %v1833_v43 }
 0x39a   : >> { %v1782_v48 = vsel %vm1212_vm3, %v1695_v4, 0.0  ;;  %2017 = vperm.xlu1 %2707, %v1853_v31   ;;  %2845 = vpow2.f32 %v1411_v38 }
 0x39b   : >> { %v1738_v46 = vrot.slane %v1737_v17, 1  ;;  %v1783_v27 = vadd.f32 %v1782_v48, %v1781_v61  ;;  %v1598_v41 = vpop.permute.xlu0 %1597  ;;  %1937 = vperm.xlu0 %2706, %v1837_v54   ;;  %v1784_v63 = vsel %vm1212_vm3, %v1696_v34, 0.0 }
 0x39c   : >> { %v2832_v10 = vpop.eup %2831  ;;  %v1681_v7 = vadd.f32 %v4523_v28, %v1598_v41  ;;  %v1600_v59 = vpop.permute.xlu1 %1599 }
 0x39d   : >> { %v1814_v6 = vmul.f32 %v2832_v10, %v4484_v1  ;;  %v4534_v18 = vadd.f32 %v1738_v46, %v1737_v17  ;;  %v1785_v21 = vadd.f32 %v1784_v63, %v1783_v27  ;;  %v1682_v58 = vadd.f32 %v4528_v9, %v1600_v59  ;;  %v4538_v54 = vpop.eup %2833 }
 0x39e   : >> { %v1740_v20 = vsel %vm1212_vm3, %v1681_v7, 0.0  ;;  %2027 = vperm.xlu1 %2707, %v1855_v16  }
 0x39f   : >> { %v1822_v38 = vsub.f32 2.0, %v1814_v6  ;;  %v1786_v44 = vrot.slane %v1785_v21, 4  ;;  %v1741_v22 = vsel %vm1212_vm3, %v1682_v58, 0.0  ;;  %v1602_v25 = vpop.permute.xlu0 %1601  ;;  %1952 = vperm.xlu0 %2706, %v4496_v39   ;;  %v4542_v52 = vpop.eup %2835  ;;  %2847 = vrcp.f32 %v4534_v18 }
 0x3a0   : >> { %v1683_v1 = vadd.f32 %v4538_v54, %v1602_v25  ;;  %v1604_v43 = vpop.permute.xlu1 %1603  ;;  %v4546_v31 = vpop.eup %2837  ;;  %v1742_v8 = vadd.f32 %v1741_v22, %v1740_v20 }
 0x3a1   : >> { %v1787_v4 = vadd.f32 %v1786_v44, %v1785_v21  ;;  %v1684_v17 = vadd.f32 %v4542_v52, %v1604_v43  ;;  %v1830_v61 = vmul.f32 %v2832_v10, %v1822_v38  ;;  %v4550_v48 = vpop.eup %2839 }
 0x3a2   : >> { %v1743_v34 = vsel %vm1212_vm3, %v1683_v1, 0.0 }
 0x3a3   : >> { %v1788_v46 = vrot.slane %v1787_v4, 2  ;;  %v1744_v39 = vadd.f32 %v1743_v34, %v1742_v8  ;;  %v1630_v27 = vpop.permute.xlu0 %1629  ;;  %2022 = vperm.xlu0 %2706, %v1854_v49   ;;  %1879 = vrot.lane.b32.xlu1 %v1830_v61, %s3051_s24  ;;  %v1745_v63 = vsel %vm1212_vm3, %v1684_v17, 0.0  ;;  %v1841_v16 = vmul.f32 %v4412_v42, %v1830_v61 }
 0x3a4   : >> { %v2842_v41 = vpop.eup %2841  ;;  %v1697_v7 = vadd.f32 %v4546_v31, %v1630_v27  ;;  %v1632_v59 = vpop.permute.xlu1 %1631  ;;  %v1843_v10 = vmul.f32 %v4422_v55, %v1830_v61  ;;  %v1842_v8 = vmul.f32 %v4416_v11, %v1830_v61 }
 0x3a5   : >> { %v1818_v6 = vmul.f32 %v2842_v41, %v4511_v36  ;;  %v1789_v21 = vadd.f32 %v1788_v46, %v1787_v4  ;;  %v1746_v58 = vadd.f32 %v1745_v63, %v1744_v39  ;;  %v1698_v20 = vadd.f32 %v4550_v48, %v1632_v59 }
 0x3a6   : >> { %v1792_v49 = vsel %vm1212_vm3, %v1697_v7, 0.0  ;;  %v4560_v38 = vpop.eup %2843 }
 0x3a7   : >> { %v1826_v44 = vsub.f32 2.0, %v1818_v6  ;;  %v1790_v22 = vrot.slane %v1789_v21, 1  ;;  %v1747_v25 = vrot.slane %v1746_v58, 4  ;;  %v1793_v1 = vsel %vm1212_vm3, %v1698_v20, 0.0  ;;  %v1634_v43 = vpop.permute.xlu0 %1633  ;;  %2032 = vperm.xlu0 %2706, %v1856_v53   ;;  %v4563_v42 = vpop.eup %2845 }
 0x3a8   : >> { %v1794_v55 = vadd.f32 %v1793_v1, %v1792_v49  ;;  %v1699_v36 = vadd.f32 %v4560_v38, %v1634_v43  ;;  %v1636_v4 = vpop.permute.xlu1 %1635  ;;  %v1844_v20 = vmul.f32 %v4425_v23, %v1830_v61 }
 0x3a9   : >> { %v1791_v17 = vadd.f32 %v1790_v22, %v1789_v21  ;;  %v1748_v34 = vadd.f32 %v1747_v25, %v1746_v58  ;;  %v1700_v46 = vadd.f32 %v4563_v42, %v1636_v4  ;;  %v1834_v39 = vmul.f32 %v2842_v41, %v1826_v44 }
 0x3aa   : >> { %v1795_v27 = vsel %vm1212_vm3, %v1699_v36, 0.0 }
 0x3ab   : >> { %2849 = vrcp.f32 %v1791_v17  ;;  %v1749_v63 = vrot.slane %v1748_v34, 2  ;;  %v1796_v7 = vadd.f32 %v1795_v27, %v1794_v55  ;;  %1962 = vperm.xlu0 %2706, %v1842_v8   ;;  %1887 = vrot.lane.b32.xlu1 %v1834_v39, %s3051_s24  ;;  %v1797_v53 = vsel %vm1212_vm3, %v1700_v46, 0.0 }
 0x3ac   : >> { %v1857_v59 = vmul.f32 %v4436_v45, %v1834_v39  ;;  %v1859_v6 = vmul.f32 %v4450_v13, %v1834_v39  ;;  %v2848_v11 = vpop.eup %2847  ;;  %v1858_v1 = vmul.f32 %v4438_v47, %v1834_v39  ;;  %v1860_v55 = vmul.f32 %v4454_v3, %v1834_v39 }
 0x3ad   : >> { %v1750_v21 = vadd.f32 %v1749_v63, %v1748_v34  ;;  %v1798_v58 = vadd.f32 %v1797_v53, %v1796_v7  ;;  %v1815_v44 = vmul.f32 %v2848_v11, %v4534_v18 }
 0x3af   : >> { %v1751_v41 = vrot.slane %v1750_v21, 1  ;;  %v1799_v49 = vrot.slane %v1798_v58, 4  ;;  %1972 = vperm.xlu0 %2706, %v1844_v20   ;;  %1957 = vperm.xlu1 %2707, %v1841_v16   ;;  %v1823_v45 = vsub.f32 2.0, %v1815_v44 }
 0x3b1   : >> { %v1752_v22 = vadd.f32 %v1751_v41, %v1750_v21  ;;  %v1800_v25 = vadd.f32 %v1799_v49, %v1798_v58  ;;  %v1831_v4 = vmul.f32 %v2848_v11, %v1823_v45  ;;  %v5286_v45 = vld [vmem:[#allocation131_spill] sm:$0xff] }
 0x3b3   : >> { %v1801_v43 = vrot.slane %v1800_v25, 2  ;;  %1967 = vperm.xlu1 %2707, %v1843_v10   ;;  %2042 = vperm.xlu0 %2706, %v1858_v1   ;;  %2851 = vrcp.f32 %v1752_v22  ;;  %v1845_v47 = vmul.f32 %v4460_v26, %v1831_v4  ;;  %v1847_v34 = vmul.f32 %v4478_v56, %v1831_v4  ;;  %v5285_v1 = vld [vmem:[#allocation130_spill] sm:$0xff] }
 0x3b4   : >> { %v1848_v27 = vmul.f32 %v4481_v15, %v1831_v4 }
 0x3b5   : >> { %v1802_v13 = vadd.f32 %v1801_v43, %v1800_v25  ;;  %v5284_v25 = vld [vmem:[#allocation129_spill] sm:$0xff] }
 0x3b7   : >> { %v1803_v36 = vrot.slane %v1802_v13, 1  ;;  %2052 = vperm.xlu0 %2706, %v1860_v55   ;;  %2037 = vperm.xlu1 %2707, %v1857_v59  }
 0x3b8   : >> { %v2850_v23 = vpop.eup %2849 }
 0x3b9   : >> { %v1819_v61 = vmul.f32 %v2850_v23, %v1791_v17  ;;  %v1804_v16 = vadd.f32 %v1803_v36, %v1802_v13  ;;  %v1846_v17 = vmul.f32 %v4465_v60, %v1831_v4  ;;  %v5287_v13 = vld [vmem:[#allocation132_spill] sm:$0xff] }
 0x3bb   : >> { %v1827_v18 = vsub.f32 2.0, %v1819_v61  ;;  %2853 = vrcp.f32 %v1804_v16  ;;  %2047 = vperm.xlu1 %2707, %v1859_v6   ;;  %1881 = vrot.lane.b32.xlu0 %v1831_v4, %s3051_s24  ;;  %v5288_v61 = vld [vmem:[#allocation133_spill] sm:$0xff]  ;;  %v5289_v4 = vld [vmem:[#allocation134_spill] sm:$0xff] }
 0x3bd   : >> { %v1835_v10 = vmul.f32 %v2850_v23, %v1827_v18 }
 0x3bf   : >> { %1977 = vperm.xlu1 %2707, %v1845_v47   ;;  %1889 = vrot.lane.b32.xlu0 %v1835_v10, %s3051_s24  ;;  %v1862_v3 = vmul.f32 %v4505_v50, %v1835_v10  ;;  %v1864_v8 = vmul.f32 %v4515_v2, %v1835_v10  ;;  %v1861_v26 = vmul.f32 %v4499_v37, %v1835_v10 }
 0x3c0   : >> { %v2852_v46 = vpop.eup %2851  ;;  %v1863_v50 = vmul.f32 %v4509_v12, %v1835_v10  ;;  %v5290_v10 = vld [vmem:[#allocation135_spill] sm:$0xff] }
 0x3c1   : >> { %v1816_v39 = vmul.f32 %v2852_v46, %v1752_v22 }
 0x3c3   : >> { %1987 = vperm.xlu1 %2707, %v1847_v34   ;;  %1982 = vperm.xlu0 %2706, %v1846_v17   ;;  %v1824_v7 = vsub.f32 2.0, %v1816_v39 }
 0x3c5   : >> { %v1832_v56 = vmul.f32 %v2852_v46, %v1824_v7 }
 0x3c7   : >> { %1992 = vperm.xlu0 %2706, %v1848_v27   ;;  %2057 = vperm.xlu1 %2707, %v1861_v26   ;;  %v1850_v37 = vmul.f32 %v4528_v9, %v1832_v56  ;;  %v1852_v6 = vmul.f32 %v4542_v52, %v1832_v56  ;;  %v1849_v12 = vmul.f32 %v4523_v28, %v1832_v56  ;;  %v3056_v9 = vmov 1  }
 0x3c8   : >> { %v2854_v63 = vpop.eup %2853  ;;  %v1851_v11 = vmul.f32 %v4538_v54, %v1832_v56 }
 0x3c9   : >> { %v1820_v53 = vmul.f32 %v2854_v63, %v1804_v16 }
 0x3cb   : >> { %v1828_v2 = vsub.f32 2.0, %v1820_v53  ;;  %2062 = vperm.xlu0 %2706, %v1862_v3   ;;  %2067 = vperm.xlu1 %2707, %v1863_v50   ;;  %v5292_v50 = vld [vmem:[#allocation137_spill] sm:$0xff] }
 0x3cd   : >> { %v1836_v60 = vmul.f32 %v2854_v63, %v1828_v2 }
 0x3cf   : >> { %2072 = vperm.xlu0 %2706, %v1864_v8   ;;  %1883 = vrot.lane.b32.xlu1 %v1832_v56, %s3051_s24  ;;  %v1865_v59 = vmul.f32 %v4546_v31, %v1836_v60  ;;  %v1867_v15 = vmul.f32 %v4560_v38, %v1836_v60  ;;  %v1866_v21 = vmul.f32 %v4550_v48, %v1836_v60  ;;  %v5291_v8 = vld [vmem:[#allocation136_spill] sm:$0xff]  ;;  %v5293_v56 = vld [vmem:[#allocation138_spill] sm:$0xff] }
 0x3d0   : >> { %v1868_v31 = vmul.f32 %v4563_v42, %v1836_v60 }
 0x3d3   : >> { %2002 = vperm.xlu0 %2706, %v1850_v37   ;;  %1891 = vrot.lane.b32.xlu1 %v1836_v60, %s3051_s24 }
 0x3d7   : >> { %2012 = vperm.xlu0 %2706, %v1852_v6   ;;  %1997 = vperm.xlu1 %2707, %v1849_v12  }
 0x3db   : >> { %2007 = vperm.xlu1 %2707, %v1851_v11   ;;  %2082 = vperm.xlu0 %2706, %v1866_v21  }
 0x3df   : >> { %2092 = vperm.xlu0 %2706, %v1868_v31   ;;  %2077 = vperm.xlu1 %2707, %v1865_v59  }
 0x3e3   : >> { %2087 = vperm.xlu1 %2707, %v1867_v15   ;;  %2709 = vset.pattern.permute.xlu0 %v3056_v9  ;;  %v5294_v15 = vld [vmem:[#allocation139_spill] sm:$0xff] }
 0x3e7   : >> { %2708 = vset.pattern.permute.xlu1 %v3056_v9 }
 0x401   : >> { %v1878_v38 = vpop.permute.xlu0 %1877 }
 0x402   : >> { %v1901_v52 = vmul.f32 %v4190_v5, %v1878_v38  ;;  %v1902_v28 = vmul.f32 %v4192_v32, %v1878_v38  ;;  %v1903_v54 = vmul.f32 %v4201_v33, %v1878_v38  ;;  %v1904_v58 = vmul.f32 %v4204_v40, %v1878_v38 }
 0x404   : >> { %2102 = vperm.xlu0 %2709, %v1902_v28   ;;  %2097 = vperm.xlu1 %2708, %v1901_v52  }
 0x408   : >> { %2107 = vperm.xlu1 %2708, %v1903_v54  }
 0x409   : >> { %v1886_v48 = vpop.permute.xlu0 %1885 }
 0x40a   : >> { %v1917_v42 = vmul.f32 %v4211_v14, %v1886_v48  ;;  %v1918_v41 = vmul.f32 %v4214_v0, %v1886_v48  ;;  %v1919_v5 = vmul.f32 %v4221_v57, %v1886_v48  ;;  %v1920_v33 = vmul.f32 %v4224_v29, %v1886_v48  ;;  %v5295_v48 = vld [vmem:[#allocation140_spill] sm:$0xff] }
 0x40c   : >> { %2177 = vperm.xlu0 %2709, %v1917_v42   ;;  %2112 = vperm.xlu1 %2708, %v1904_v58   ;;  %v5297_v42 = vld [vmem:[#allocation142_spill] sm:$0xff] }
 0x40d   : >> { %v4602_v20 = vpop.permute.xlu1 %1942 }
 0x410   : >> { %2187 = vperm.xlu0 %2709, %v1919_v5   ;;  %2182 = vperm.xlu1 %2708, %v1918_v41  }
 0x411   : >> { %v4606_v32 = vpop.permute.xlu1 %1947 }
 0x414   : >> { %2192 = vperm.xlu1 %2708, %v1920_v33  }
 0x415   : >> { %v4609_v49 = vpop.permute.xlu1 %2017 }
 0x416   : >> { %v4611_v40 = vpop.permute.xlu0 %1937 }
 0x419   : >> { %v4613_v14 = vpop.permute.xlu1 %2027 }
 0x41a   : >> { %v4615_v44 = vpop.permute.xlu0 %1952 }
 0x41d   : >> { %v1880_v22 = vpop.permute.xlu1 %1879 }
 0x41e   : >> { %v1905_v0 = vmul.f32 %v5284_v25, %v1880_v22  ;;  %v1906_v57 = vmul.f32 %v5285_v1, %v1880_v22  ;;  %v4619_v43 = vpop.permute.xlu0 %2022  ;;  %v1907_v29 = vmul.f32 %v5286_v45, %v1880_v22  ;;  %v1908_v55 = vmul.f32 %v5287_v13, %v1880_v22  ;;  %v5299_v22 = vld [vmem:[#allocation144_spill] sm:$0xff] }
 0x420   : >> { %2122 = vperm.xlu1 %2708, %v1906_v57   ;;  %2117 = vperm.xlu0 %2709, %v1905_v0   ;;  %v5300_v0 = vld [vmem:[#allocation145_spill] sm:$0xff]  ;;  %v5301_v57 = vld [vmem:[#allocation146_spill] sm:$0xff] }
 0x421   : >> { %v1888_v23 = vpop.permute.xlu1 %1887 }
 0x422   : >> { %v4623_v36 = vpop.permute.xlu0 %2032  ;;  %v1921_v16 = vmul.f32 %v5288_v61, %v1888_v23  ;;  %v1922_v18 = vmul.f32 %v5289_v4, %v1888_v23  ;;  %v1923_v3 = vmul.f32 %v5290_v10, %v1888_v23  ;;  %v1924_v34 = vmul.f32 %v5291_v8, %v1888_v23 }
 0x424   : >> { %2132 = vperm.xlu1 %2708, %v1908_v55   ;;  %2127 = vperm.xlu0 %2709, %v1907_v29  }
 0x426   : >> { %v4627_v47 = vpop.permute.xlu0 %1962 }
 0x428   : >> { %2202 = vperm.xlu1 %2708, %v1922_v18   ;;  %2197 = vperm.xlu0 %2709, %v1921_v16  }
 0x42a   : >> { %v4631_v17 = vpop.permute.xlu0 %1972  ;;  %v4633_v46 = vpop.permute.xlu1 %1957 }
 0x42c   : >> { %2212 = vperm.xlu1 %2708, %v1924_v34   ;;  %2207 = vperm.xlu0 %2709, %v1923_v3  }
 0x42e   : >> { %v4635_v39 = vpop.permute.xlu0 %2042  ;;  %v4637_v27 = vpop.permute.xlu1 %1967 }
 0x432   : >> { %v4639_v26 = vpop.permute.xlu0 %2052  ;;  %v4641_v63 = vpop.permute.xlu1 %2037 }
 0x436   : >> { %v1882_v7 = vpop.permute.xlu0 %1881  ;;  %v4643_v53 = vpop.permute.xlu1 %2047 }
 0x437   : >> { %v1909_v2 = vmul.f32 %v5292_v50, %v1882_v7  ;;  %v1910_v60 = vmul.f32 %v5293_v56, %v1882_v7  ;;  %v1911_v37 = vmul.f32 %v5294_v15, %v1882_v7  ;;  %v1912_v6 = vmul.f32 %v4284_v19, %v1882_v7  ;;  %v5303_v56 = vld [vmem:[#allocation67_spill] sm:$0xff]  ;;  %v5304_v15 = vld [vmem:[#allocation65_spill] sm:$0xff] }
 0x439   : >> { %2142 = vperm.xlu1 %2708, %v1910_v60   ;;  %2137 = vperm.xlu0 %2709, %v1909_v2  }
 0x43a   : >> { %v4647_v59 = vpop.permute.xlu1 %1977  ;;  %v1890_v12 = vpop.permute.xlu0 %1889 }
 0x43b   : >> { %v1925_v21 = vmul.f32 %v4293_v51, %v1890_v12  ;;  %v1926_v31 = vmul.f32 %v4296_v24, %v1890_v12  ;;  %v1927_v38 = vmul.f32 %v4302_v62, %v1890_v12  ;;  %v1928_v52 = vmul.f32 %v4304_v30, %v1890_v12  ;;  %v5296_v24 = vld [vmem:[#allocation141_spill] sm:$0xff]  ;;  %v5298_v62 = vld [vmem:[#allocation143_spill] sm:$0xff] }
 0x43d   : >> { %2152 = vperm.xlu1 %2708, %v1912_v6   ;;  %2147 = vperm.xlu0 %2709, %v1911_v37   ;;  %v5305_v6 = vld [vmem:[#allocation99_spill] sm:$0xff] }
 0x43e   : >> { %v4651_v11 = vpop.permute.xlu1 %1987  ;;  %v4665_v33 = vpop.permute.xlu0 %1982 }
 0x441   : >> { %2222 = vperm.xlu1 %2708, %v1926_v31   ;;  %2217 = vperm.xlu0 %2709, %v1925_v21   ;;  %v5306_v21 = vld [vmem:[#allocation97_spill] sm:$0xff] }
 0x442   : >> { %v4655_v9 = vpop.permute.xlu1 %2057 }
 0x445   : >> { %2232 = vperm.xlu1 %2708, %v1928_v52   ;;  %2227 = vperm.xlu0 %2709, %v1927_v38  }
 0x446   : >> { %v4659_v19 = vpop.permute.xlu1 %2067 }
 0x44a   : >> { %v1884_v28 = vpop.permute.xlu1 %1883 }
 0x44b   : >> { %v1913_v54 = vmul.f32 %v4310_v35, %v1884_v28  ;;  %v1914_v58 = vmul.f32 %v5295_v48, %v1884_v28  ;;  %v1915_v51 = vmul.f32 %v5296_v24, %v1884_v28  ;;  %v1916_v41 = vmul.f32 %v5297_v42, %v1884_v28  ;;  %v4669_v35 = vpop.permute.xlu0 %1992 }
 0x44d   : >> { %2162 = vperm.xlu1 %2708, %v1914_v58   ;;  %2157 = vperm.xlu0 %2709, %v1913_v54   ;;  %v5308_v54 = vld [vmem:[#allocation69_spill] sm:$0xff] }
 0x44e   : >> { %v1892_v5 = vpop.permute.xlu1 %1891  ;;  %v5309_v58 = vld [vmem:[#allocation101_spill] sm:$0xff] }
 0x44f   : >> { %v1929_v30 = vmul.f32 %v5298_v62, %v1892_v5  ;;  %v1930_v25 = vmul.f32 %v5299_v22, %v1892_v5  ;;  %v1931_v1 = vmul.f32 %v5300_v0, %v1892_v5  ;;  %v1932_v45 = vmul.f32 %v5301_v57, %v1892_v5  ;;  %v4673_v29 = vpop.permute.xlu0 %2062  ;;  %v5310_v62 = vld [vmem:[#allocation66_spill] sm:$0xff]  ;;  %v5311_v22 = vld [vmem:[#allocation71_spill] sm:$0xff] }
 0x450   : >> { %v5312_v0 = vld [vmem:[#allocation98_spill] sm:$0xff]  ;;  %v5313_v57 = vld [vmem:[#allocation103_spill] sm:$0xff] }
 0x451   : >> { %2172 = vperm.xlu1 %2708, %v1916_v41   ;;  %2167 = vperm.xlu0 %2709, %v1915_v51  }
 0x452   : >> { %v4679_v23 = vpop.permute.xlu1 %1997 }
 0x453   : >> { %v4675_v13 = vpop.permute.xlu0 %2072 }
 0x455   : >> { %2242 = vperm.xlu1 %2708, %v1930_v25   ;;  %2237 = vperm.xlu0 %2709, %v1929_v30  }
 0x456   : >> { %v4683_v16 = vpop.permute.xlu1 %2007 }
 0x457   : >> { %v4677_v55 = vpop.permute.xlu0 %2002 }
 0x459   : >> { %2252 = vperm.xlu1 %2708, %v1932_v45   ;;  %2247 = vperm.xlu0 %2709, %v1931_v1  }
 0x45a   : >> { %v4687_v18 = vpop.permute.xlu1 %2077 }
 0x45b   : >> { %v4681_v61 = vpop.permute.xlu0 %2012 }
 0x45e   : >> { %v4691_v3 = vpop.permute.xlu1 %2087 }
 0x45f   : >> { %v4685_v4 = vpop.permute.xlu0 %2082 }
 0x463   : >> { %v4689_v10 = vpop.permute.xlu0 %2092 }
 0x47f   : >> { %v2103_v8 = vpop.permute.xlu0 %2102  ;;  %v2098_v34 = vpop.permute.xlu1 %2097 }
 0x480   : >> { %v2256_v50 = vsel %vm314_vm0, %v4602_v20, %v2103_v8  ;;  %v2255_v2 = vsel %vm314_vm0, %v4611_v40, %v2098_v34  ;;  %v5307_v40 = vld [vmem:[#allocation64_spill] sm:$0xff] }
 0x481   : >> { %v2288_v60 = vmul.f32 %v2256_v50, %v5303_v56  ;;  %v2287_v37 = vmul.f32 %v2255_v2, %v5304_v15  ;;  %v5314_v56 = vld [vmem:[#allocation70_spill] sm:$0xff]  ;;  %v5315_v15 = vld [vmem:[#allocation68_spill] sm:$0xff] }
 0x483   : >> { %v2320_v12 = vadd.f32 %v2288_v60, %v5305_v6  ;;  %v2319_v31 = vadd.f32 %v2287_v37, %v5306_v21  ;;  %v2108_v38 = vpop.permute.xlu1 %2107  ;;  %v5316_v6 = vld [vmem:[#allocation102_spill] sm:$0xff]  ;;  %v5317_v21 = vld [vmem:[#allocation100_spill] sm:$0xff] }
 0x484   : >> { %v2257_v20 = vsel %vm314_vm0, %v4606_v32, %v2108_v38 }
 0x485   : >> { %v2358_v52 = vadd.f32 %v5307_v40, %v2320_v12  ;;  %v2357_v28 = vadd.f32 %v5307_v40, %v2319_v31  ;;  %v2289_v48 = vmul.f32 %v2257_v20, %v5308_v54  ;;  %v5319_v54 = vld [vmem:[#allocation104_spill] sm:$0xff] }
 0x487   : >> { %2392 = vst [vmem:[%s4705_s11 + $0x8] sm:$0xff] %v2358_v52  ;;  %2391 = vst [vmem:[%s4705_s11] sm:$0xff] %v2357_v28  ;;  %v2321_v24 = vadd.f32 %v2289_v48, %v5309_v58  ;;  %v2178_v51 = vpop.permute.xlu0 %2177  ;;  %v2113_v42 = vpop.permute.xlu1 %2112  ;;  %v5318_v52 = vld [vmem:[#allocation72_spill] sm:$0xff] }
 0x488   : >> { %v2271_v41 = vsel %vm314_vm0, %v4609_v49, %v2178_v51  ;;  %v2258_v32 = vsel %vm314_vm0, %v4615_v44, %v2113_v42 }
 0x489   : >> { %v2359_v5 = vadd.f32 %v5307_v40, %v2321_v24  ;;  %v2303_v30 = vmul.f32 %v2271_v41, %v5310_v62  ;;  %v2290_v25 = vmul.f32 %v2258_v32, %v5311_v22  ;;  %v5320_v41 = vld [vmem:[#allocation73_spill] sm:$0xff] }
 0x48b   : >> { %2393 = vst [vmem:[%s4705_s11 + $0x10] sm:$0xff] %v2359_v5  ;;  %v2335_v1 = vadd.f32 %v2303_v30, %v5312_v0  ;;  %v2322_v45 = vadd.f32 %v2290_v25, %v5313_v57  ;;  %v2188_v8 = vpop.permute.xlu0 %2187  ;;  %v2183_v34 = vpop.permute.xlu1 %2182  ;;  %v5321_v5 = vld [vmem:[#allocation75_spill] sm:$0xff]  ;;  %v5322_v30 = vld [vmem:[#allocation105_spill] sm:$0xff] }
 0x48c   : >> { %v2273_v49 = vsel %vm314_vm0, %v4613_v14, %v2188_v8  ;;  %v2272_v44 = vsel %vm314_vm0, %v4619_v43, %v2183_v34  ;;  %v5323_v25 = vld [vmem:[#allocation107_spill] sm:$0xff]  ;;  %v5324_v34 = vld [vmem:[#allocation77_spill] sm:$0xff] }
 0x48d   : >> { %v2373_v50 = vadd.f32 %v5307_v40, %v2335_v1  ;;  %v2360_v2 = vadd.f32 %v5307_v40, %v2322_v45  ;;  %v2305_v60 = vmul.f32 %v2273_v49, %v5314_v56  ;;  %v2304_v37 = vmul.f32 %v2272_v44, %v5315_v15  ;;  %v5325_v44 = vld [vmem:[#allocation79_spill] sm:$0xff] }
 0x48f   : >> { %2407 = vst [vmem:[%s4705_s11 + $0x80] sm:$0xff] %v2373_v50  ;;  %2394 = vst [vmem:[%s4705_s11 + $0x18] sm:$0xff] %v2360_v2  ;;  %v2337_v12 = vadd.f32 %v2305_v60, %v5316_v6  ;;  %v2336_v14 = vadd.f32 %v2304_v37, %v5317_v21  ;;  %v2193_v31 = vpop.permute.xlu1 %2192  ;;  %v5326_v2 = vld [vmem:[#allocation109_spill] sm:$0xff]  ;;  %v5327_v60 = vld [vmem:[#allocation111_spill] sm:$0xff] }
 0x490   : >> { %v2274_v43 = vsel %vm314_vm0, %v4623_v36, %v2193_v31 }
 0x491   : >> { %v2375_v38 = vadd.f32 %v5307_v40, %v2337_v12  ;;  %v2374_v20 = vadd.f32 %v5307_v40, %v2336_v14  ;;  %v2306_v28 = vmul.f32 %v2274_v43, %v5318_v52  ;;  %v5328_v14 = vld [vmem:[#allocation74_spill] sm:$0xff]  ;;  %v5329_v43 = vld [vmem:[#allocation76_spill] sm:$0xff] }
 0x493   : >> { %2409 = vst [vmem:[%s4705_s11 + $0x90] sm:$0xff] %v2375_v38  ;;  %2408 = vst [vmem:[%s4705_s11 + $0x88] sm:$0xff] %v2374_v20  ;;  %v2338_v48 = vadd.f32 %v2306_v28, %v5319_v54  ;;  %v5330_v20 = vld [vmem:[#allocation106_spill] sm:$0xff]  ;;  %v5331_v28 = vld [vmem:[#allocation108_spill] sm:$0xff] }
 0x495   : >> { %v2376_v58 = vadd.f32 %v5307_v40, %v2338_v48 }
 0x497   : >> { %2410 = vst [vmem:[%s4705_s11 + $0x98] sm:$0xff] %v2376_v58 }
 0x49b   : >> { %v2118_v24 = vpop.permute.xlu0 %2117  ;;  %v2123_v51 = vpop.permute.xlu1 %2122 }
 0x49c   : >> { %v2259_v36 = vsel %vm314_vm0, %v4633_v46, %v2118_v24  ;;  %v2260_v42 = vsel %vm314_vm0, %v4627_v47, %v2123_v51 }
 0x49d   : >> { %v2291_v32 = vmul.f32 %v2259_v36, %v5320_v41  ;;  %v2292_v62 = vmul.f32 %v2260_v42, %v5321_v5  ;;  %v5332_v36 = vld [vmem:[#allocation78_spill] sm:$0xff]  ;;  %v5333_v41 = vld [vmem:[#allocation80_spill] sm:$0xff] }
 0x49e   : >> { %v5334_v5 = vld [vmem:[#allocation110_spill] sm:$0xff] }
 0x49f   : >> { %v2323_v22 = vadd.f32 %v2291_v32, %v5322_v30  ;;  %v2324_v0 = vadd.f32 %v2292_v62, %v5323_v25  ;;  %v2128_v1 = vpop.permute.xlu0 %2127  ;;  %v2133_v57 = vpop.permute.xlu1 %2132  ;;  %v5335_v30 = vld [vmem:[#allocation112_spill] sm:$0xff] }
 0x4a0   : >> { %v2261_v45 = vsel %vm314_vm0, %v4637_v27, %v2128_v1  ;;  %v2262_v46 = vsel %vm314_vm0, %v4631_v17, %v2133_v57 }
 0x4a1   : >> { %v2361_v47 = vadd.f32 %v5307_v40, %v2323_v22  ;;  %v2362_v8 = vadd.f32 %v5307_v40, %v2324_v0  ;;  %v2293_v49 = vmul.f32 %v2261_v45, %v5324_v34  ;;  %v2294_v50 = vmul.f32 %v2262_v46, %v5325_v44  ;;  %v5336_v45 = vld [vmem:[#allocation81_spill] sm:$0xff]  ;;  %v5339_v44 = vld [vmem:[#allocation115_spill] sm:$0xff] }
 0x4a2   : >> { %v5338_v34 = vld [vmem:[#allocation113_spill] sm:$0xff] }
 0x4a3   : >> { %2395 = vst [vmem:[%s4705_s11 + $0x20] sm:$0xff] %v2361_v47  ;;  %2396 = vst [vmem:[%s4705_s11 + $0x28] sm:$0xff] %v2362_v8  ;;  %v2325_v56 = vadd.f32 %v2293_v49, %v5326_v2  ;;  %v2326_v27 = vadd.f32 %v2294_v50, %v5327_v60  ;;  %v2198_v15 = vpop.permute.xlu0 %2197  ;;  %v2203_v37 = vpop.permute.xlu1 %2202  ;;  %v5337_v47 = vld [vmem:[#allocation83_spill] sm:$0xff] }
 0x4a4   : >> { %v2275_v17 = vsel %vm314_vm0, %v4641_v63, %v2198_v15  ;;  %v2276_v6 = vsel %vm314_vm0, %v4635_v39, %v2203_v37  ;;  %v5340_v15 = vld [vmem:[#allocation85_spill] sm:$0xff] }
 0x4a5   : >> { %v2363_v12 = vadd.f32 %v5307_v40, %v2325_v56  ;;  %v2364_v21 = vadd.f32 %v5307_v40, %v2326_v27  ;;  %v2307_v31 = vmul.f32 %v2275_v17, %v5328_v14  ;;  %v2308_v38 = vmul.f32 %v2276_v6, %v5329_v43  ;;  %v5341_v17 = vld [vmem:[#allocation87_spill] sm:$0xff] }
 0x4a6   : >> { %v5343_v14 = vld [vmem:[#allocation119_spill] sm:$0xff] }
 0x4a7   : >> { %2397 = vst [vmem:[%s4705_s11 + $0x30] sm:$0xff] %v2363_v12  ;;  %2398 = vst [vmem:[%s4705_s11 + $0x38] sm:$0xff] %v2364_v21  ;;  %v2339_v52 = vadd.f32 %v2307_v31, %v5330_v20  ;;  %v2340_v63 = vadd.f32 %v2308_v38, %v5331_v28  ;;  %v2208_v54 = vpop.permute.xlu0 %2207  ;;  %v2213_v39 = vpop.permute.xlu1 %2212  ;;  %v5342_v12 = vld [vmem:[#allocation117_spill] sm:$0xff]  ;;  %v5344_v28 = vld [vmem:[#allocation82_spill] sm:$0xff] }
 0x4a8   : >> { %v2277_v48 = vsel %vm314_vm0, %v4643_v53, %v2208_v54  ;;  %v2278_v58 = vsel %vm314_vm0, %v4639_v26, %v2213_v39  ;;  %v5345_v54 = vld [vmem:[#allocation84_spill] sm:$0xff] }
 0x4a9   : >> { %v2377_v24 = vadd.f32 %v5307_v40, %v2339_v52  ;;  %v2378_v51 = vadd.f32 %v5307_v40, %v2340_v63  ;;  %v2309_v42 = vmul.f32 %v2277_v48, %v5332_v36  ;;  %v2310_v32 = vmul.f32 %v2278_v58, %v5333_v41  ;;  %v5346_v48 = vld [vmem:[#allocation114_spill] sm:$0xff] }
 0x4ab   : >> { %2411 = vst [vmem:[%s4705_s11 + $0xa0] sm:$0xff] %v2377_v24  ;;  %2412 = vst [vmem:[%s4705_s11 + $0xa8] sm:$0xff] %v2378_v51  ;;  %v2341_v62 = vadd.f32 %v2309_v42, %v5334_v5  ;;  %v2342_v22 = vadd.f32 %v2310_v32, %v5335_v30  ;;  %v5347_v24 = vld [vmem:[#allocation116_spill] sm:$0xff]  ;;  %v5348_v5 = vld [vmem:[#allocation86_spill] sm:$0xff] }
 0x4ac   : >> { %v5349_v30 = vld [vmem:[#allocation88_spill] sm:$0xff] }
 0x4ad   : >> { %v2379_v53 = vadd.f32 %v5307_v40, %v2341_v62  ;;  %v2380_v25 = vadd.f32 %v5307_v40, %v2342_v22 }
 0x4af   : >> { %2413 = vst [vmem:[%s4705_s11 + $0xb0] sm:$0xff] %v2379_v53  ;;  %2414 = vst [vmem:[%s4705_s11 + $0xb8] sm:$0xff] %v2380_v25  ;;  %v5350_v53 = vld [vmem:[#allocation118_spill] sm:$0xff] }
 0x4b4   : >> { %v2138_v26 = vpop.permute.xlu0 %2137  ;;  %v2143_v0 = vpop.permute.xlu1 %2142 }
 0x4b5   : >> { %v2263_v1 = vsel %vm314_vm0, %v4647_v59, %v2138_v26  ;;  %v2264_v57 = vsel %vm314_vm0, %v4665_v33, %v2143_v0  ;;  %v5351_v26 = vld [vmem:[#allocation120_spill] sm:$0xff] }
 0x4b6   : >> { %v2295_v46 = vmul.f32 %v2263_v1, %v5336_v45  ;;  %v2296_v8 = vmul.f32 %v2264_v57, %v5337_v47  ;;  %v5352_v47 = vld [vmem:[#allocation89_spill] sm:$0xff] }
 0x4b8   : >> { %v2327_v49 = vadd.f32 %v2295_v46, %v5338_v34  ;;  %v2328_v50 = vadd.f32 %v2296_v8, %v5339_v44  ;;  %v2148_v2 = vpop.permute.xlu0 %2147  ;;  %v2153_v56 = vpop.permute.xlu1 %2152  ;;  %v5353_v34 = vld [vmem:[#allocation91_spill] sm:$0xff]  ;;  %v5354_v44 = vld [vmem:[#allocation121_spill] sm:$0xff] }
 0x4b9   : >> { %v2265_v60 = vsel %vm314_vm0, %v4651_v11, %v2148_v2  ;;  %v2266_v59 = vsel %vm314_vm0, %v4669_v35, %v2153_v56  ;;  %v5355_v2 = vld [vmem:[#allocation123_spill] sm:$0xff] }
 0x4ba   : >> { %v2365_v33 = vadd.f32 %v5307_v40, %v2327_v49  ;;  %v2366_v27 = vadd.f32 %v5307_v40, %v2328_v50  ;;  %v2297_v37 = vmul.f32 %v2265_v60, %v5340_v15  ;;  %v2298_v6 = vmul.f32 %v2266_v59, %v5341_v17  ;;  %v5356_v15 = vld [vmem:[#allocation93_spill] sm:$0xff]  ;;  %v5357_v17 = vld [vmem:[#allocation95_spill] sm:$0xff] }
 0x4bc   : >> { %2399 = vst [vmem:[%s4705_s11 + $0x40] sm:$0xff] %v2365_v33  ;;  %2400 = vst [vmem:[%s4705_s11 + $0x48] sm:$0xff] %v2366_v27  ;;  %v2329_v21 = vadd.f32 %v2297_v37, %v5342_v12  ;;  %v2330_v11 = vadd.f32 %v2298_v6, %v5343_v14  ;;  %v2218_v31 = vpop.permute.xlu0 %2217  ;;  %v2223_v43 = vpop.permute.xlu1 %2222  ;;  %v5358_v12 = vld [vmem:[#allocation125_spill] sm:$0xff]  ;;  %v5359_v14 = vld [vmem:[#allocation127_spill] sm:$0xff] }
 0x4bd   : >> { %v2279_v35 = vsel %vm314_vm0, %v4655_v9, %v2218_v31  ;;  %v2280_v38 = vsel %vm314_vm0, %v4673_v29, %v2223_v43 }
 0x4be   : >> { %v2367_v20 = vadd.f32 %v5307_v40, %v2329_v21  ;;  %v2368_v52 = vadd.f32 %v5307_v40, %v2330_v11  ;;  %v2311_v63 = vmul.f32 %v2279_v35, %v5344_v28  ;;  %v2312_v39 = vmul.f32 %v2280_v38, %v5345_v54  ;;  %v5361_v28 = vld [vmem:[#allocation92_spill] sm:$0xff]  ;;  %v5362_v54 = vld [vmem:[#allocation122_spill] sm:$0xff] }
 0x4c0   : >> { %2401 = vst [vmem:[%s4705_s11 + $0x50] sm:$0xff] %v2367_v20  ;;  %2402 = vst [vmem:[%s4705_s11 + $0x58] sm:$0xff] %v2368_v52  ;;  %v2343_v58 = vadd.f32 %v2311_v63, %v5346_v48  ;;  %v2344_v9 = vadd.f32 %v2312_v39, %v5347_v24  ;;  %v2228_v51 = vpop.permute.xlu0 %2227  ;;  %v2233_v29 = vpop.permute.xlu1 %2232  ;;  %v5360_v20 = vld [vmem:[#allocation90_spill] sm:$0xff]  ;;  %v5363_v48 = vld [vmem:[#allocation124_spill] sm:$0xff] }
 0x4c1   : >> { %v2281_v36 = vsel %vm314_vm0, %v4659_v19, %v2228_v51  ;;  %v2282_v42 = vsel %vm314_vm0, %v4675_v13, %v2233_v29 }
 0x4c2   : >> { %v2381_v41 = vadd.f32 %v5307_v40, %v2343_v58  ;;  %v2382_v32 = vadd.f32 %v5307_v40, %v2344_v9  ;;  %v2313_v62 = vmul.f32 %v2281_v36, %v5348_v5  ;;  %v2314_v22 = vmul.f32 %v2282_v42, %v5349_v30  ;;  %v5364_v36 = vld [vmem:[#allocation94_spill] sm:$0xff]  ;;  %v5367_v30 = vld [vmem:[#allocation128_spill] sm:$0xff] }
 0x4c3   : >> { %v5366_v5 = vld [vmem:[#allocation126_spill] sm:$0xff] }
 0x4c4   : >> { %2415 = vst [vmem:[%s4705_s11 + $0xc0] sm:$0xff] %v2381_v41  ;;  %2416 = vst [vmem:[%s4705_s11 + $0xc8] sm:$0xff] %v2382_v32  ;;  %v2345_v25 = vadd.f32 %v2313_v62, %v5350_v53  ;;  %v2346_v0 = vadd.f32 %v2314_v22, %v5351_v26  ;;  %v5365_v41 = vld [vmem:[#allocation96_spill] sm:$0xff] }
 0x4c6   : >> { %v2383_v19 = vadd.f32 %v5307_v40, %v2345_v25  ;;  %v2384_v1 = vadd.f32 %v5307_v40, %v2346_v0 }
 0x4c8   : >> { %2417 = vst [vmem:[%s4705_s11 + $0xd0] sm:$0xff] %v2383_v19  ;;  %2418 = vst [vmem:[%s4705_s11 + $0xd8] sm:$0xff] %v2384_v1  ;;  %v2158_v13 = vpop.permute.xlu0 %2157  ;;  %v2163_v57 = vpop.permute.xlu1 %2162 }
 0x4c9   : >> { %v2267_v45 = vsel %vm314_vm0, %v4679_v23, %v2158_v13  ;;  %v2268_v46 = vsel %vm314_vm0, %v4677_v55, %v2163_v57 }
 0x4ca   : >> { %v2299_v8 = vmul.f32 %v2267_v45, %v5352_v47  ;;  %v2300_v49 = vmul.f32 %v2268_v46, %v5353_v34 }
 0x4cc   : >> { %v2331_v50 = vadd.f32 %v2299_v8, %v5354_v44  ;;  %v2332_v56 = vadd.f32 %v2300_v49, %v5355_v2  ;;  %v2168_v60 = vpop.permute.xlu0 %2167  ;;  %v2173_v59 = vpop.permute.xlu1 %2172 }
 0x4cd   : >> { %v2269_v33 = vsel %vm314_vm0, %v4683_v16, %v2168_v60  ;;  %v2270_v23 = vsel %vm314_vm0, %v4681_v61, %v2173_v59 }
 0x4ce   : >> { %v2369_v55 = vadd.f32 %v5307_v40, %v2331_v50  ;;  %v2370_v27 = vadd.f32 %v5307_v40, %v2332_v56  ;;  %v2301_v37 = vmul.f32 %v2269_v33, %v5356_v15  ;;  %v2302_v6 = vmul.f32 %v2270_v23, %v5357_v17 }
 0x4d0   : >> { %2403 = vst [vmem:[%s4705_s11 + $0x60] sm:$0xff] %v2369_v55  ;;  %2404 = vst [vmem:[%s4705_s11 + $0x68] sm:$0xff] %v2370_v27  ;;  %v2333_v21 = vadd.f32 %v2301_v37, %v5358_v12  ;;  %v2334_v16 = vadd.f32 %v2302_v6, %v5359_v14  ;;  %v2238_v11 = vpop.permute.xlu0 %2237  ;;  %v2243_v31 = vpop.permute.xlu1 %2242 }
 0x4d1   : >> { %v2283_v61 = vsel %vm314_vm0, %v4687_v18, %v2238_v11  ;;  %v2284_v43 = vsel %vm314_vm0, %v4685_v4, %v2243_v31 }
 0x4d2   : >> { %v2371_v35 = vadd.f32 %v5307_v40, %v2333_v21  ;;  %v2372_v38 = vadd.f32 %v5307_v40, %v2334_v16  ;;  %v2315_v52 = vmul.f32 %v2283_v61, %v5360_v20  ;;  %v2316_v63 = vmul.f32 %v2284_v43, %v5361_v28 }
 0x4d4   : >> { %2405 = vst [vmem:[%s4705_s11 + $0x70] sm:$0xff] %v2371_v35  ;;  %2406 = vst [vmem:[%s4705_s11 + $0x78] sm:$0xff] %v2372_v38  ;;  %v2347_v39 = vadd.f32 %v2315_v52, %v5362_v54  ;;  %v2348_v18 = vadd.f32 %v2316_v63, %v5363_v48  ;;  %v2248_v58 = vpop.permute.xlu0 %2247  ;;  %v2253_v4 = vpop.permute.xlu1 %2252 }
 0x4d5   : >> { %v2285_v24 = vsel %vm314_vm0, %v4691_v3, %v2248_v58  ;;  %v2286_v9 = vsel %vm314_vm0, %v4689_v10, %v2253_v4 }
 0x4d6   : >> { %v2385_v51 = vadd.f32 %v5307_v40, %v2347_v39  ;;  %v2386_v29 = vadd.f32 %v5307_v40, %v2348_v18  ;;  %v2317_v42 = vmul.f32 %v2285_v24, %v5364_v36  ;;  %v2318_v32 = vmul.f32 %v2286_v9, %v5365_v41 }
 0x4d8   : >> { %2419 = vst [vmem:[%s4705_s11 + $0xe0] sm:$0xff] %v2385_v51  ;;  %2420 = vst [vmem:[%s4705_s11 + $0xe8] sm:$0xff] %v2386_v29  ;;  %v2349_v62 = vadd.f32 %v2317_v42, %v5366_v5  ;;  %v2350_v22 = vadd.f32 %v2318_v32, %v5367_v30  ;;  %320 = sbr.rel (!%p318_p7) target bundleno = 132 (0x84), region = 105 }
 0x4da   : >> { %v2387_v3 = vadd.f32 %v5307_v40, %v2349_v62  ;;  %v2388_v53 = vadd.f32 %v5307_v40, %v2350_v22 }
 0x4dc   : >> { %2421 = vst [vmem:[%s4705_s11 + $0xf0] sm:$0xff] %v2387_v3  ;;  %2422 = vst [vmem:[%s4705_s11 + $0xf8] sm:$0xff] %v2388_v53 }
 0x4dd   : > { %2974 = shalt.err (!%p2971_p1)
}
 0x4de   : > { %s2975_s21 = scalar_lea.hbm %s4928_s29, 32768  ;;  %s2979_s24 = scalar_lea.hbm %s4977_s4, 98304 }
 0x4df   : > { %p2976_p4 = scmp.ne.s32.totalorder %s4928_s29, %s2975_s21  ;;  %p2980_p5 = scmp.lt.s32.totalorder %s4928_s29, %s4977_s4 }
 0x4e0   : > { %p2981_p10 = scmp.lt.s32.totalorder %s2979_s24, %s2975_s21 }
 0x4e1   : > { %p2977_p6 = pnand %p2976_p4, %p5368_p12 }
 0x4e2   : > { %p2982_p7 = por %p2981_p10, %p2980_p5 }
 0x4e3   : > { %p2978_p8 = pneg %p2977_p6 }
 0x4e5   : > { %p2983_p11 = pnand %p2982_p7, %p2978_p8 }
 0x4e7   : > { %2986 = shalt.err (!%p2983_p11)
}
 0x4e8   : > { %s3058_s11 = smov 128   ;;  %s3059_s8 = smov 8  }
 0x4e9   : > { %2623 = dma.vmem_to_hbm [thread:$0]  (%p5368_p12), %s4931_s6, 32768, %s4928_s29, %s2424_s9, %s3058_s11, %s3058_s11, %s3059_s8  }
 0x4ea PF: > { %p2650_p13 = scmp.ge.s32.totalorder %s3037_s18, 2  ;;  %s2453_s12 = sand.u32 1, %s3025_s15  }
 0x4eb   : > { %p5369_p3 = scmp.ne.s32.totalorder %s5088_s22, 0  ;;  %s2454_s14 = scalar_lea.sflag [#allocation4], %s2453_s12 }
 0x4ed   : > { %p2640_p0 = pnand %p2650_p13, %p5369_p3 }
 0x4ef   : > { %p2641_p2 = pneg %p2640_p0 }
 0x4f1   : > { %3020 = dma.done.wait (%p2641_p2), %s2454_s14, 32768  }
 0x4f2   : > { %3022 = vsyncadd (%p2641_p2), %s2454_s14, 4294934528  ;;  %p19_p9 = scmp.ge.s32.totalorder %s3159_s20, 5   ;;  %s5370_s15 = smov %s3029_s16 }
 0x4f3   : > { %s5371_s16 = smov %s3033_s17  ;;  %s5372_s17 = smov %s3177_s26 }
 0x4f4   : > { %s5373_s18 = smov %s3159_s20  ;;  %21 = sbr.rel (!%p19_p9) target bundleno = 7 (0x7), region = 116 }
 0x4f9   :  { %2459 = vsyncpa [#allocation3], 1 }
 0x4fa   :  { %2461 = vsyncpa [#allocation3 + $0x1], 1 }
 0x4fb   :  { %2462 = vsyncpa [#allocation6], 1 }
 0x4fc   :  { %2463 = vsyncpa [#allocation9], 1 }
 0x4fd   :  { %2464 = vsyncpa [#allocation4], 1 }
 0x4fe   :  { %2466 = vsyncpa [#allocation4 + $0x1], 1 }

</bundles_post_ra>
